<compile_context>
chip_gen: v7x
topology: tpu7x:2x2x1
jax: 0.10.0
libtpu: 0.0.40
codegen_flags: <defaults>
</compile_context>

<pallas_src>
import functools

import jax
import jax.numpy as jnp
from jax import lax
from jax.experimental import pallas as pl
from jax.experimental.pallas import tpu as pltpu


def bigru_attention_kernel(
    x_ref,        # (T, Bt, I)   f32
    len_ref,      # (Bt, 1)      i32  sequence lengths (descending over the batch)
    wih_f_ref,    # (I, 3H)      fused input->hidden weights, gate order r|z|n
    whh_f_ref,    # (H, 3H)      fused hidden->hidden weights
    bi_f_ref,     # (1, 3H)      bih + [bhh_r | bhh_z | 0]  (folded biases)
    bhn_f_ref,    # (1, H)       bhh_n (kept separate: it is multiplied by r)
    wih_b_ref, whh_b_ref, bi_b_ref, bhn_b_ref,   # same, backward direction
    wlin_f_ref,   # (H, 2H)      rows 0:H   of lin.weight.T  (applied to forward h)
    wlin_b_ref,   # (H, 2H)      rows H:2H  of lin.weight.T  (applied to backward h)
    blin_ref,     # (1, 2H)
    watt_ref,     # (1, 2H)      attention weight as a row (score = <e, watt>)
    out_ref,      # (Bt, 2H)
    gi_f_ref,     # scratch (T, Bt, 3H)  hoisted input projections, fwd
    gi_b_ref,     # scratch (T, Bt, 3H)  hoisted input projections, bwd
    hf_ref,       # scratch (T, Bt, H)   forward hidden states
    hb_ref,       # scratch (T, Bt, H)   backward hidden states
    *, T, B, H):
  f32 = jnp.float32
  len_col = len_ref[...]                                   # (B, 1) int32
  I = x_ref.shape[-1]

  # ---------- hoisted input projections: one big matmul per direction ----------
  x2 = x_ref[...].reshape(T * B, I)                        # lane dim preserved
  gi_f_ref[...] = (jnp.dot(x2, wih_f_ref[...], preferred_element_type=f32)
                   + bi_f_ref[...]).reshape(T, B, 3 * H)
  gi_b_ref[...] = (jnp.dot(x2, wih_b_ref[...], preferred_element_type=f32)
                   + bi_b_ref[...]).reshape(T, B, 3 * H)

  # ---------- fused bidirectional recurrence (one unrolled loop) ----------
  whh_f = whh_f_ref[...]; bhn_f = bhn_f_ref[...]
  whh_b = whh_b_ref[...]; bhn_b = bhn_b_ref[...]

  def gru_cell(gi, h, whh, bhn):
    gh = jnp.dot(h, whh, preferred_element_type=f32)                  # (B, 3H)
    r = jax.nn.sigmoid(gi[:, 0:H] + gh[:, 0:H])
    z = jax.nn.sigmoid(gi[:, H:2 * H] + gh[:, H:2 * H])
    n = jnp.tanh(gi[:, 2 * H:3 * H] + r * (gh[:, 2 * H:3 * H] + bhn))
    return (1.0 - z) * n + z * h

  h0 = jnp.zeros((B, H), f32)

  def rnn_body(i, carry):
    hf, hb = carry
    tb = T - 1 - i
    # forward chain at time i — packed-seq semantics: padded steps output 0
    hf_new = jnp.where(i < len_col, gru_cell(gi_f_ref[i], hf, whh_f, bhn_f), 0.0)
    hf_ref[i] = hf_new
    # backward chain at time T-1-i — independent chain, interleaved to hide latency
    hb_new = jnp.where(tb < len_col, gru_cell(gi_b_ref[tb], hb, whh_b, bhn_b), 0.0)
    hb_ref[tb] = hb_new
    return (hf_new, hb_new)
  lax.fori_loop(0, T, rnn_body, (h0, h0), unroll=True)

  # ---------- vectorized attention + masked softmax + pooling ----------
  # out = sum_t exp(att_t)*mask_t*emb_t / (sum_t exp(att_t)*mask_t + 1e-4)
  # (matches _masked_softmax exactly: mask after exp, +1e-4 in the denominator)
  hf3 = hf_ref[...]                                          # (T, B, H)
  hb3 = hb_ref[...]                                          # (T, B, H)
  hf2 = hf3.reshape(T * B, H)
  hb2 = hb3.reshape(T * B, H)
  # [hf | hb] @ Wlin == hf @ Wlin_top + hb @ Wlin_bot  -> no (T,B,2H) concat needed
  e = jnp.tanh(jnp.dot(hf2, wlin_f_ref[...], preferred_element_type=f32)
               + jnp.dot(hb2, wlin_b_ref[...], preferred_element_type=f32)
               + blin_ref[...])                              # (T*B, 2H)
  s = jnp.sum(e * watt_ref[...], axis=-1, keepdims=True).reshape(T, B, 1)
  t_idx = lax.broadcasted_iota(jnp.int32, (T, B, 1), 0)
  ex = jnp.exp(s) * (t_idx < len_col[None, :, :]).astype(f32)  # masked exp (T, B, 1)
  den = jnp.sum(ex, axis=0) + 1e-4                           # (B, 1)
  num_f = jnp.sum(ex * hf3, axis=0)                          # (B, H)
  num_b = jnp.sum(ex * hb3, axis=0)                          # (B, H)
  out_ref[...] = (jnp.concatenate([num_f, num_b], axis=-1) / den).astype(out_ref.dtype)


def _pick_batch_tile(B):
  # largest multiple-of-8 tile that divides B (capped); fall back to full batch.
  for bt in (128, 64, 32, 16, 8):
    if B % bt == 0:
      return bt
  return B


def bigru_attention_word(x, lengths, params):
  T, B, I = x.shape
  H = params["wih_f"].shape[-1]

  # --- fold per-gate weights into lane-packed (.,3H) matrices (trace time) ---
  def fuse_dir(wih, whh, bih, bhh):
    wih_c = jnp.concatenate([wih[0], wih[1], wih[2]], axis=-1)                   # (I, 3H)
    whh_c = jnp.concatenate([whh[0], whh[1], whh[2]], axis=-1)                   # (H, 3H)
    bi_c = jnp.concatenate([bih[0] + bhh[0], bih[1] + bhh[1], bih[2]], axis=-1)  # (1, 3H)
    return wih_c, whh_c, bi_c, bhh[2]                                            # bhn (1, H)

  wih_f, whh_f, bi_f, bhn_f = fuse_dir(params["wih_f"], params["whh_f"],
                                       params["bih_f"], params["bhh_f"])
  wih_b, whh_b, bi_b, bhn_b = fuse_dir(params["wih_b"], params["whh_b"],
                                       params["bih_b"], params["bhh_b"])
  wlin, blin = params["wlin"], params["blin"]
  wlin_f = wlin[:H, :]                                       # applied to forward h
  wlin_b = wlin[H:, :]                                       # applied to backward h
  watt_row = params["watt"].T                                # (1, 2H)

  len_col = lengths.astype(jnp.int32).reshape(B, 1)

  Bt = _pick_batch_tile(B)
  grid = (B // Bt,)

  def full_spec(arr):
    nd = arr.ndim
    return pl.BlockSpec(arr.shape, lambda b: (0,) * nd)

  in_specs = [
      pl.BlockSpec((T, Bt, I), lambda b: (0, b, 0)),      # x, tiled over batch
      pl.BlockSpec((Bt, 1), lambda b: (b, 0)),            # lengths
      full_spec(wih_f), full_spec(whh_f), full_spec(bi_f), full_spec(bhn_f),
      full_spec(wih_b), full_spec(whh_b), full_spec(bi_b), full_spec(bhn_b),
      full_spec(wlin_f), full_spec(wlin_b), full_spec(blin), full_spec(watt_row),
  ]
  out_specs = pl.BlockSpec((Bt, 2 * H), lambda b: (b, 0))

  kernel = functools.partial(bigru_attention_kernel, T=T, B=Bt, H=H)

  return pl.pallas_call(
      kernel,
      out_shape=jax.ShapeDtypeStruct((B, 2 * H), jnp.float32),
      grid=grid,
      in_specs=in_specs,
      out_specs=out_specs,
      scratch_shapes=[
          pltpu.VMEM((T, Bt, 3 * H), jnp.float32),   # hoisted gi, fwd
          pltpu.VMEM((T, Bt, 3 * H), jnp.float32),   # hoisted gi, bwd
          pltpu.VMEM((T, Bt, H), jnp.float32),       # forward hidden states
          pltpu.VMEM((T, Bt, H), jnp.float32),       # backward hidden states
      ],
      compiler_params=pltpu.CompilerParams(
          dimension_semantics=("parallel",)),
  )(x, len_col, wih_f, whh_f, bi_f, bhn_f, wih_b, whh_b, bi_b, bhn_b,
    wlin_f, wlin_b, blin, watt_row)


# ------------------------- pure-JAX reference -------------------------
def reference(x, lengths, p):
  T, B, I = x.shape
  H = p["wih_f"].shape[-1]

  def step(x_t, h, wih, whh, bih, bhh):
    hp = jax.lax.Precision.HIGHEST
    gi = [jnp.dot(x_t, wih[g], precision=hp) + bih[g] for g in range(3)]
    gh = [jnp.dot(h, whh[g], precision=hp) + bhh[g] for g in range(3)]
    r = jax.nn.sigmoid(gi[0] + gh[0])
    z = jax.nn.sigmoid(gi[1] + gh[1])
    n = jnp.tanh(gi[2] + r * gh[2])
    return (1.0 - z) * n + z * h

  hf = jnp.zeros((B, H), jnp.float32)
  outs_f = []
  for t in range(T):
    valid = (t < lengths)[:, None]
    hf = jnp.where(valid, step(x[t], hf, p["wih_f"], p["whh_f"], p["bih_f"], p["bhh_f"]), 0.0)
    outs_f.append(hf)
  hb = jnp.zeros((B, H), jnp.float32)
  outs_b = [None] * T
  for t in range(T - 1, -1, -1):
    valid = (t < lengths)[:, None]
    hb = jnp.where(valid, step(x[t], hb, p["wih_b"], p["whh_b"], p["bih_b"], p["bhh_b"]), 0.0)
    outs_b[t] = hb

  emb = jnp.concatenate([jnp.stack(outs_f), jnp.stack(outs_b)], axis=-1)  # (T,B,2H)
  hp = jax.lax.Precision.HIGHEST
  e = jnp.tanh(jnp.dot(emb.reshape(T * B, 2 * H), p["wlin"], precision=hp) + p["blin"])
  att = jnp.dot(e, p["watt"], precision=hp).reshape(T, B)
  mask = (jnp.arange(T)[:, None] < lengths[None, :]).astype(jnp.float32)
  ex = jnp.exp(att) * mask
  w = ex / (ex.sum(0, keepdims=True) + 1e-4)
  return (w[:, :, None] * emb).sum(0)


# ------------------------- parameter construction -------------------------
def init_params(key, in_size, hidden_size):
  H = hidden_size
  bound = 1.0 / jnp.sqrt(H)
  keys = jax.random.split(key, 16)
  u = lambda k, shape: jax.random.uniform(k, shape, jnp.float32, -bound, bound)
  return {
      # per-gate (r, z, n) stacked weights, already transposed for x @ W
      "wih_f": u(keys[0], (3, in_size, H)),
      "whh_f": u(keys[1], (3, H, H)),
      "bih_f": u(keys[2], (3, 1, H)),
      "bhh_f": u(keys[3], (3, 1, H)),
      "wih_b": u(keys[4], (3, in_size, H)),
      "whh_b": u(keys[5], (3, H, H)),
      "bih_b": u(keys[6], (3, 1, H)),
      "bhh_b": u(keys[7], (3, 1, H)),
      "wlin": u(keys[8], (2 * H, 2 * H)),   # lin.weight.T
      "blin": u(keys[9], (1, 2 * H)),
      "watt": u(keys[10], (2 * H, 1)),      # attention.weight.T (no bias)
  }


if __name__ == "__main__":
  T, B, IN, H = 8, 4, 16, 32
  key = jax.random.PRNGKey(0)
  kx, kp = jax.random.split(key)

  x = jax.random.normal(kx, (T, B, IN), jnp.float32)
  # packed-sequence lengths: descending, lengths[0] == T
  lengths = jnp.array([8, 6, 5, 3], dtype=jnp.int32)
  params = init_params(kp, IN, H)

  out = bigru_attention_word(x, lengths, params)
  out = jax.block_until_ready(out)

  ref = jax.block_until_ready(reference(x, lengths, params))
  assert out.shape == (B, 2 * H)
  assert jnp.allclose(out, ref, atol=2e-3, rtol=2e-3), (
      f"max abs diff {jnp.max(jnp.abs(out - ref))}")

  print("KERNEL_OK")
</pallas_src>

<mosaic_0001>
module attributes {stable_mosaic.version = 11 : i64} {
  func.func @bigru_attention_kernel(%arg0: i32, %arg1: memref<8x4x16xf32, #tpu.memory_space<vmem>>, %arg2: memref<4x1xi32, #tpu.memory_space<vmem>>, %arg3: memref<16x96xf32, #tpu.memory_space<vmem>>, %arg4: memref<32x96xf32, #tpu.memory_space<vmem>>, %arg5: memref<1x96xf32, #tpu.memory_space<vmem>>, %arg6: memref<1x32xf32, #tpu.memory_space<vmem>>, %arg7: memref<16x96xf32, #tpu.memory_space<vmem>>, %arg8: memref<32x96xf32, #tpu.memory_space<vmem>>, %arg9: memref<1x96xf32, #tpu.memory_space<vmem>>, %arg10: memref<1x32xf32, #tpu.memory_space<vmem>>, %arg11: memref<32x64xf32, #tpu.memory_space<vmem>>, %arg12: memref<32x64xf32, #tpu.memory_space<vmem>>, %arg13: memref<1x64xf32, #tpu.memory_space<vmem>>, %arg14: memref<1x64xf32, #tpu.memory_space<vmem>>, %arg15: memref<4x64xf32, #tpu.memory_space<vmem>>, %arg16: memref<8x4x96xf32, #tpu.memory_space<vmem>>, %arg17: memref<8x4x96xf32, #tpu.memory_space<vmem>>, %arg18: memref<8x4x32xf32, #tpu.memory_space<vmem>>, %arg19: memref<8x4x32xf32, #tpu.memory_space<vmem>>) attributes {dimension_semantics = [#tpu.dimension_semantics<parallel>], iteration_bounds = array<i64: 1>, scalar_prefetch = 0 : i64, scratch_operands = 4 : i64, tpu.core_type = #tpu.core_type<tc>, window_params = [{transform_indices = @transform_0, window_bounds = array<i64: 8, 4, 16>}, {transform_indices = @transform_1, window_bounds = array<i64: 4, 1>}, {pipeline_mode = #tpu.pipeline_mode<synchronous>, transform_indices = @transform_2, window_bounds = array<i64: 16, 96>}, {pipeline_mode = #tpu.pipeline_mode<synchronous>, transform_indices = @transform_3, window_bounds = array<i64: 32, 96>}, {pipeline_mode = #tpu.pipeline_mode<synchronous>, transform_indices = @transform_4, window_bounds = array<i64: 1, 96>}, {pipeline_mode = #tpu.pipeline_mode<synchronous>, transform_indices = @transform_5, window_bounds = array<i64: 1, 32>}, {pipeline_mode = #tpu.pipeline_mode<synchronous>, transform_indices = @transform_6, window_bounds = array<i64: 16, 96>}, {pipeline_mode = #tpu.pipeline_mode<synchronous>, transform_indices = @transform_7, window_bounds = array<i64: 32, 96>}, {pipeline_mode = #tpu.pipeline_mode<synchronous>, transform_indices = @transform_8, window_bounds = array<i64: 1, 96>}, {pipeline_mode = #tpu.pipeline_mode<synchronous>, transform_indices = @transform_9, window_bounds = array<i64: 1, 32>}, {pipeline_mode = #tpu.pipeline_mode<synchronous>, transform_indices = @transform_10, window_bounds = array<i64: 32, 64>}, {pipeline_mode = #tpu.pipeline_mode<synchronous>, transform_indices = @transform_11, window_bounds = array<i64: 32, 64>}, {pipeline_mode = #tpu.pipeline_mode<synchronous>, transform_indices = @transform_12, window_bounds = array<i64: 1, 64>}, {pipeline_mode = #tpu.pipeline_mode<synchronous>, transform_indices = @transform_13, window_bounds = array<i64: 1, 64>}, {transform_indices = @transform_14, window_bounds = array<i64: 4, 64>}]} {
    %c0 = arith.constant 0 : index
    %c0_0 = arith.constant 0 : index
    %0 = vector.load %arg2[%c0, %c0_0] : memref<4x1xi32, #tpu.memory_space<vmem>>, vector<4x1xi32>
    %c0_1 = arith.constant 0 : index
    %c0_2 = arith.constant 0 : index
    %c0_3 = arith.constant 0 : index
    %1 = vector.load %arg1[%c0_1, %c0_2, %c0_3] : memref<8x4x16xf32, #tpu.memory_space<vmem>>, vector<8x4x16xf32>
    %2 = vector.shape_cast %1 : vector<8x4x16xf32> to vector<32x16xf32>
    %c0_4 = arith.constant 0 : index
    %c0_5 = arith.constant 0 : index
    %3 = vector.load %arg3[%c0_4, %c0_5] : memref<16x96xf32, #tpu.memory_space<vmem>>, vector<16x96xf32>
    %cst = arith.constant dense<0.000000e+00> : vector<32x96xf32>
    %4 = tpu.matmul %2, %3, %cst {dimension_numbers = #tpu.dot_dimension_numbers<[1], [0], [0], [1], [0, 0, 1, 1], [], []>} : vector<32x16xf32>, vector<16x96xf32>, vector<32x96xf32> -> vector<32x96xf32>
    %c0_6 = arith.constant 0 : index
    %c0_7 = arith.constant 0 : index
    %5 = vector.load %arg5[%c0_6, %c0_7] : memref<1x96xf32, #tpu.memory_space<vmem>>, vector<1x96xf32>
    %6 = vector.broadcast %5 : vector<1x96xf32> to vector<32x96xf32>
    %7 = arith.addf %4, %6 : vector<32x96xf32>
    %8 = vector.shape_cast %7 : vector<32x96xf32> to vector<8x4x96xf32>
    %c0_8 = arith.constant 0 : index
    %c0_9 = arith.constant 0 : index
    %c0_10 = arith.constant 0 : index
    %9 = vector.load %arg16[%c0_8, %c0_9, %c0_10] : memref<8x4x96xf32, #tpu.memory_space<vmem>>, vector<8x4x96xf32>
    tpu.vector_store %arg16[%c0_8, %c0_9, %c0_10], %8 {strides = array<i32>} : memref<8x4x96xf32, #tpu.memory_space<vmem>>, vector<8x4x96xf32>,
    %c0_11 = arith.constant 0 : index
    %c0_12 = arith.constant 0 : index
    %10 = vector.load %arg7[%c0_11, %c0_12] : memref<16x96xf32, #tpu.memory_space<vmem>>, vector<16x96xf32>
    %cst_13 = arith.constant dense<0.000000e+00> : vector<32x96xf32>
    %11 = tpu.matmul %2, %10, %cst_13 {dimension_numbers = #tpu.dot_dimension_numbers<[1], [0], [0], [1], [0, 0, 1, 1], [], []>} : vector<32x16xf32>, vector<16x96xf32>, vector<32x96xf32> -> vector<32x96xf32>
    %c0_14 = arith.constant 0 : index
    %c0_15 = arith.constant 0 : index
    %12 = vector.load %arg9[%c0_14, %c0_15] : memref<1x96xf32, #tpu.memory_space<vmem>>, vector<1x96xf32>
    %13 = vector.broadcast %12 : vector<1x96xf32> to vector<32x96xf32>
    %14 = arith.addf %11, %13 : vector<32x96xf32>
    %15 = vector.shape_cast %14 : vector<32x96xf32> to vector<8x4x96xf32>
    %c0_16 = arith.constant 0 : index
    %c0_17 = arith.constant 0 : index
    %c0_18 = arith.constant 0 : index
    %16 = vector.load %arg17[%c0_16, %c0_17, %c0_18] : memref<8x4x96xf32, #tpu.memory_space<vmem>>, vector<8x4x96xf32>
    tpu.vector_store %arg17[%c0_16, %c0_17, %c0_18], %15 {strides = array<i32>} : memref<8x4x96xf32, #tpu.memory_space<vmem>>, vector<8x4x96xf32>,
    %c0_19 = arith.constant 0 : index
    %c0_20 = arith.constant 0 : index
    %17 = vector.load %arg4[%c0_19, %c0_20] : memref<32x96xf32, #tpu.memory_space<vmem>>, vector<32x96xf32>
    %c0_21 = arith.constant 0 : index
    %c0_22 = arith.constant 0 : index
    %18 = vector.load %arg6[%c0_21, %c0_22] : memref<1x32xf32, #tpu.memory_space<vmem>>, vector<1x32xf32>
    %c0_23 = arith.constant 0 : index
    %c0_24 = arith.constant 0 : index
    %19 = vector.load %arg8[%c0_23, %c0_24] : memref<32x96xf32, #tpu.memory_space<vmem>>, vector<32x96xf32>
    %c0_25 = arith.constant 0 : index
    %c0_26 = arith.constant 0 : index
    %20 = vector.load %arg10[%c0_25, %c0_26] : memref<1x32xf32, #tpu.memory_space<vmem>>, vector<1x32xf32>
    %cst_27 = arith.constant 0.000000e+00 : f32
    %21 = vector.broadcast %cst_27 : f32 to vector<4x32xf32>
    %c0_i32 = arith.constant 0 : i32
    %c7_i32 = arith.constant 7 : i32
    %22 = arith.subi %c7_i32, %c0_i32 : i32
    %23 = vector.broadcast %c0_i32 : i32 to vector<4x1xi32>
    %24 = arith.cmpi slt, %23, %0 : vector<4x1xi32>
    %25 = arith.index_cast %c0_i32 : i32 to index
    %c0_28 = arith.constant 0 : index
    %c0_29 = arith.constant 0 : index
    %26 = vector.load %arg16[%25, %c0_28, %c0_29] : memref<8x4x96xf32, #tpu.memory_space<vmem>>, vector<1x4x96xf32>
    %27 = vector.shape_cast %26 : vector<1x4x96xf32> to vector<4x96xf32>
    %cst_30 = arith.constant dense<0.000000e+00> : vector<4x96xf32>
    %28 = tpu.matmul %21, %17, %cst_30 {dimension_numbers = #tpu.dot_dimension_numbers<[1], [0], [0], [1], [0, 0, 1, 1], [], []>} : vector<4x32xf32>, vector<32x96xf32>, vector<4x96xf32> -> vector<4x96xf32>
    %29 = vector.extract_strided_slice %27 {offsets = [0, 0], sizes = [4, 32], strides = [1, 1]} : vector<4x96xf32> to vector<4x32xf32>
    %30 = vector.extract_strided_slice %28 {offsets = [0, 0], sizes = [4, 32], strides = [1, 1]} : vector<4x96xf32> to vector<4x32xf32>
    %31 = arith.addf %29, %30 : vector<4x32xf32>
    %32 = arith.negf %31 : vector<4x32xf32>
    %33 = math.exp %32 : vector<4x32xf32>
    %cst_31 = arith.constant 1.000000e+00 : f32
    %34 = vector.broadcast %cst_31 : f32 to vector<4x32xf32>
    %35 = arith.addf %34, %33 : vector<4x32xf32>
    %36 = arith.divf %34, %35 : vector<4x32xf32>
    %37 = vector.extract_strided_slice %27 {offsets = [0, 32], sizes = [4, 32], strides = [1, 1]} : vector<4x96xf32> to vector<4x32xf32>
    %38 = vector.extract_strided_slice %28 {offsets = [0, 32], sizes = [4, 32], strides = [1, 1]} : vector<4x96xf32> to vector<4x32xf32>
    %39 = arith.addf %37, %38 : vector<4x32xf32>
    %40 = arith.negf %39 : vector<4x32xf32>
    %41 = math.exp %40 : vector<4x32xf32>
    %cst_32 = arith.constant 1.000000e+00 : f32
    %42 = vector.broadcast %cst_32 : f32 to vector<4x32xf32>
    %43 = arith.addf %42, %41 : vector<4x32xf32>
    %44 = arith.divf %42, %43 : vector<4x32xf32>
    %45 = vector.extract_strided_slice %27 {offsets = [0, 64], sizes = [4, 32], strides = [1, 1]} : vector<4x96xf32> to vector<4x32xf32>
    %46 = vector.extract_strided_slice %28 {offsets = [0, 64], sizes = [4, 32], strides = [1, 1]} : vector<4x96xf32> to vector<4x32xf32>
    %47 = vector.broadcast %18 : vector<1x32xf32> to vector<4x32xf32>
    %48 = arith.addf %46, %47 : vector<4x32xf32>
    %49 = arith.mulf %36, %48 : vector<4x32xf32>
    %50 = arith.addf %45, %49 : vector<4x32xf32>
    %51 = math.tanh %50 : vector<4x32xf32>
    %cst_33 = arith.constant 1.000000e+00 : f32
    %52 = vector.broadcast %cst_33 : f32 to vector<4x32xf32>
    %53 = arith.subf %52, %44 : vector<4x32xf32>
    %54 = arith.mulf %53, %51 : vector<4x32xf32>
    %55 = arith.mulf %44, %21 : vector<4x32xf32>
    %56 = arith.addf %54, %55 : vector<4x32xf32>
    %cst_34 = arith.constant 0.000000e+00 : f32
    %57 = vector.shape_cast %24 : vector<4x1xi1> to vector<4x1xi1>
    %58 = vector.broadcast %57 : vector<4x1xi1> to vector<4x32xi1>
    %59 = vector.broadcast %cst_34 : f32 to vector<4x32xf32>
    %60 = arith.select %58, %56, %59 : vector<4x32xi1>, vector<4x32xf32>
    %61 = arith.index_cast %c0_i32 : i32 to index
    %c0_35 = arith.constant 0 : index
    %c0_36 = arith.constant 0 : index
    %62 = vector.load %arg18[%61, %c0_35, %c0_36] : memref<8x4x32xf32, #tpu.memory_space<vmem>>, vector<1x4x32xf32>
    %63 = vector.shape_cast %62 : vector<1x4x32xf32> to vector<4x32xf32>
    %64 = vector.shape_cast %60 : vector<4x32xf32> to vector<1x4x32xf32>
    tpu.vector_store %arg18[%61, %c0_35, %c0_36], %64 {strides = array<i32>} : memref<8x4x32xf32, #tpu.memory_space<vmem>>, vector<1x4x32xf32>,
    %65 = vector.broadcast %22 : i32 to vector<4x1xi32>
    %66 = arith.cmpi slt, %65, %0 : vector<4x1xi32>
    %67 = arith.index_cast %22 : i32 to index
    %c0_37 = arith.constant 0 : index
    %c0_38 = arith.constant 0 : index
    %68 = vector.load %arg17[%67, %c0_37, %c0_38] : memref<8x4x96xf32, #tpu.memory_space<vmem>>, vector<1x4x96xf32>
    %69 = vector.shape_cast %68 : vector<1x4x96xf32> to vector<4x96xf32>
    %cst_39 = arith.constant dense<0.000000e+00> : vector<4x96xf32>
    %70 = tpu.matmul %21, %19, %cst_39 {dimension_numbers = #tpu.dot_dimension_numbers<[1], [0], [0], [1], [0, 0, 1, 1], [], []>} : vector<4x32xf32>, vector<32x96xf32>, vector<4x96xf32> -> vector<4x96xf32>
    %71 = vector.extract_strided_slice %69 {offsets = [0, 0], sizes = [4, 32], strides = [1, 1]} : vector<4x96xf32> to vector<4x32xf32>
    %72 = vector.extract_strided_slice %70 {offsets = [0, 0], sizes = [4, 32], strides = [1, 1]} : vector<4x96xf32> to vector<4x32xf32>
    %73 = arith.addf %71, %72 : vector<4x32xf32>
    %74 = arith.negf %73 : vector<4x32xf32>
    %75 = math.exp %74 : vector<4x32xf32>
    %cst_40 = arith.constant 1.000000e+00 : f32
    %76 = vector.broadcast %cst_40 : f32 to vector<4x32xf32>
    %77 = arith.addf %76, %75 : vector<4x32xf32>
    %78 = arith.divf %76, %77 : vector<4x32xf32>
    %79 = vector.extract_strided_slice %69 {offsets = [0, 32], sizes = [4, 32], strides = [1, 1]} : vector<4x96xf32> to vector<4x32xf32>
    %80 = vector.extract_strided_slice %70 {offsets = [0, 32], sizes = [4, 32], strides = [1, 1]} : vector<4x96xf32> to vector<4x32xf32>
    %81 = arith.addf %79, %80 : vector<4x32xf32>
    %82 = arith.negf %81 : vector<4x32xf32>
    %83 = math.exp %82 : vector<4x32xf32>
    %cst_41 = arith.constant 1.000000e+00 : f32
    %84 = vector.broadcast %cst_41 : f32 to vector<4x32xf32>
    %85 = arith.addf %84, %83 : vector<4x32xf32>
    %86 = arith.divf %84, %85 : vector<4x32xf32>
    %87 = vector.extract_strided_slice %69 {offsets = [0, 64], sizes = [4, 32], strides = [1, 1]} : vector<4x96xf32> to vector<4x32xf32>
    %88 = vector.extract_strided_slice %70 {offsets = [0, 64], sizes = [4, 32], strides = [1, 1]} : vector<4x96xf32> to vector<4x32xf32>
    %89 = vector.broadcast %20 : vector<1x32xf32> to vector<4x32xf32>
    %90 = arith.addf %88, %89 : vector<4x32xf32>
    %91 = arith.mulf %78, %90 : vector<4x32xf32>
    %92 = arith.addf %87, %91 : vector<4x32xf32>
    %93 = math.tanh %92 : vector<4x32xf32>
    %cst_42 = arith.constant 1.000000e+00 : f32
    %94 = vector.broadcast %cst_42 : f32 to vector<4x32xf32>
    %95 = arith.subf %94, %86 : vector<4x32xf32>
    %96 = arith.mulf %95, %93 : vector<4x32xf32>
    %97 = arith.mulf %86, %21 : vector<4x32xf32>
    %98 = arith.addf %96, %97 : vector<4x32xf32>
    %cst_43 = arith.constant 0.000000e+00 : f32
    %99 = vector.shape_cast %66 : vector<4x1xi1> to vector<4x1xi1>
    %100 = vector.broadcast %99 : vector<4x1xi1> to vector<4x32xi1>
    %101 = vector.broadcast %cst_43 : f32 to vector<4x32xf32>
    %102 = arith.select %100, %98, %101 : vector<4x32xi1>, vector<4x32xf32>
    %103 = arith.index_cast %22 : i32 to index
    %c0_44 = arith.constant 0 : index
    %c0_45 = arith.constant 0 : index
    %104 = vector.load %arg19[%103, %c0_44, %c0_45] : memref<8x4x32xf32, #tpu.memory_space<vmem>>, vector<1x4x32xf32>
    %105 = vector.shape_cast %104 : vector<1x4x32xf32> to vector<4x32xf32>
    %106 = vector.shape_cast %102 : vector<4x32xf32> to vector<1x4x32xf32>
    tpu.vector_store %arg19[%103, %c0_44, %c0_45], %106 {strides = array<i32>} : memref<8x4x32xf32, #tpu.memory_space<vmem>>, vector<1x4x32xf32>,
    %c1_i32 = arith.constant 1 : i32
    %c7_i32_46 = arith.constant 7 : i32
    %107 = arith.subi %c7_i32_46, %c1_i32 : i32
    %108 = vector.broadcast %c1_i32 : i32 to vector<4x1xi32>
    %109 = arith.cmpi slt, %108, %0 : vector<4x1xi32>
    %110 = arith.index_cast %c1_i32 : i32 to index
    %c0_47 = arith.constant 0 : index
    %c0_48 = arith.constant 0 : index
    %111 = vector.load %arg16[%110, %c0_47, %c0_48] : memref<8x4x96xf32, #tpu.memory_space<vmem>>, vector<1x4x96xf32>
    %112 = vector.shape_cast %111 : vector<1x4x96xf32> to vector<4x96xf32>
    %cst_49 = arith.constant dense<0.000000e+00> : vector<4x96xf32>
    %113 = tpu.matmul %60, %17, %cst_49 {dimension_numbers = #tpu.dot_dimension_numbers<[1], [0], [0], [1], [0, 0, 1, 1], [], []>} : vector<4x32xf32>, vector<32x96xf32>, vector<4x96xf32> -> vector<4x96xf32>
    %114 = vector.extract_strided_slice %112 {offsets = [0, 0], sizes = [4, 32], strides = [1, 1]} : vector<4x96xf32> to vector<4x32xf32>
    %115 = vector.extract_strided_slice %113 {offsets = [0, 0], sizes = [4, 32], strides = [1, 1]} : vector<4x96xf32> to vector<4x32xf32>
    %116 = arith.addf %114, %115 : vector<4x32xf32>
    %117 = arith.negf %116 : vector<4x32xf32>
    %118 = math.exp %117 : vector<4x32xf32>
    %cst_50 = arith.constant 1.000000e+00 : f32
    %119 = vector.broadcast %cst_50 : f32 to vector<4x32xf32>
    %120 = arith.addf %119, %118 : vector<4x32xf32>
    %121 = arith.divf %119, %120 : vector<4x32xf32>
    %122 = vector.extract_strided_slice %112 {offsets = [0, 32], sizes = [4, 32], strides = [1, 1]} : vector<4x96xf32> to vector<4x32xf32>
    %123 = vector.extract_strided_slice %113 {offsets = [0, 32], sizes = [4, 32], strides = [1, 1]} : vector<4x96xf32> to vector<4x32xf32>
    %124 = arith.addf %122, %123 : vector<4x32xf32>
    %125 = arith.negf %124 : vector<4x32xf32>
    %126 = math.exp %125 : vector<4x32xf32>
    %cst_51 = arith.constant 1.000000e+00 : f32
    %127 = vector.broadcast %cst_51 : f32 to vector<4x32xf32>
    %128 = arith.addf %127, %126 : vector<4x32xf32>
    %129 = arith.divf %127, %128 : vector<4x32xf32>
    %130 = vector.extract_strided_slice %112 {offsets = [0, 64], sizes = [4, 32], strides = [1, 1]} : vector<4x96xf32> to vector<4x32xf32>
    %131 = vector.extract_strided_slice %113 {offsets = [0, 64], sizes = [4, 32], strides = [1, 1]} : vector<4x96xf32> to vector<4x32xf32>
    %132 = vector.broadcast %18 : vector<1x32xf32> to vector<4x32xf32>
    %133 = arith.addf %131, %132 : vector<4x32xf32>
    %134 = arith.mulf %121, %133 : vector<4x32xf32>
    %135 = arith.addf %130, %134 : vector<4x32xf32>
    %136 = math.tanh %135 : vector<4x32xf32>
    %cst_52 = arith.constant 1.000000e+00 : f32
    %137 = vector.broadcast %cst_52 : f32 to vector<4x32xf32>
    %138 = arith.subf %137, %129 : vector<4x32xf32>
    %139 = arith.mulf %138, %136 : vector<4x32xf32>
    %140 = arith.mulf %129, %60 : vector<4x32xf32>
    %141 = arith.addf %139, %140 : vector<4x32xf32>
    %cst_53 = arith.constant 0.000000e+00 : f32
    %142 = vector.shape_cast %109 : vector<4x1xi1> to vector<4x1xi1>
    %143 = vector.broadcast %142 : vector<4x1xi1> to vector<4x32xi1>
    %144 = vector.broadcast %cst_53 : f32 to vector<4x32xf32>
    %145 = arith.select %143, %141, %144 : vector<4x32xi1>, vector<4x32xf32>
    %146 = arith.index_cast %c1_i32 : i32 to index
    %c0_54 = arith.constant 0 : index
    %c0_55 = arith.constant 0 : index
    %147 = vector.load %arg18[%146, %c0_54, %c0_55] : memref<8x4x32xf32, #tpu.memory_space<vmem>>, vector<1x4x32xf32>
    %148 = vector.shape_cast %147 : vector<1x4x32xf32> to vector<4x32xf32>
    %149 = vector.shape_cast %145 : vector<4x32xf32> to vector<1x4x32xf32>
    tpu.vector_store %arg18[%146, %c0_54, %c0_55], %149 {strides = array<i32>} : memref<8x4x32xf32, #tpu.memory_space<vmem>>, vector<1x4x32xf32>,
    %150 = vector.broadcast %107 : i32 to vector<4x1xi32>
    %151 = arith.cmpi slt, %150, %0 : vector<4x1xi32>
    %152 = arith.index_cast %107 : i32 to index
    %c0_56 = arith.constant 0 : index
    %c0_57 = arith.constant 0 : index
    %153 = vector.load %arg17[%152, %c0_56, %c0_57] : memref<8x4x96xf32, #tpu.memory_space<vmem>>, vector<1x4x96xf32>
    %154 = vector.shape_cast %153 : vector<1x4x96xf32> to vector<4x96xf32>
    %cst_58 = arith.constant dense<0.000000e+00> : vector<4x96xf32>
    %155 = tpu.matmul %102, %19, %cst_58 {dimension_numbers = #tpu.dot_dimension_numbers<[1], [0], [0], [1], [0, 0, 1, 1], [], []>} : vector<4x32xf32>, vector<32x96xf32>, vector<4x96xf32> -> vector<4x96xf32>
    %156 = vector.extract_strided_slice %154 {offsets = [0, 0], sizes = [4, 32], strides = [1, 1]} : vector<4x96xf32> to vector<4x32xf32>
    %157 = vector.extract_strided_slice %155 {offsets = [0, 0], sizes = [4, 32], strides = [1, 1]} : vector<4x96xf32> to vector<4x32xf32>
    %158 = arith.addf %156, %157 : vector<4x32xf32>
    %159 = arith.negf %158 : vector<4x32xf32>
    %160 = math.exp %159 : vector<4x32xf32>
    %cst_59 = arith.constant 1.000000e+00 : f32
    %161 = vector.broadcast %cst_59 : f32 to vector<4x32xf32>
    %162 = arith.addf %161, %160 : vector<4x32xf32>
    %163 = arith.divf %161, %162 : vector<4x32xf32>
    %164 = vector.extract_strided_slice %154 {offsets = [0, 32], sizes = [4, 32], strides = [1, 1]} : vector<4x96xf32> to vector<4x32xf32>
    %165 = vector.extract_strided_slice %155 {offsets = [0, 32], sizes = [4, 32], strides = [1, 1]} : vector<4x96xf32> to vector<4x32xf32>
    %166 = arith.addf %164, %165 : vector<4x32xf32>
    %167 = arith.negf %166 : vector<4x32xf32>
    %168 = math.exp %167 : vector<4x32xf32>
    %cst_60 = arith.constant 1.000000e+00 : f32
    %169 = vector.broadcast %cst_60 : f32 to vector<4x32xf32>
    %170 = arith.addf %169, %168 : vector<4x32xf32>
    %171 = arith.divf %169, %170 : vector<4x32xf32>
    %172 = vector.extract_strided_slice %154 {offsets = [0, 64], sizes = [4, 32], strides = [1, 1]} : vector<4x96xf32> to vector<4x32xf32>
    %173 = vector.extract_strided_slice %155 {offsets = [0, 64], sizes = [4, 32], strides = [1, 1]} : vector<4x96xf32> to vector<4x32xf32>
    %174 = vector.broadcast %20 : vector<1x32xf32> to vector<4x32xf32>
    %175 = arith.addf %173, %174 : vector<4x32xf32>
    %176 = arith.mulf %163, %175 : vector<4x32xf32>
    %177 = arith.addf %172, %176 : vector<4x32xf32>
    %178 = math.tanh %177 : vector<4x32xf32>
    %cst_61 = arith.constant 1.000000e+00 : f32
    %179 = vector.broadcast %cst_61 : f32 to vector<4x32xf32>
    %180 = arith.subf %179, %171 : vector<4x32xf32>
    %181 = arith.mulf %180, %178 : vector<4x32xf32>
    %182 = arith.mulf %171, %102 : vector<4x32xf32>
    %183 = arith.addf %181, %182 : vector<4x32xf32>
    %cst_62 = arith.constant 0.000000e+00 : f32
    %184 = vector.shape_cast %151 : vector<4x1xi1> to vector<4x1xi1>
    %185 = vector.broadcast %184 : vector<4x1xi1> to vector<4x32xi1>
    %186 = vector.broadcast %cst_62 : f32 to vector<4x32xf32>
    %187 = arith.select %185, %183, %186 : vector<4x32xi1>, vector<4x32xf32>
    %188 = arith.index_cast %107 : i32 to index
    %c0_63 = arith.constant 0 : index
    %c0_64 = arith.constant 0 : index
    %189 = vector.load %arg19[%188, %c0_63, %c0_64] : memref<8x4x32xf32, #tpu.memory_space<vmem>>, vector<1x4x32xf32>
    %190 = vector.shape_cast %189 : vector<1x4x32xf32> to vector<4x32xf32>
    %191 = vector.shape_cast %187 : vector<4x32xf32> to vector<1x4x32xf32>
    tpu.vector_store %arg19[%188, %c0_63, %c0_64], %191 {strides = array<i32>} : memref<8x4x32xf32, #tpu.memory_space<vmem>>, vector<1x4x32xf32>,
    %c2_i32 = arith.constant 2 : i32
    %c7_i32_65 = arith.constant 7 : i32
    %192 = arith.subi %c7_i32_65, %c2_i32 : i32
    %193 = vector.broadcast %c2_i32 : i32 to vector<4x1xi32>
    %194 = arith.cmpi slt, %193, %0 : vector<4x1xi32>
    %195 = arith.index_cast %c2_i32 : i32 to index
    %c0_66 = arith.constant 0 : index
    %c0_67 = arith.constant 0 : index
    %196 = vector.load %arg16[%195, %c0_66, %c0_67] : memref<8x4x96xf32, #tpu.memory_space<vmem>>, vector<1x4x96xf32>
    %197 = vector.shape_cast %196 : vector<1x4x96xf32> to vector<4x96xf32>
    %cst_68 = arith.constant dense<0.000000e+00> : vector<4x96xf32>
    %198 = tpu.matmul %145, %17, %cst_68 {dimension_numbers = #tpu.dot_dimension_numbers<[1], [0], [0], [1], [0, 0, 1, 1], [], []>} : vector<4x32xf32>, vector<32x96xf32>, vector<4x96xf32> -> vector<4x96xf32>
    %199 = vector.extract_strided_slice %197 {offsets = [0, 0], sizes = [4, 32], strides = [1, 1]} : vector<4x96xf32> to vector<4x32xf32>
    %200 = vector.extract_strided_slice %198 {offsets = [0, 0], sizes = [4, 32], strides = [1, 1]} : vector<4x96xf32> to vector<4x32xf32>
    %201 = arith.addf %199, %200 : vector<4x32xf32>
    %202 = arith.negf %201 : vector<4x32xf32>
    %203 = math.exp %202 : vector<4x32xf32>
    %cst_69 = arith.constant 1.000000e+00 : f32
    %204 = vector.broadcast %cst_69 : f32 to vector<4x32xf32>
    %205 = arith.addf %204, %203 : vector<4x32xf32>
    %206 = arith.divf %204, %205 : vector<4x32xf32>
    %207 = vector.extract_strided_slice %197 {offsets = [0, 32], sizes = [4, 32], strides = [1, 1]} : vector<4x96xf32> to vector<4x32xf32>
    %208 = vector.extract_strided_slice %198 {offsets = [0, 32], sizes = [4, 32], strides = [1, 1]} : vector<4x96xf32> to vector<4x32xf32>
    %209 = arith.addf %207, %208 : vector<4x32xf32>
    %210 = arith.negf %209 : vector<4x32xf32>
    %211 = math.exp %210 : vector<4x32xf32>
    %cst_70 = arith.constant 1.000000e+00 : f32
    %212 = vector.broadcast %cst_70 : f32 to vector<4x32xf32>
    %213 = arith.addf %212, %211 : vector<4x32xf32>
    %214 = arith.divf %212, %213 : vector<4x32xf32>
    %215 = vector.extract_strided_slice %197 {offsets = [0, 64], sizes = [4, 32], strides = [1, 1]} : vector<4x96xf32> to vector<4x32xf32>
    %216 = vector.extract_strided_slice %198 {offsets = [0, 64], sizes = [4, 32], strides = [1, 1]} : vector<4x96xf32> to vector<4x32xf32>
    %217 = vector.broadcast %18 : vector<1x32xf32> to vector<4x32xf32>
    %218 = arith.addf %216, %217 : vector<4x32xf32>
    %219 = arith.mulf %206, %218 : vector<4x32xf32>
    %220 = arith.addf %215, %219 : vector<4x32xf32>
    %221 = math.tanh %220 : vector<4x32xf32>
    %cst_71 = arith.constant 1.000000e+00 : f32
    %222 = vector.broadcast %cst_71 : f32 to vector<4x32xf32>
    %223 = arith.subf %222, %214 : vector<4x32xf32>
    %224 = arith.mulf %223, %221 : vector<4x32xf32>
    %225 = arith.mulf %214, %145 : vector<4x32xf32>
    %226 = arith.addf %224, %225 : vector<4x32xf32>
    %cst_72 = arith.constant 0.000000e+00 : f32
    %227 = vector.shape_cast %194 : vector<4x1xi1> to vector<4x1xi1>
    %228 = vector.broadcast %227 : vector<4x1xi1> to vector<4x32xi1>
    %229 = vector.broadcast %cst_72 : f32 to vector<4x32xf32>
    %230 = arith.select %228, %226, %229 : vector<4x32xi1>, vector<4x32xf32>
    %231 = arith.index_cast %c2_i32 : i32 to index
    %c0_73 = arith.constant 0 : index
    %c0_74 = arith.constant 0 : index
    %232 = vector.load %arg18[%231, %c0_73, %c0_74] : memref<8x4x32xf32, #tpu.memory_space<vmem>>, vector<1x4x32xf32>
    %233 = vector.shape_cast %232 : vector<1x4x32xf32> to vector<4x32xf32>
    %234 = vector.shape_cast %230 : vector<4x32xf32> to vector<1x4x32xf32>
    tpu.vector_store %arg18[%231, %c0_73, %c0_74], %234 {strides = array<i32>} : memref<8x4x32xf32, #tpu.memory_space<vmem>>, vector<1x4x32xf32>,
    %235 = vector.broadcast %192 : i32 to vector<4x1xi32>
    %236 = arith.cmpi slt, %235, %0 : vector<4x1xi32>
    %237 = arith.index_cast %192 : i32 to index
    %c0_75 = arith.constant 0 : index
    %c0_76 = arith.constant 0 : index
    %238 = vector.load %arg17[%237, %c0_75, %c0_76] : memref<8x4x96xf32, #tpu.memory_space<vmem>>, vector<1x4x96xf32>
    %239 = vector.shape_cast %238 : vector<1x4x96xf32> to vector<4x96xf32>
    %cst_77 = arith.constant dense<0.000000e+00> : vector<4x96xf32>
    %240 = tpu.matmul %187, %19, %cst_77 {dimension_numbers = #tpu.dot_dimension_numbers<[1], [0], [0], [1], [0, 0, 1, 1], [], []>} : vector<4x32xf32>, vector<32x96xf32>, vector<4x96xf32> -> vector<4x96xf32>
    %241 = vector.extract_strided_slice %239 {offsets = [0, 0], sizes = [4, 32], strides = [1, 1]} : vector<4x96xf32> to vector<4x32xf32>
    %242 = vector.extract_strided_slice %240 {offsets = [0, 0], sizes = [4, 32], strides = [1, 1]} : vector<4x96xf32> to vector<4x32xf32>
    %243 = arith.addf %241, %242 : vector<4x32xf32>
    %244 = arith.negf %243 : vector<4x32xf32>
    %245 = math.exp %244 : vector<4x32xf32>
    %cst_78 = arith.constant 1.000000e+00 : f32
    %246 = vector.broadcast %cst_78 : f32 to vector<4x32xf32>
    %247 = arith.addf %246, %245 : vector<4x32xf32>
    %248 = arith.divf %246, %247 : vector<4x32xf32>
    %249 = vector.extract_strided_slice %239 {offsets = [0, 32], sizes = [4, 32], strides = [1, 1]} : vector<4x96xf32> to vector<4x32xf32>
    %250 = vector.extract_strided_slice %240 {offsets = [0, 32], sizes = [4, 32], strides = [1, 1]} : vector<4x96xf32> to vector<4x32xf32>
    %251 = arith.addf %249, %250 : vector<4x32xf32>
    %252 = arith.negf %251 : vector<4x32xf32>
    %253 = math.exp %252 : vector<4x32xf32>
    %cst_79 = arith.constant 1.000000e+00 : f32
    %254 = vector.broadcast %cst_79 : f32 to vector<4x32xf32>
    %255 = arith.addf %254, %253 : vector<4x32xf32>
    %256 = arith.divf %254, %255 : vector<4x32xf32>
    %257 = vector.extract_strided_slice %239 {offsets = [0, 64], sizes = [4, 32], strides = [1, 1]} : vector<4x96xf32> to vector<4x32xf32>
    %258 = vector.extract_strided_slice %240 {offsets = [0, 64], sizes = [4, 32], strides = [1, 1]} : vector<4x96xf32> to vector<4x32xf32>
    %259 = vector.broadcast %20 : vector<1x32xf32> to vector<4x32xf32>
    %260 = arith.addf %258, %259 : vector<4x32xf32>
    %261 = arith.mulf %248, %260 : vector<4x32xf32>
    %262 = arith.addf %257, %261 : vector<4x32xf32>
    %263 = math.tanh %262 : vector<4x32xf32>
    %cst_80 = arith.constant 1.000000e+00 : f32
    %264 = vector.broadcast %cst_80 : f32 to vector<4x32xf32>
    %265 = arith.subf %264, %256 : vector<4x32xf32>
    %266 = arith.mulf %265, %263 : vector<4x32xf32>
    %267 = arith.mulf %256, %187 : vector<4x32xf32>
    %268 = arith.addf %266, %267 : vector<4x32xf32>
    %cst_81 = arith.constant 0.000000e+00 : f32
    %269 = vector.shape_cast %236 : vector<4x1xi1> to vector<4x1xi1>
    %270 = vector.broadcast %269 : vector<4x1xi1> to vector<4x32xi1>
    %271 = vector.broadcast %cst_81 : f32 to vector<4x32xf32>
    %272 = arith.select %270, %268, %271 : vector<4x32xi1>, vector<4x32xf32>
    %273 = arith.index_cast %192 : i32 to index
    %c0_82 = arith.constant 0 : index
    %c0_83 = arith.constant 0 : index
    %274 = vector.load %arg19[%273, %c0_82, %c0_83] : memref<8x4x32xf32, #tpu.memory_space<vmem>>, vector<1x4x32xf32>
    %275 = vector.shape_cast %274 : vector<1x4x32xf32> to vector<4x32xf32>
    %276 = vector.shape_cast %272 : vector<4x32xf32> to vector<1x4x32xf32>
    tpu.vector_store %arg19[%273, %c0_82, %c0_83], %276 {strides = array<i32>} : memref<8x4x32xf32, #tpu.memory_space<vmem>>, vector<1x4x32xf32>,
    %c3_i32 = arith.constant 3 : i32
    %c7_i32_84 = arith.constant 7 : i32
    %277 = arith.subi %c7_i32_84, %c3_i32 : i32
    %278 = vector.broadcast %c3_i32 : i32 to vector<4x1xi32>
    %279 = arith.cmpi slt, %278, %0 : vector<4x1xi32>
    %280 = arith.index_cast %c3_i32 : i32 to index
    %c0_85 = arith.constant 0 : index
    %c0_86 = arith.constant 0 : index
    %281 = vector.load %arg16[%280, %c0_85, %c0_86] : memref<8x4x96xf32, #tpu.memory_space<vmem>>, vector<1x4x96xf32>
    %282 = vector.shape_cast %281 : vector<1x4x96xf32> to vector<4x96xf32>
    %cst_87 = arith.constant dense<0.000000e+00> : vector<4x96xf32>
    %283 = tpu.matmul %230, %17, %cst_87 {dimension_numbers = #tpu.dot_dimension_numbers<[1], [0], [0], [1], [0, 0, 1, 1], [], []>} : vector<4x32xf32>, vector<32x96xf32>, vector<4x96xf32> -> vector<4x96xf32>
    %284 = vector.extract_strided_slice %282 {offsets = [0, 0], sizes = [4, 32], strides = [1, 1]} : vector<4x96xf32> to vector<4x32xf32>
    %285 = vector.extract_strided_slice %283 {offsets = [0, 0], sizes = [4, 32], strides = [1, 1]} : vector<4x96xf32> to vector<4x32xf32>
    %286 = arith.addf %284, %285 : vector<4x32xf32>
    %287 = arith.negf %286 : vector<4x32xf32>
    %288 = math.exp %287 : vector<4x32xf32>
    %cst_88 = arith.constant 1.000000e+00 : f32
    %289 = vector.broadcast %cst_88 : f32 to vector<4x32xf32>
    %290 = arith.addf %289, %288 : vector<4x32xf32>
    %291 = arith.divf %289, %290 : vector<4x32xf32>
    %292 = vector.extract_strided_slice %282 {offsets = [0, 32], sizes = [4, 32], strides = [1, 1]} : vector<4x96xf32> to vector<4x32xf32>
    %293 = vector.extract_strided_slice %283 {offsets = [0, 32], sizes = [4, 32], strides = [1, 1]} : vector<4x96xf32> to vector<4x32xf32>
    %294 = arith.addf %292, %293 : vector<4x32xf32>
    %295 = arith.negf %294 : vector<4x32xf32>
    %296 = math.exp %295 : vector<4x32xf32>
    %cst_89 = arith.constant 1.000000e+00 : f32
    %297 = vector.broadcast %cst_89 : f32 to vector<4x32xf32>
    %298 = arith.addf %297, %296 : vector<4x32xf32>
    %299 = arith.divf %297, %298 : vector<4x32xf32>
    %300 = vector.extract_strided_slice %282 {offsets = [0, 64], sizes = [4, 32], strides = [1, 1]} : vector<4x96xf32> to vector<4x32xf32>
    %301 = vector.extract_strided_slice %283 {offsets = [0, 64], sizes = [4, 32], strides = [1, 1]} : vector<4x96xf32> to vector<4x32xf32>
    %302 = vector.broadcast %18 : vector<1x32xf32> to vector<4x32xf32>
    %303 = arith.addf %301, %302 : vector<4x32xf32>
    %304 = arith.mulf %291, %303 : vector<4x32xf32>
    %305 = arith.addf %300, %304 : vector<4x32xf32>
    %306 = math.tanh %305 : vector<4x32xf32>
    %cst_90 = arith.constant 1.000000e+00 : f32
    %307 = vector.broadcast %cst_90 : f32 to vector<4x32xf32>
    %308 = arith.subf %307, %299 : vector<4x32xf32>
    %309 = arith.mulf %308, %306 : vector<4x32xf32>
    %310 = arith.mulf %299, %230 : vector<4x32xf32>
    %311 = arith.addf %309, %310 : vector<4x32xf32>
    %cst_91 = arith.constant 0.000000e+00 : f32
    %312 = vector.shape_cast %279 : vector<4x1xi1> to vector<4x1xi1>
    %313 = vector.broadcast %312 : vector<4x1xi1> to vector<4x32xi1>
    %314 = vector.broadcast %cst_91 : f32 to vector<4x32xf32>
    %315 = arith.select %313, %311, %314 : vector<4x32xi1>, vector<4x32xf32>
    %316 = arith.index_cast %c3_i32 : i32 to index
    %c0_92 = arith.constant 0 : index
    %c0_93 = arith.constant 0 : index
    %317 = vector.load %arg18[%316, %c0_92, %c0_93] : memref<8x4x32xf32, #tpu.memory_space<vmem>>, vector<1x4x32xf32>
    %318 = vector.shape_cast %317 : vector<1x4x32xf32> to vector<4x32xf32>
    %319 = vector.shape_cast %315 : vector<4x32xf32> to vector<1x4x32xf32>
    tpu.vector_store %arg18[%316, %c0_92, %c0_93], %319 {strides = array<i32>} : memref<8x4x32xf32, #tpu.memory_space<vmem>>, vector<1x4x32xf32>,
    %320 = vector.broadcast %277 : i32 to vector<4x1xi32>
    %321 = arith.cmpi slt, %320, %0 : vector<4x1xi32>
    %322 = arith.index_cast %277 : i32 to index
    %c0_94 = arith.constant 0 : index
    %c0_95 = arith.constant 0 : index
    %323 = vector.load %arg17[%322, %c0_94, %c0_95] : memref<8x4x96xf32, #tpu.memory_space<vmem>>, vector<1x4x96xf32>
    %324 = vector.shape_cast %323 : vector<1x4x96xf32> to vector<4x96xf32>
    %cst_96 = arith.constant dense<0.000000e+00> : vector<4x96xf32>
    %325 = tpu.matmul %272, %19, %cst_96 {dimension_numbers = #tpu.dot_dimension_numbers<[1], [0], [0], [1], [0, 0, 1, 1], [], []>} : vector<4x32xf32>, vector<32x96xf32>, vector<4x96xf32> -> vector<4x96xf32>
    %326 = vector.extract_strided_slice %324 {offsets = [0, 0], sizes = [4, 32], strides = [1, 1]} : vector<4x96xf32> to vector<4x32xf32>
    %327 = vector.extract_strided_slice %325 {offsets = [0, 0], sizes = [4, 32], strides = [1, 1]} : vector<4x96xf32> to vector<4x32xf32>
    %328 = arith.addf %326, %327 : vector<4x32xf32>
    %329 = arith.negf %328 : vector<4x32xf32>
    %330 = math.exp %329 : vector<4x32xf32>
    %cst_97 = arith.constant 1.000000e+00 : f32
    %331 = vector.broadcast %cst_97 : f32 to vector<4x32xf32>
    %332 = arith.addf %331, %330 : vector<4x32xf32>
    %333 = arith.divf %331, %332 : vector<4x32xf32>
    %334 = vector.extract_strided_slice %324 {offsets = [0, 32], sizes = [4, 32], strides = [1, 1]} : vector<4x96xf32> to vector<4x32xf32>
    %335 = vector.extract_strided_slice %325 {offsets = [0, 32], sizes = [4, 32], strides = [1, 1]} : vector<4x96xf32> to vector<4x32xf32>
    %336 = arith.addf %334, %335 : vector<4x32xf32>
    %337 = arith.negf %336 : vector<4x32xf32>
    %338 = math.exp %337 : vector<4x32xf32>
    %cst_98 = arith.constant 1.000000e+00 : f32
    %339 = vector.broadcast %cst_98 : f32 to vector<4x32xf32>
    %340 = arith.addf %339, %338 : vector<4x32xf32>
    %341 = arith.divf %339, %340 : vector<4x32xf32>
    %342 = vector.extract_strided_slice %324 {offsets = [0, 64], sizes = [4, 32], strides = [1, 1]} : vector<4x96xf32> to vector<4x32xf32>
    %343 = vector.extract_strided_slice %325 {offsets = [0, 64], sizes = [4, 32], strides = [1, 1]} : vector<4x96xf32> to vector<4x32xf32>
    %344 = vector.broadcast %20 : vector<1x32xf32> to vector<4x32xf32>
    %345 = arith.addf %343, %344 : vector<4x32xf32>
    %346 = arith.mulf %333, %345 : vector<4x32xf32>
    %347 = arith.addf %342, %346 : vector<4x32xf32>
    %348 = math.tanh %347 : vector<4x32xf32>
    %cst_99 = arith.constant 1.000000e+00 : f32
    %349 = vector.broadcast %cst_99 : f32 to vector<4x32xf32>
    %350 = arith.subf %349, %341 : vector<4x32xf32>
    %351 = arith.mulf %350, %348 : vector<4x32xf32>
    %352 = arith.mulf %341, %272 : vector<4x32xf32>
    %353 = arith.addf %351, %352 : vector<4x32xf32>
    %cst_100 = arith.constant 0.000000e+00 : f32
    %354 = vector.shape_cast %321 : vector<4x1xi1> to vector<4x1xi1>
    %355 = vector.broadcast %354 : vector<4x1xi1> to vector<4x32xi1>
    %356 = vector.broadcast %cst_100 : f32 to vector<4x32xf32>
    %357 = arith.select %355, %353, %356 : vector<4x32xi1>, vector<4x32xf32>
    %358 = arith.index_cast %277 : i32 to index
    %c0_101 = arith.constant 0 : index
    %c0_102 = arith.constant 0 : index
    %359 = vector.load %arg19[%358, %c0_101, %c0_102] : memref<8x4x32xf32, #tpu.memory_space<vmem>>, vector<1x4x32xf32>
    %360 = vector.shape_cast %359 : vector<1x4x32xf32> to vector<4x32xf32>
    %361 = vector.shape_cast %357 : vector<4x32xf32> to vector<1x4x32xf32>
    tpu.vector_store %arg19[%358, %c0_101, %c0_102], %361 {strides = array<i32>} : memref<8x4x32xf32, #tpu.memory_space<vmem>>, vector<1x4x32xf32>,
    %c4_i32 = arith.constant 4 : i32
    %c7_i32_103 = arith.constant 7 : i32
    %362 = arith.subi %c7_i32_103, %c4_i32 : i32
    %363 = vector.broadcast %c4_i32 : i32 to vector<4x1xi32>
    %364 = arith.cmpi slt, %363, %0 : vector<4x1xi32>
    %365 = arith.index_cast %c4_i32 : i32 to index
    %c0_104 = arith.constant 0 : index
    %c0_105 = arith.constant 0 : index
    %366 = vector.load %arg16[%365, %c0_104, %c0_105] : memref<8x4x96xf32, #tpu.memory_space<vmem>>, vector<1x4x96xf32>
    %367 = vector.shape_cast %366 : vector<1x4x96xf32> to vector<4x96xf32>
    %cst_106 = arith.constant dense<0.000000e+00> : vector<4x96xf32>
    %368 = tpu.matmul %315, %17, %cst_106 {dimension_numbers = #tpu.dot_dimension_numbers<[1], [0], [0], [1], [0, 0, 1, 1], [], []>} : vector<4x32xf32>, vector<32x96xf32>, vector<4x96xf32> -> vector<4x96xf32>
    %369 = vector.extract_strided_slice %367 {offsets = [0, 0], sizes = [4, 32], strides = [1, 1]} : vector<4x96xf32> to vector<4x32xf32>
    %370 = vector.extract_strided_slice %368 {offsets = [0, 0], sizes = [4, 32], strides = [1, 1]} : vector<4x96xf32> to vector<4x32xf32>
    %371 = arith.addf %369, %370 : vector<4x32xf32>
    %372 = arith.negf %371 : vector<4x32xf32>
    %373 = math.exp %372 : vector<4x32xf32>
    %cst_107 = arith.constant 1.000000e+00 : f32
    %374 = vector.broadcast %cst_107 : f32 to vector<4x32xf32>
    %375 = arith.addf %374, %373 : vector<4x32xf32>
    %376 = arith.divf %374, %375 : vector<4x32xf32>
    %377 = vector.extract_strided_slice %367 {offsets = [0, 32], sizes = [4, 32], strides = [1, 1]} : vector<4x96xf32> to vector<4x32xf32>
    %378 = vector.extract_strided_slice %368 {offsets = [0, 32], sizes = [4, 32], strides = [1, 1]} : vector<4x96xf32> to vector<4x32xf32>
    %379 = arith.addf %377, %378 : vector<4x32xf32>
    %380 = arith.negf %379 : vector<4x32xf32>
    %381 = math.exp %380 : vector<4x32xf32>
    %cst_108 = arith.constant 1.000000e+00 : f32
    %382 = vector.broadcast %cst_108 : f32 to vector<4x32xf32>
    %383 = arith.addf %382, %381 : vector<4x32xf32>
    %384 = arith.divf %382, %383 : vector<4x32xf32>
    %385 = vector.extract_strided_slice %367 {offsets = [0, 64], sizes = [4, 32], strides = [1, 1]} : vector<4x96xf32> to vector<4x32xf32>
    %386 = vector.extract_strided_slice %368 {offsets = [0, 64], sizes = [4, 32], strides = [1, 1]} : vector<4x96xf32> to vector<4x32xf32>
    %387 = vector.broadcast %18 : vector<1x32xf32> to vector<4x32xf32>
    %388 = arith.addf %386, %387 : vector<4x32xf32>
    %389 = arith.mulf %376, %388 : vector<4x32xf32>
    %390 = arith.addf %385, %389 : vector<4x32xf32>
    %391 = math.tanh %390 : vector<4x32xf32>
    %cst_109 = arith.constant 1.000000e+00 : f32
    %392 = vector.broadcast %cst_109 : f32 to vector<4x32xf32>
    %393 = arith.subf %392, %384 : vector<4x32xf32>
    %394 = arith.mulf %393, %391 : vector<4x32xf32>
    %395 = arith.mulf %384, %315 : vector<4x32xf32>
    %396 = arith.addf %394, %395 : vector<4x32xf32>
    %cst_110 = arith.constant 0.000000e+00 : f32
    %397 = vector.shape_cast %364 : vector<4x1xi1> to vector<4x1xi1>
    %398 = vector.broadcast %397 : vector<4x1xi1> to vector<4x32xi1>
    %399 = vector.broadcast %cst_110 : f32 to vector<4x32xf32>
    %400 = arith.select %398, %396, %399 : vector<4x32xi1>, vector<4x32xf32>
    %401 = arith.index_cast %c4_i32 : i32 to index
    %c0_111 = arith.constant 0 : index
    %c0_112 = arith.constant 0 : index
    %402 = vector.load %arg18[%401, %c0_111, %c0_112] : memref<8x4x32xf32, #tpu.memory_space<vmem>>, vector<1x4x32xf32>
    %403 = vector.shape_cast %402 : vector<1x4x32xf32> to vector<4x32xf32>
    %404 = vector.shape_cast %400 : vector<4x32xf32> to vector<1x4x32xf32>
    tpu.vector_store %arg18[%401, %c0_111, %c0_112], %404 {strides = array<i32>} : memref<8x4x32xf32, #tpu.memory_space<vmem>>, vector<1x4x32xf32>,
    %405 = vector.broadcast %362 : i32 to vector<4x1xi32>
    %406 = arith.cmpi slt, %405, %0 : vector<4x1xi32>
    %407 = arith.index_cast %362 : i32 to index
    %c0_113 = arith.constant 0 : index
    %c0_114 = arith.constant 0 : index
    %408 = vector.load %arg17[%407, %c0_113, %c0_114] : memref<8x4x96xf32, #tpu.memory_space<vmem>>, vector<1x4x96xf32>
    %409 = vector.shape_cast %408 : vector<1x4x96xf32> to vector<4x96xf32>
    %cst_115 = arith.constant dense<0.000000e+00> : vector<4x96xf32>
    %410 = tpu.matmul %357, %19, %cst_115 {dimension_numbers = #tpu.dot_dimension_numbers<[1], [0], [0], [1], [0, 0, 1, 1], [], []>} : vector<4x32xf32>, vector<32x96xf32>, vector<4x96xf32> -> vector<4x96xf32>
    %411 = vector.extract_strided_slice %409 {offsets = [0, 0], sizes = [4, 32], strides = [1, 1]} : vector<4x96xf32> to vector<4x32xf32>
    %412 = vector.extract_strided_slice %410 {offsets = [0, 0], sizes = [4, 32], strides = [1, 1]} : vector<4x96xf32> to vector<4x32xf32>
    %413 = arith.addf %411, %412 : vector<4x32xf32>
    %414 = arith.negf %413 : vector<4x32xf32>
    %415 = math.exp %414 : vector<4x32xf32>
    %cst_116 = arith.constant 1.000000e+00 : f32
    %416 = vector.broadcast %cst_116 : f32 to vector<4x32xf32>
    %417 = arith.addf %416, %415 : vector<4x32xf32>
    %418 = arith.divf %416, %417 : vector<4x32xf32>
    %419 = vector.extract_strided_slice %409 {offsets = [0, 32], sizes = [4, 32], strides = [1, 1]} : vector<4x96xf32> to vector<4x32xf32>
    %420 = vector.extract_strided_slice %410 {offsets = [0, 32], sizes = [4, 32], strides = [1, 1]} : vector<4x96xf32> to vector<4x32xf32>
    %421 = arith.addf %419, %420 : vector<4x32xf32>
    %422 = arith.negf %421 : vector<4x32xf32>
    %423 = math.exp %422 : vector<4x32xf32>
    %cst_117 = arith.constant 1.000000e+00 : f32
    %424 = vector.broadcast %cst_117 : f32 to vector<4x32xf32>
    %425 = arith.addf %424, %423 : vector<4x32xf32>
    %426 = arith.divf %424, %425 : vector<4x32xf32>
    %427 = vector.extract_strided_slice %409 {offsets = [0, 64], sizes = [4, 32], strides = [1, 1]} : vector<4x96xf32> to vector<4x32xf32>
    %428 = vector.extract_strided_slice %410 {offsets = [0, 64], sizes = [4, 32], strides = [1, 1]} : vector<4x96xf32> to vector<4x32xf32>
    %429 = vector.broadcast %20 : vector<1x32xf32> to vector<4x32xf32>
    %430 = arith.addf %428, %429 : vector<4x32xf32>
    %431 = arith.mulf %418, %430 : vector<4x32xf32>
    %432 = arith.addf %427, %431 : vector<4x32xf32>
    %433 = math.tanh %432 : vector<4x32xf32>
    %cst_118 = arith.constant 1.000000e+00 : f32
    %434 = vector.broadcast %cst_118 : f32 to vector<4x32xf32>
    %435 = arith.subf %434, %426 : vector<4x32xf32>
    %436 = arith.mulf %435, %433 : vector<4x32xf32>
    %437 = arith.mulf %426, %357 : vector<4x32xf32>
    %438 = arith.addf %436, %437 : vector<4x32xf32>
    %cst_119 = arith.constant 0.000000e+00 : f32
    %439 = vector.shape_cast %406 : vector<4x1xi1> to vector<4x1xi1>
    %440 = vector.broadcast %439 : vector<4x1xi1> to vector<4x32xi1>
    %441 = vector.broadcast %cst_119 : f32 to vector<4x32xf32>
    %442 = arith.select %440, %438, %441 : vector<4x32xi1>, vector<4x32xf32>
    %443 = arith.index_cast %362 : i32 to index
    %c0_120 = arith.constant 0 : index
    %c0_121 = arith.constant 0 : index
    %444 = vector.load %arg19[%443, %c0_120, %c0_121] : memref<8x4x32xf32, #tpu.memory_space<vmem>>, vector<1x4x32xf32>
    %445 = vector.shape_cast %444 : vector<1x4x32xf32> to vector<4x32xf32>
    %446 = vector.shape_cast %442 : vector<4x32xf32> to vector<1x4x32xf32>
    tpu.vector_store %arg19[%443, %c0_120, %c0_121], %446 {strides = array<i32>} : memref<8x4x32xf32, #tpu.memory_space<vmem>>, vector<1x4x32xf32>,
    %c5_i32 = arith.constant 5 : i32
    %c7_i32_122 = arith.constant 7 : i32
    %447 = arith.subi %c7_i32_122, %c5_i32 : i32
    %448 = vector.broadcast %c5_i32 : i32 to vector<4x1xi32>
    %449 = arith.cmpi slt, %448, %0 : vector<4x1xi32>
    %450 = arith.index_cast %c5_i32 : i32 to index
    %c0_123 = arith.constant 0 : index
    %c0_124 = arith.constant 0 : index
    %451 = vector.load %arg16[%450, %c0_123, %c0_124] : memref<8x4x96xf32, #tpu.memory_space<vmem>>, vector<1x4x96xf32>
    %452 = vector.shape_cast %451 : vector<1x4x96xf32> to vector<4x96xf32>
    %cst_125 = arith.constant dense<0.000000e+00> : vector<4x96xf32>
    %453 = tpu.matmul %400, %17, %cst_125 {dimension_numbers = #tpu.dot_dimension_numbers<[1], [0], [0], [1], [0, 0, 1, 1], [], []>} : vector<4x32xf32>, vector<32x96xf32>, vector<4x96xf32> -> vector<4x96xf32>
    %454 = vector.extract_strided_slice %452 {offsets = [0, 0], sizes = [4, 32], strides = [1, 1]} : vector<4x96xf32> to vector<4x32xf32>
    %455 = vector.extract_strided_slice %453 {offsets = [0, 0], sizes = [4, 32], strides = [1, 1]} : vector<4x96xf32> to vector<4x32xf32>
    %456 = arith.addf %454, %455 : vector<4x32xf32>
    %457 = arith.negf %456 : vector<4x32xf32>
    %458 = math.exp %457 : vector<4x32xf32>
    %cst_126 = arith.constant 1.000000e+00 : f32
    %459 = vector.broadcast %cst_126 : f32 to vector<4x32xf32>
    %460 = arith.addf %459, %458 : vector<4x32xf32>
    %461 = arith.divf %459, %460 : vector<4x32xf32>
    %462 = vector.extract_strided_slice %452 {offsets = [0, 32], sizes = [4, 32], strides = [1, 1]} : vector<4x96xf32> to vector<4x32xf32>
    %463 = vector.extract_strided_slice %453 {offsets = [0, 32], sizes = [4, 32], strides = [1, 1]} : vector<4x96xf32> to vector<4x32xf32>
    %464 = arith.addf %462, %463 : vector<4x32xf32>
    %465 = arith.negf %464 : vector<4x32xf32>
    %466 = math.exp %465 : vector<4x32xf32>
    %cst_127 = arith.constant 1.000000e+00 : f32
    %467 = vector.broadcast %cst_127 : f32 to vector<4x32xf32>
    %468 = arith.addf %467, %466 : vector<4x32xf32>
    %469 = arith.divf %467, %468 : vector<4x32xf32>
    %470 = vector.extract_strided_slice %452 {offsets = [0, 64], sizes = [4, 32], strides = [1, 1]} : vector<4x96xf32> to vector<4x32xf32>
    %471 = vector.extract_strided_slice %453 {offsets = [0, 64], sizes = [4, 32], strides = [1, 1]} : vector<4x96xf32> to vector<4x32xf32>
    %472 = vector.broadcast %18 : vector<1x32xf32> to vector<4x32xf32>
    %473 = arith.addf %471, %472 : vector<4x32xf32>
    %474 = arith.mulf %461, %473 : vector<4x32xf32>
    %475 = arith.addf %470, %474 : vector<4x32xf32>
    %476 = math.tanh %475 : vector<4x32xf32>
    %cst_128 = arith.constant 1.000000e+00 : f32
    %477 = vector.broadcast %cst_128 : f32 to vector<4x32xf32>
    %478 = arith.subf %477, %469 : vector<4x32xf32>
    %479 = arith.mulf %478, %476 : vector<4x32xf32>
    %480 = arith.mulf %469, %400 : vector<4x32xf32>
    %481 = arith.addf %479, %480 : vector<4x32xf32>
    %cst_129 = arith.constant 0.000000e+00 : f32
    %482 = vector.shape_cast %449 : vector<4x1xi1> to vector<4x1xi1>
    %483 = vector.broadcast %482 : vector<4x1xi1> to vector<4x32xi1>
    %484 = vector.broadcast %cst_129 : f32 to vector<4x32xf32>
    %485 = arith.select %483, %481, %484 : vector<4x32xi1>, vector<4x32xf32>
    %486 = arith.index_cast %c5_i32 : i32 to index
    %c0_130 = arith.constant 0 : index
    %c0_131 = arith.constant 0 : index
    %487 = vector.load %arg18[%486, %c0_130, %c0_131] : memref<8x4x32xf32, #tpu.memory_space<vmem>>, vector<1x4x32xf32>
    %488 = vector.shape_cast %487 : vector<1x4x32xf32> to vector<4x32xf32>
    %489 = vector.shape_cast %485 : vector<4x32xf32> to vector<1x4x32xf32>
    tpu.vector_store %arg18[%486, %c0_130, %c0_131], %489 {strides = array<i32>} : memref<8x4x32xf32, #tpu.memory_space<vmem>>, vector<1x4x32xf32>,
    %490 = vector.broadcast %447 : i32 to vector<4x1xi32>
    %491 = arith.cmpi slt, %490, %0 : vector<4x1xi32>
    %492 = arith.index_cast %447 : i32 to index
    %c0_132 = arith.constant 0 : index
    %c0_133 = arith.constant 0 : index
    %493 = vector.load %arg17[%492, %c0_132, %c0_133] : memref<8x4x96xf32, #tpu.memory_space<vmem>>, vector<1x4x96xf32>
    %494 = vector.shape_cast %493 : vector<1x4x96xf32> to vector<4x96xf32>
    %cst_134 = arith.constant dense<0.000000e+00> : vector<4x96xf32>
    %495 = tpu.matmul %442, %19, %cst_134 {dimension_numbers = #tpu.dot_dimension_numbers<[1], [0], [0], [1], [0, 0, 1, 1], [], []>} : vector<4x32xf32>, vector<32x96xf32>, vector<4x96xf32> -> vector<4x96xf32>
    %496 = vector.extract_strided_slice %494 {offsets = [0, 0], sizes = [4, 32], strides = [1, 1]} : vector<4x96xf32> to vector<4x32xf32>
    %497 = vector.extract_strided_slice %495 {offsets = [0, 0], sizes = [4, 32], strides = [1, 1]} : vector<4x96xf32> to vector<4x32xf32>
    %498 = arith.addf %496, %497 : vector<4x32xf32>
    %499 = arith.negf %498 : vector<4x32xf32>
    %500 = math.exp %499 : vector<4x32xf32>
    %cst_135 = arith.constant 1.000000e+00 : f32
    %501 = vector.broadcast %cst_135 : f32 to vector<4x32xf32>
    %502 = arith.addf %501, %500 : vector<4x32xf32>
    %503 = arith.divf %501, %502 : vector<4x32xf32>
    %504 = vector.extract_strided_slice %494 {offsets = [0, 32], sizes = [4, 32], strides = [1, 1]} : vector<4x96xf32> to vector<4x32xf32>
    %505 = vector.extract_strided_slice %495 {offsets = [0, 32], sizes = [4, 32], strides = [1, 1]} : vector<4x96xf32> to vector<4x32xf32>
    %506 = arith.addf %504, %505 : vector<4x32xf32>
    %507 = arith.negf %506 : vector<4x32xf32>
    %508 = math.exp %507 : vector<4x32xf32>
    %cst_136 = arith.constant 1.000000e+00 : f32
    %509 = vector.broadcast %cst_136 : f32 to vector<4x32xf32>
    %510 = arith.addf %509, %508 : vector<4x32xf32>
    %511 = arith.divf %509, %510 : vector<4x32xf32>
    %512 = vector.extract_strided_slice %494 {offsets = [0, 64], sizes = [4, 32], strides = [1, 1]} : vector<4x96xf32> to vector<4x32xf32>
    %513 = vector.extract_strided_slice %495 {offsets = [0, 64], sizes = [4, 32], strides = [1, 1]} : vector<4x96xf32> to vector<4x32xf32>
    %514 = vector.broadcast %20 : vector<1x32xf32> to vector<4x32xf32>
    %515 = arith.addf %513, %514 : vector<4x32xf32>
    %516 = arith.mulf %503, %515 : vector<4x32xf32>
    %517 = arith.addf %512, %516 : vector<4x32xf32>
    %518 = math.tanh %517 : vector<4x32xf32>
    %cst_137 = arith.constant 1.000000e+00 : f32
    %519 = vector.broadcast %cst_137 : f32 to vector<4x32xf32>
    %520 = arith.subf %519, %511 : vector<4x32xf32>
    %521 = arith.mulf %520, %518 : vector<4x32xf32>
    %522 = arith.mulf %511, %442 : vector<4x32xf32>
    %523 = arith.addf %521, %522 : vector<4x32xf32>
    %cst_138 = arith.constant 0.000000e+00 : f32
    %524 = vector.shape_cast %491 : vector<4x1xi1> to vector<4x1xi1>
    %525 = vector.broadcast %524 : vector<4x1xi1> to vector<4x32xi1>
    %526 = vector.broadcast %cst_138 : f32 to vector<4x32xf32>
    %527 = arith.select %525, %523, %526 : vector<4x32xi1>, vector<4x32xf32>
    %528 = arith.index_cast %447 : i32 to index
    %c0_139 = arith.constant 0 : index
    %c0_140 = arith.constant 0 : index
    %529 = vector.load %arg19[%528, %c0_139, %c0_140] : memref<8x4x32xf32, #tpu.memory_space<vmem>>, vector<1x4x32xf32>
    %530 = vector.shape_cast %529 : vector<1x4x32xf32> to vector<4x32xf32>
    %531 = vector.shape_cast %527 : vector<4x32xf32> to vector<1x4x32xf32>
    tpu.vector_store %arg19[%528, %c0_139, %c0_140], %531 {strides = array<i32>} : memref<8x4x32xf32, #tpu.memory_space<vmem>>, vector<1x4x32xf32>,
    %c6_i32 = arith.constant 6 : i32
    %c7_i32_141 = arith.constant 7 : i32
    %532 = arith.subi %c7_i32_141, %c6_i32 : i32
    %533 = vector.broadcast %c6_i32 : i32 to vector<4x1xi32>
    %534 = arith.cmpi slt, %533, %0 : vector<4x1xi32>
    %535 = arith.index_cast %c6_i32 : i32 to index
    %c0_142 = arith.constant 0 : index
    %c0_143 = arith.constant 0 : index
    %536 = vector.load %arg16[%535, %c0_142, %c0_143] : memref<8x4x96xf32, #tpu.memory_space<vmem>>, vector<1x4x96xf32>
    %537 = vector.shape_cast %536 : vector<1x4x96xf32> to vector<4x96xf32>
    %cst_144 = arith.constant dense<0.000000e+00> : vector<4x96xf32>
    %538 = tpu.matmul %485, %17, %cst_144 {dimension_numbers = #tpu.dot_dimension_numbers<[1], [0], [0], [1], [0, 0, 1, 1], [], []>} : vector<4x32xf32>, vector<32x96xf32>, vector<4x96xf32> -> vector<4x96xf32>
    %539 = vector.extract_strided_slice %537 {offsets = [0, 0], sizes = [4, 32], strides = [1, 1]} : vector<4x96xf32> to vector<4x32xf32>
    %540 = vector.extract_strided_slice %538 {offsets = [0, 0], sizes = [4, 32], strides = [1, 1]} : vector<4x96xf32> to vector<4x32xf32>
    %541 = arith.addf %539, %540 : vector<4x32xf32>
    %542 = arith.negf %541 : vector<4x32xf32>
    %543 = math.exp %542 : vector<4x32xf32>
    %cst_145 = arith.constant 1.000000e+00 : f32
    %544 = vector.broadcast %cst_145 : f32 to vector<4x32xf32>
    %545 = arith.addf %544, %543 : vector<4x32xf32>
    %546 = arith.divf %544, %545 : vector<4x32xf32>
    %547 = vector.extract_strided_slice %537 {offsets = [0, 32], sizes = [4, 32], strides = [1, 1]} : vector<4x96xf32> to vector<4x32xf32>
    %548 = vector.extract_strided_slice %538 {offsets = [0, 32], sizes = [4, 32], strides = [1, 1]} : vector<4x96xf32> to vector<4x32xf32>
    %549 = arith.addf %547, %548 : vector<4x32xf32>
    %550 = arith.negf %549 : vector<4x32xf32>
    %551 = math.exp %550 : vector<4x32xf32>
    %cst_146 = arith.constant 1.000000e+00 : f32
    %552 = vector.broadcast %cst_146 : f32 to vector<4x32xf32>
    %553 = arith.addf %552, %551 : vector<4x32xf32>
    %554 = arith.divf %552, %553 : vector<4x32xf32>
    %555 = vector.extract_strided_slice %537 {offsets = [0, 64], sizes = [4, 32], strides = [1, 1]} : vector<4x96xf32> to vector<4x32xf32>
    %556 = vector.extract_strided_slice %538 {offsets = [0, 64], sizes = [4, 32], strides = [1, 1]} : vector<4x96xf32> to vector<4x32xf32>
    %557 = vector.broadcast %18 : vector<1x32xf32> to vector<4x32xf32>
    %558 = arith.addf %556, %557 : vector<4x32xf32>
    %559 = arith.mulf %546, %558 : vector<4x32xf32>
    %560 = arith.addf %555, %559 : vector<4x32xf32>
    %561 = math.tanh %560 : vector<4x32xf32>
    %cst_147 = arith.constant 1.000000e+00 : f32
    %562 = vector.broadcast %cst_147 : f32 to vector<4x32xf32>
    %563 = arith.subf %562, %554 : vector<4x32xf32>
    %564 = arith.mulf %563, %561 : vector<4x32xf32>
    %565 = arith.mulf %554, %485 : vector<4x32xf32>
    %566 = arith.addf %564, %565 : vector<4x32xf32>
    %cst_148 = arith.constant 0.000000e+00 : f32
    %567 = vector.shape_cast %534 : vector<4x1xi1> to vector<4x1xi1>
    %568 = vector.broadcast %567 : vector<4x1xi1> to vector<4x32xi1>
    %569 = vector.broadcast %cst_148 : f32 to vector<4x32xf32>
    %570 = arith.select %568, %566, %569 : vector<4x32xi1>, vector<4x32xf32>
    %571 = arith.index_cast %c6_i32 : i32 to index
    %c0_149 = arith.constant 0 : index
    %c0_150 = arith.constant 0 : index
    %572 = vector.load %arg18[%571, %c0_149, %c0_150] : memref<8x4x32xf32, #tpu.memory_space<vmem>>, vector<1x4x32xf32>
    %573 = vector.shape_cast %572 : vector<1x4x32xf32> to vector<4x32xf32>
    %574 = vector.shape_cast %570 : vector<4x32xf32> to vector<1x4x32xf32>
    tpu.vector_store %arg18[%571, %c0_149, %c0_150], %574 {strides = array<i32>} : memref<8x4x32xf32, #tpu.memory_space<vmem>>, vector<1x4x32xf32>,
    %575 = vector.broadcast %532 : i32 to vector<4x1xi32>
    %576 = arith.cmpi slt, %575, %0 : vector<4x1xi32>
    %577 = arith.index_cast %532 : i32 to index
    %c0_151 = arith.constant 0 : index
    %c0_152 = arith.constant 0 : index
    %578 = vector.load %arg17[%577, %c0_151, %c0_152] : memref<8x4x96xf32, #tpu.memory_space<vmem>>, vector<1x4x96xf32>
    %579 = vector.shape_cast %578 : vector<1x4x96xf32> to vector<4x96xf32>
    %cst_153 = arith.constant dense<0.000000e+00> : vector<4x96xf32>
    %580 = tpu.matmul %527, %19, %cst_153 {dimension_numbers = #tpu.dot_dimension_numbers<[1], [0], [0], [1], [0, 0, 1, 1], [], []>} : vector<4x32xf32>, vector<32x96xf32>, vector<4x96xf32> -> vector<4x96xf32>
    %581 = vector.extract_strided_slice %579 {offsets = [0, 0], sizes = [4, 32], strides = [1, 1]} : vector<4x96xf32> to vector<4x32xf32>
    %582 = vector.extract_strided_slice %580 {offsets = [0, 0], sizes = [4, 32], strides = [1, 1]} : vector<4x96xf32> to vector<4x32xf32>
    %583 = arith.addf %581, %582 : vector<4x32xf32>
    %584 = arith.negf %583 : vector<4x32xf32>
    %585 = math.exp %584 : vector<4x32xf32>
    %cst_154 = arith.constant 1.000000e+00 : f32
    %586 = vector.broadcast %cst_154 : f32 to vector<4x32xf32>
    %587 = arith.addf %586, %585 : vector<4x32xf32>
    %588 = arith.divf %586, %587 : vector<4x32xf32>
    %589 = vector.extract_strided_slice %579 {offsets = [0, 32], sizes = [4, 32], strides = [1, 1]} : vector<4x96xf32> to vector<4x32xf32>
    %590 = vector.extract_strided_slice %580 {offsets = [0, 32], sizes = [4, 32], strides = [1, 1]} : vector<4x96xf32> to vector<4x32xf32>
    %591 = arith.addf %589, %590 : vector<4x32xf32>
    %592 = arith.negf %591 : vector<4x32xf32>
    %593 = math.exp %592 : vector<4x32xf32>
    %cst_155 = arith.constant 1.000000e+00 : f32
    %594 = vector.broadcast %cst_155 : f32 to vector<4x32xf32>
    %595 = arith.addf %594, %593 : vector<4x32xf32>
    %596 = arith.divf %594, %595 : vector<4x32xf32>
    %597 = vector.extract_strided_slice %579 {offsets = [0, 64], sizes = [4, 32], strides = [1, 1]} : vector<4x96xf32> to vector<4x32xf32>
    %598 = vector.extract_strided_slice %580 {offsets = [0, 64], sizes = [4, 32], strides = [1, 1]} : vector<4x96xf32> to vector<4x32xf32>
    %599 = vector.broadcast %20 : vector<1x32xf32> to vector<4x32xf32>
    %600 = arith.addf %598, %599 : vector<4x32xf32>
    %601 = arith.mulf %588, %600 : vector<4x32xf32>
    %602 = arith.addf %597, %601 : vector<4x32xf32>
    %603 = math.tanh %602 : vector<4x32xf32>
    %cst_156 = arith.constant 1.000000e+00 : f32
    %604 = vector.broadcast %cst_156 : f32 to vector<4x32xf32>
    %605 = arith.subf %604, %596 : vector<4x32xf32>
    %606 = arith.mulf %605, %603 : vector<4x32xf32>
    %607 = arith.mulf %596, %527 : vector<4x32xf32>
    %608 = arith.addf %606, %607 : vector<4x32xf32>
    %cst_157 = arith.constant 0.000000e+00 : f32
    %609 = vector.shape_cast %576 : vector<4x1xi1> to vector<4x1xi1>
    %610 = vector.broadcast %609 : vector<4x1xi1> to vector<4x32xi1>
    %611 = vector.broadcast %cst_157 : f32 to vector<4x32xf32>
    %612 = arith.select %610, %608, %611 : vector<4x32xi1>, vector<4x32xf32>
    %613 = arith.index_cast %532 : i32 to index
    %c0_158 = arith.constant 0 : index
    %c0_159 = arith.constant 0 : index
    %614 = vector.load %arg19[%613, %c0_158, %c0_159] : memref<8x4x32xf32, #tpu.memory_space<vmem>>, vector<1x4x32xf32>
    %615 = vector.shape_cast %614 : vector<1x4x32xf32> to vector<4x32xf32>
    %616 = vector.shape_cast %612 : vector<4x32xf32> to vector<1x4x32xf32>
    tpu.vector_store %arg19[%613, %c0_158, %c0_159], %616 {strides = array<i32>} : memref<8x4x32xf32, #tpu.memory_space<vmem>>, vector<1x4x32xf32>,
    %c7_i32_160 = arith.constant 7 : i32
    %c7_i32_161 = arith.constant 7 : i32
    %617 = arith.subi %c7_i32_161, %c7_i32_160 : i32
    %618 = vector.broadcast %c7_i32_160 : i32 to vector<4x1xi32>
    %619 = arith.cmpi slt, %618, %0 : vector<4x1xi32>
    %620 = arith.index_cast %c7_i32_160 : i32 to index
    %c0_162 = arith.constant 0 : index
    %c0_163 = arith.constant 0 : index
    %621 = vector.load %arg16[%620, %c0_162, %c0_163] : memref<8x4x96xf32, #tpu.memory_space<vmem>>, vector<1x4x96xf32>
    %622 = vector.shape_cast %621 : vector<1x4x96xf32> to vector<4x96xf32>
    %cst_164 = arith.constant dense<0.000000e+00> : vector<4x96xf32>
    %623 = tpu.matmul %570, %17, %cst_164 {dimension_numbers = #tpu.dot_dimension_numbers<[1], [0], [0], [1], [0, 0, 1, 1], [], []>} : vector<4x32xf32>, vector<32x96xf32>, vector<4x96xf32> -> vector<4x96xf32>
    %624 = vector.extract_strided_slice %622 {offsets = [0, 0], sizes = [4, 32], strides = [1, 1]} : vector<4x96xf32> to vector<4x32xf32>
    %625 = vector.extract_strided_slice %623 {offsets = [0, 0], sizes = [4, 32], strides = [1, 1]} : vector<4x96xf32> to vector<4x32xf32>
    %626 = arith.addf %624, %625 : vector<4x32xf32>
    %627 = arith.negf %626 : vector<4x32xf32>
    %628 = math.exp %627 : vector<4x32xf32>
    %cst_165 = arith.constant 1.000000e+00 : f32
    %629 = vector.broadcast %cst_165 : f32 to vector<4x32xf32>
    %630 = arith.addf %629, %628 : vector<4x32xf32>
    %631 = arith.divf %629, %630 : vector<4x32xf32>
    %632 = vector.extract_strided_slice %622 {offsets = [0, 32], sizes = [4, 32], strides = [1, 1]} : vector<4x96xf32> to vector<4x32xf32>
    %633 = vector.extract_strided_slice %623 {offsets = [0, 32], sizes = [4, 32], strides = [1, 1]} : vector<4x96xf32> to vector<4x32xf32>
    %634 = arith.addf %632, %633 : vector<4x32xf32>
    %635 = arith.negf %634 : vector<4x32xf32>
    %636 = math.exp %635 : vector<4x32xf32>
    %cst_166 = arith.constant 1.000000e+00 : f32
    %637 = vector.broadcast %cst_166 : f32 to vector<4x32xf32>
    %638 = arith.addf %637, %636 : vector<4x32xf32>
    %639 = arith.divf %637, %638 : vector<4x32xf32>
    %640 = vector.extract_strided_slice %622 {offsets = [0, 64], sizes = [4, 32], strides = [1, 1]} : vector<4x96xf32> to vector<4x32xf32>
    %641 = vector.extract_strided_slice %623 {offsets = [0, 64], sizes = [4, 32], strides = [1, 1]} : vector<4x96xf32> to vector<4x32xf32>
    %642 = vector.broadcast %18 : vector<1x32xf32> to vector<4x32xf32>
    %643 = arith.addf %641, %642 : vector<4x32xf32>
    %644 = arith.mulf %631, %643 : vector<4x32xf32>
    %645 = arith.addf %640, %644 : vector<4x32xf32>
    %646 = math.tanh %645 : vector<4x32xf32>
    %cst_167 = arith.constant 1.000000e+00 : f32
    %647 = vector.broadcast %cst_167 : f32 to vector<4x32xf32>
    %648 = arith.subf %647, %639 : vector<4x32xf32>
    %649 = arith.mulf %648, %646 : vector<4x32xf32>
    %650 = arith.mulf %639, %570 : vector<4x32xf32>
    %651 = arith.addf %649, %650 : vector<4x32xf32>
    %cst_168 = arith.constant 0.000000e+00 : f32
    %652 = vector.shape_cast %619 : vector<4x1xi1> to vector<4x1xi1>
    %653 = vector.broadcast %652 : vector<4x1xi1> to vector<4x32xi1>
    %654 = vector.broadcast %cst_168 : f32 to vector<4x32xf32>
    %655 = arith.select %653, %651, %654 : vector<4x32xi1>, vector<4x32xf32>
    %656 = arith.index_cast %c7_i32_160 : i32 to index
    %c0_169 = arith.constant 0 : index
    %c0_170 = arith.constant 0 : index
    %657 = vector.load %arg18[%656, %c0_169, %c0_170] : memref<8x4x32xf32, #tpu.memory_space<vmem>>, vector<1x4x32xf32>
    %658 = vector.shape_cast %657 : vector<1x4x32xf32> to vector<4x32xf32>
    %659 = vector.shape_cast %655 : vector<4x32xf32> to vector<1x4x32xf32>
    tpu.vector_store %arg18[%656, %c0_169, %c0_170], %659 {strides = array<i32>} : memref<8x4x32xf32, #tpu.memory_space<vmem>>, vector<1x4x32xf32>,
    %660 = vector.broadcast %617 : i32 to vector<4x1xi32>
    %661 = arith.cmpi slt, %660, %0 : vector<4x1xi32>
    %662 = arith.index_cast %617 : i32 to index
    %c0_171 = arith.constant 0 : index
    %c0_172 = arith.constant 0 : index
    %663 = vector.load %arg17[%662, %c0_171, %c0_172] : memref<8x4x96xf32, #tpu.memory_space<vmem>>, vector<1x4x96xf32>
    %664 = vector.shape_cast %663 : vector<1x4x96xf32> to vector<4x96xf32>
    %cst_173 = arith.constant dense<0.000000e+00> : vector<4x96xf32>
    %665 = tpu.matmul %612, %19, %cst_173 {dimension_numbers = #tpu.dot_dimension_numbers<[1], [0], [0], [1], [0, 0, 1, 1], [], []>} : vector<4x32xf32>, vector<32x96xf32>, vector<4x96xf32> -> vector<4x96xf32>
    %666 = vector.extract_strided_slice %664 {offsets = [0, 0], sizes = [4, 32], strides = [1, 1]} : vector<4x96xf32> to vector<4x32xf32>
    %667 = vector.extract_strided_slice %665 {offsets = [0, 0], sizes = [4, 32], strides = [1, 1]} : vector<4x96xf32> to vector<4x32xf32>
    %668 = arith.addf %666, %667 : vector<4x32xf32>
    %669 = arith.negf %668 : vector<4x32xf32>
    %670 = math.exp %669 : vector<4x32xf32>
    %cst_174 = arith.constant 1.000000e+00 : f32
    %671 = vector.broadcast %cst_174 : f32 to vector<4x32xf32>
    %672 = arith.addf %671, %670 : vector<4x32xf32>
    %673 = arith.divf %671, %672 : vector<4x32xf32>
    %674 = vector.extract_strided_slice %664 {offsets = [0, 32], sizes = [4, 32], strides = [1, 1]} : vector<4x96xf32> to vector<4x32xf32>
    %675 = vector.extract_strided_slice %665 {offsets = [0, 32], sizes = [4, 32], strides = [1, 1]} : vector<4x96xf32> to vector<4x32xf32>
    %676 = arith.addf %674, %675 : vector<4x32xf32>
    %677 = arith.negf %676 : vector<4x32xf32>
    %678 = math.exp %677 : vector<4x32xf32>
    %cst_175 = arith.constant 1.000000e+00 : f32
    %679 = vector.broadcast %cst_175 : f32 to vector<4x32xf32>
    %680 = arith.addf %679, %678 : vector<4x32xf32>
    %681 = arith.divf %679, %680 : vector<4x32xf32>
    %682 = vector.extract_strided_slice %664 {offsets = [0, 64], sizes = [4, 32], strides = [1, 1]} : vector<4x96xf32> to vector<4x32xf32>
    %683 = vector.extract_strided_slice %665 {offsets = [0, 64], sizes = [4, 32], strides = [1, 1]} : vector<4x96xf32> to vector<4x32xf32>
    %684 = vector.broadcast %20 : vector<1x32xf32> to vector<4x32xf32>
    %685 = arith.addf %683, %684 : vector<4x32xf32>
    %686 = arith.mulf %673, %685 : vector<4x32xf32>
    %687 = arith.addf %682, %686 : vector<4x32xf32>
    %688 = math.tanh %687 : vector<4x32xf32>
    %cst_176 = arith.constant 1.000000e+00 : f32
    %689 = vector.broadcast %cst_176 : f32 to vector<4x32xf32>
    %690 = arith.subf %689, %681 : vector<4x32xf32>
    %691 = arith.mulf %690, %688 : vector<4x32xf32>
    %692 = arith.mulf %681, %612 : vector<4x32xf32>
    %693 = arith.addf %691, %692 : vector<4x32xf32>
    %cst_177 = arith.constant 0.000000e+00 : f32
    %694 = vector.shape_cast %661 : vector<4x1xi1> to vector<4x1xi1>
    %695 = vector.broadcast %694 : vector<4x1xi1> to vector<4x32xi1>
    %696 = vector.broadcast %cst_177 : f32 to vector<4x32xf32>
    %697 = arith.select %695, %693, %696 : vector<4x32xi1>, vector<4x32xf32>
    %698 = arith.index_cast %617 : i32 to index
    %c0_178 = arith.constant 0 : index
    %c0_179 = arith.constant 0 : index
    %699 = vector.load %arg19[%698, %c0_178, %c0_179] : memref<8x4x32xf32, #tpu.memory_space<vmem>>, vector<1x4x32xf32>
    %700 = vector.shape_cast %699 : vector<1x4x32xf32> to vector<4x32xf32>
    %701 = vector.shape_cast %697 : vector<4x32xf32> to vector<1x4x32xf32>
    tpu.vector_store %arg19[%698, %c0_178, %c0_179], %701 {strides = array<i32>} : memref<8x4x32xf32, #tpu.memory_space<vmem>>, vector<1x4x32xf32>,
    %c8_i32 = arith.constant 8 : i32
    %c0_180 = arith.constant 0 : index
    %c0_181 = arith.constant 0 : index
    %c0_182 = arith.constant 0 : index
    %702 = vector.load %arg18[%c0_180, %c0_181, %c0_182] : memref<8x4x32xf32, #tpu.memory_space<vmem>>, vector<8x4x32xf32>
    %c0_183 = arith.constant 0 : index
    %c0_184 = arith.constant 0 : index
    %c0_185 = arith.constant 0 : index
    %703 = vector.load %arg19[%c0_183, %c0_184, %c0_185] : memref<8x4x32xf32, #tpu.memory_space<vmem>>, vector<8x4x32xf32>
    %704 = vector.shape_cast %702 : vector<8x4x32xf32> to vector<32x32xf32>
    %705 = vector.shape_cast %703 : vector<8x4x32xf32> to vector<32x32xf32>
    %c0_186 = arith.constant 0 : index
    %c0_187 = arith.constant 0 : index
    %706 = vector.load %arg11[%c0_186, %c0_187] : memref<32x64xf32, #tpu.memory_space<vmem>>, vector<32x64xf32>
    %cst_188 = arith.constant dense<0.000000e+00> : vector<32x64xf32>
    %707 = tpu.matmul %704, %706, %cst_188 {dimension_numbers = #tpu.dot_dimension_numbers<[1], [0], [0], [1], [0, 0, 1, 1], [], []>} : vector<32x32xf32>, vector<32x64xf32>, vector<32x64xf32> -> vector<32x64xf32>
    %c0_189 = arith.constant 0 : index
    %c0_190 = arith.constant 0 : index
    %708 = vector.load %arg12[%c0_189, %c0_190] : memref<32x64xf32, #tpu.memory_space<vmem>>, vector<32x64xf32>
    %cst_191 = arith.constant dense<0.000000e+00> : vector<32x64xf32>
    %709 = tpu.matmul %705, %708, %cst_191 {dimension_numbers = #tpu.dot_dimension_numbers<[1], [0], [0], [1], [0, 0, 1, 1], [], []>} : vector<32x32xf32>, vector<32x64xf32>, vector<32x64xf32> -> vector<32x64xf32>
    %710 = arith.addf %707, %709 : vector<32x64xf32>
    %c0_192 = arith.constant 0 : index
    %c0_193 = arith.constant 0 : index
    %711 = vector.load %arg13[%c0_192, %c0_193] : memref<1x64xf32, #tpu.memory_space<vmem>>, vector<1x64xf32>
    %712 = vector.broadcast %711 : vector<1x64xf32> to vector<32x64xf32>
    %713 = arith.addf %710, %712 : vector<32x64xf32>
    %714 = math.tanh %713 : vector<32x64xf32>
    %c0_194 = arith.constant 0 : index
    %c0_195 = arith.constant 0 : index
    %715 = vector.load %arg14[%c0_194, %c0_195] : memref<1x64xf32, #tpu.memory_space<vmem>>, vector<1x64xf32>
    %716 = vector.broadcast %715 : vector<1x64xf32> to vector<32x64xf32>
    %717 = arith.mulf %714, %716 : vector<32x64xf32>
    %cst_196 = arith.constant dense<0.000000e+00> : vector<32xf32>
    %718 = vector.multi_reduction <add>, %717, %cst_196 [1] : vector<32x64xf32> to vector<32xf32>
    %719 = vector.shape_cast %718 : vector<32xf32> to vector<32x1xf32>
    %720 = vector.shape_cast %719 : vector<32x1xf32> to vector<8x4x1xf32>
    %721 = tpu.iota {dimensions = array<i32: 0>} : vector<8x4x1xi32>
    %722 = math.exp %720 : vector<8x4x1xf32>
    %723 = vector.shape_cast %0 : vector<4x1xi32> to vector<1x4x1xi32>
    %724 = vector.broadcast %723 : vector<1x4x1xi32> to vector<8x4x1xi32>
    %725 = arith.cmpi slt, %721, %724 : vector<8x4x1xi32>
    %726 = arith.extui %725 : vector<8x4x1xi1> to vector<8x4x1xi32>
    %727 = arith.sitofp %726 : vector<8x4x1xi32> to vector<8x4x1xf32>
    %728 = arith.mulf %722, %727 : vector<8x4x1xf32>
    %cst_197 = arith.constant dense<0.000000e+00> : vector<4x1xf32>
    %729 = vector.multi_reduction <add>, %728, %cst_197 [0] : vector<8x4x1xf32> to vector<4x1xf32>
    %cst_198 = arith.constant 9.99999974E-5 : f32
    %730 = vector.broadcast %cst_198 : f32 to vector<4x1xf32>
    %731 = arith.addf %729, %730 : vector<4x1xf32>
    %732 = vector.broadcast %728 : vector<8x4x1xf32> to vector<8x4x32xf32>
    %733 = arith.mulf %732, %702 : vector<8x4x32xf32>
    %cst_199 = arith.constant dense<0.000000e+00> : vector<4x32xf32>
    %734 = vector.multi_reduction <add>, %733, %cst_199 [0] : vector<8x4x32xf32> to vector<4x32xf32>
    %735 = vector.broadcast %728 : vector<8x4x1xf32> to vector<8x4x32xf32>
    %736 = arith.mulf %735, %703 : vector<8x4x32xf32>
    %cst_200 = arith.constant dense<0.000000e+00> : vector<4x32xf32>
    %737 = vector.multi_reduction <add>, %736, %cst_200 [0] : vector<8x4x32xf32> to vector<4x32xf32>
    %738 = tpu.concatenate %734, %737 in 1 : vector<4x32xf32>, vector<4x32xf32> -> vector<4x64xf32>
    %739 = vector.broadcast %731 : vector<4x1xf32> to vector<4x64xf32>
    %740 = arith.divf %738, %739 : vector<4x64xf32>
    %c0_201 = arith.constant 0 : index
    %c0_202 = arith.constant 0 : index
    %741 = vector.load %arg15[%c0_201, %c0_202] : memref<4x64xf32, #tpu.memory_space<vmem>>, vector<4x64xf32>
    tpu.vector_store %arg15[%c0_201, %c0_202], %740 {strides = array<i32>} : memref<4x64xf32, #tpu.memory_space<vmem>>, vector<4x64xf32>,
    return
  }
  func.func @transform_0(%arg0: i32) -> (i32, i32, i32) {
    %c0_i32 = arith.constant 0 : i32
    %c0_i32_0 = arith.constant 0 : i32
    %c0_i32_1 = arith.constant 0 : i32
    return %c0_i32, %arg0, %c0_i32_0 : i32, i32, i32
  }
  func.func @transform_1(%arg0: i32) -> (i32, i32) {
    %c0_i32 = arith.constant 0 : i32
    %c0_i32_0 = arith.constant 0 : i32
    return %arg0, %c0_i32 : i32, i32
  }
  func.func @transform_2(%arg0: i32) -> (i32, i32) {
    %c0_i32 = arith.constant 0 : i32
    %c0_i32_0 = arith.constant 0 : i32
    %c0_i32_1 = arith.constant 0 : i32
    return %c0_i32, %c0_i32_0 : i32, i32
  }
  func.func @transform_3(%arg0: i32) -> (i32, i32) {
    %c0_i32 = arith.constant 0 : i32
    %c0_i32_0 = arith.constant 0 : i32
    %c0_i32_1 = arith.constant 0 : i32
    return %c0_i32, %c0_i32_0 : i32, i32
  }
  func.func @transform_4(%arg0: i32) -> (i32, i32) {
    %c0_i32 = arith.constant 0 : i32
    %c0_i32_0 = arith.constant 0 : i32
    %c0_i32_1 = arith.constant 0 : i32
    return %c0_i32, %c0_i32_0 : i32, i32
  }
  func.func @transform_5(%arg0: i32) -> (i32, i32) {
    %c0_i32 = arith.constant 0 : i32
    %c0_i32_0 = arith.constant 0 : i32
    %c0_i32_1 = arith.constant 0 : i32
    return %c0_i32, %c0_i32_0 : i32, i32
  }
  func.func @transform_6(%arg0: i32) -> (i32, i32) {
    %c0_i32 = arith.constant 0 : i32
    %c0_i32_0 = arith.constant 0 : i32
    %c0_i32_1 = arith.constant 0 : i32
    return %c0_i32, %c0_i32_0 : i32, i32
  }
  func.func @transform_7(%arg0: i32) -> (i32, i32) {
    %c0_i32 = arith.constant 0 : i32
    %c0_i32_0 = arith.constant 0 : i32
    %c0_i32_1 = arith.constant 0 : i32
    return %c0_i32, %c0_i32_0 : i32, i32
  }
  func.func @transform_8(%arg0: i32) -> (i32, i32) {
    %c0_i32 = arith.constant 0 : i32
    %c0_i32_0 = arith.constant 0 : i32
    %c0_i32_1 = arith.constant 0 : i32
    return %c0_i32, %c0_i32_0 : i32, i32
  }
  func.func @transform_9(%arg0: i32) -> (i32, i32) {
    %c0_i32 = arith.constant 0 : i32
    %c0_i32_0 = arith.constant 0 : i32
    %c0_i32_1 = arith.constant 0 : i32
    return %c0_i32, %c0_i32_0 : i32, i32
  }
  func.func @transform_10(%arg0: i32) -> (i32, i32) {
    %c0_i32 = arith.constant 0 : i32
    %c0_i32_0 = arith.constant 0 : i32
    %c0_i32_1 = arith.constant 0 : i32
    return %c0_i32, %c0_i32_0 : i32, i32
  }
  func.func @transform_11(%arg0: i32) -> (i32, i32) {
    %c0_i32 = arith.constant 0 : i32
    %c0_i32_0 = arith.constant 0 : i32
    %c0_i32_1 = arith.constant 0 : i32
    return %c0_i32, %c0_i32_0 : i32, i32
  }
  func.func @transform_12(%arg0: i32) -> (i32, i32) {
    %c0_i32 = arith.constant 0 : i32
    %c0_i32_0 = arith.constant 0 : i32
    %c0_i32_1 = arith.constant 0 : i32
    return %c0_i32, %c0_i32_0 : i32, i32
  }
  func.func @transform_13(%arg0: i32) -> (i32, i32) {
    %c0_i32 = arith.constant 0 : i32
    %c0_i32_0 = arith.constant 0 : i32
    %c0_i32_1 = arith.constant 0 : i32
    return %c0_i32, %c0_i32_0 : i32, i32
  }
  func.func @transform_14(%arg0: i32) -> (i32, i32) {
    %c0_i32 = arith.constant 0 : i32
    %c0_i32_0 = arith.constant 0 : i32
    return %arg0, %c0_i32 : i32, i32
  }
}

</mosaic_0001>

<bundles_post_ra>
// kernel: tpu_custom_call.1
= control target key start
LH: loop header
LB: loop body
LE: loop exit
PB: predicated region body
PF: predicated region fallthrough
CT: control target
= control target key end

     0   :  { %19 = vsyncpa [#allocation7], 0  ;;  %s4350_s0 = inlined_call_operand.hbm [shape: f32[8,4,16], index: 0, kind: input, shape index: {}]   ;;  %s4351_s1 = inlined_call_operand.vmem [shape: s32[4,1], index: 1, kind: input, shape index: {}]   ;;  %s4352_s2 = inlined_call_operand.hbm [shape: f32[16,96], index: 2, kind: input, shape index: {}]   ;;  %s4353_s3 = inlined_call_operand.hbm [shape: f32[32,96], index: 3, kind: input, shape index: {}]   ;;  %s4354_s4 = inlined_call_operand.vmem [shape: f32[1,96], index: 4, kind: input, shape index: {}]   ;;  %s4355_s5 = inlined_call_operand.vmem [shape: f32[1,32], index: 5, kind: input, shape index: {}]   ;;  %s4356_s6 = inlined_call_operand.hbm [shape: f32[16,96], index: 6, kind: input, shape index: {}]   ;;  %s4357_s7 = inlined_call_operand.hbm [shape: f32[32,96], index: 7, kind: input, shape index: {}]   ;;  %s4358_s8 = inlined_call_operand.vmem [shape: f32[1,96], index: 8, kind: input, shape index: {}]   ;;  %s4359_s9 = inlined_call_operand.vmem [shape: f32[1,32], index: 9, kind: input, shape index: {}]   ;;  %s4360_s10 = inlined_call_operand.vmem [shape: f32[32,64], index: 10, kind: input, shape index: {}]   ;;  %s4361_s11 = inlined_call_operand.hbm [shape: f32[32,64], index: 11, kind: input, shape index: {}]   ;;  %s4362_s12 = inlined_call_operand.vmem [shape: f32[1,64], index: 12, kind: input, shape index: {}]   ;;  %s4363_s13 = inlined_call_operand.vmem [shape: f32[1,64], index: 13, kind: input, shape index: {}]   ;;  %s4364_s14 = inlined_call_operand.hbm [shape: f32[4,64], index: 14, kind: output, shape index: {}]  }
   0x1   :  { %20 = vsyncpa [#allocation10], 0 }
   0x2   :  { %21 = vsyncpa [#allocation13], 0 }
   0x3   :  { %22 = vsyncpa [#allocation16], 0 }
   0x4   :  { %23 = vsyncpa [#allocation8], 0  ;;  %s3587_s29 = smov [#allocation9]   ;;  %s3423_s17 = scalar_lea.hbm %s4352_s2, 256 }
   0x5   :  { %s43_s30 = sshll.u32 %s3587_s29, 4  ;;  %p3424_p0 = scmp.ne.s32.totalorder %s4352_s2, %s3423_s17  ;;  %s44_s30 = int_to_ptr.vmem [resolvable:$true] %s43_s30 }
   0x6   :  { %p3427_p1 = scmp.lt.u32.totalorder %s3423_s17, %s4352_s2 }
   0x8   :  { %p3429_p2 = pnand %p3427_p1, %p3424_p0 }
   0xa   :  { %3432 = shalt.err (!%p3429_p2)
}
   0xb   :  { %s3433_s22 = scalar_lea.vmem %s44_s30, 256  ;;  %p3438_p4 = scmp.lt.s32.totalorder %s44_s30, %s44_s30 }
   0xc   :  { %p3434_p3 = scmp.ne.s32.totalorder %s44_s30, %s3433_s22  ;;  %p3439_p5 = scmp.lt.s32.totalorder %s3433_s22, %s3433_s22 }
   0xe   :  { %p3440_p6 = por %p3439_p5, %p3438_p4 }
  0x10   :  { %p3441_p7 = pnand %p3440_p6, %p3434_p3 }
  0x12   :  { %3444 = shalt.err (!%p3441_p7)
}
  0x13   :  { %s3588_s23 = smov 128   ;;  %s3589_s24 = smov 8  }
  0x14   :  { %49 = dma.hbm_to_vmem [thread:$0]  %s4352_s2, 256, %s44_s30, [#allocation10], %s3588_s23, %s3588_s23, %s3589_s24  }
  0x15   :  { %s3590_s27 = smov [#allocation12]   ;;  %s3591_s29 = smov [#allocation6]  }
  0x16   :  { %s71_s28 = sshll.u32 %s3590_s27, 4  ;;  %s29_s15 = sshll.u32 %s3591_s29, 4  ;;  %s72_s28 = int_to_ptr.vmem [resolvable:$true] %s71_s28  ;;  %s30_s15 = int_to_ptr.vmem [resolvable:$true] %s29_s15 }
  0x17   :  { %s3445_s18 = scalar_lea.hbm %s4356_s6, 256 }
  0x18   :  { %p3446_p8 = scmp.ne.s32.totalorder %s4356_s6, %s3445_s18  ;;  %p3449_p9 = scmp.lt.u32.totalorder %s3445_s18, %s4356_s6 }
  0x1a   :  { %p3451_p10 = pnand %p3449_p9, %p3446_p8 }
  0x1c   :  { %3454 = shalt.err (!%p3451_p10)
}
  0x1d   :  { %s3455_s2 = scalar_lea.vmem %s72_s28, 256  ;;  %p3460_p12 = scmp.lt.s32.totalorder %s72_s28, %s72_s28 }
  0x1e   :  { %p3456_p11 = scmp.ne.s32.totalorder %s72_s28, %s3455_s2  ;;  %p3461_p13 = scmp.lt.s32.totalorder %s3455_s2, %s3455_s2 }
  0x20   :  { %p3462_p0 = por %p3461_p13, %p3460_p12 }
  0x22   :  { %p3463_p1 = pnand %p3462_p0, %p3456_p11 }
  0x24   :  { %3466 = shalt.err (!%p3463_p1)
}
  0x25   :  { %77 = dma.hbm_to_vmem [thread:$0]  %s4356_s6, 256, %s72_s28, [#allocation13], %s3588_s23, %s3588_s23, %s3589_s24  }
  0x26   :  { %s3467_s29 = scalar_lea.hbm %s4350_s0, 512 }
  0x27   :  { %p3468_p2 = scmp.ne.s32.totalorder %s4350_s0, %s3467_s29  ;;  %p3471_p3 = scmp.lt.u32.totalorder %s3467_s29, %s4350_s0 }
  0x29   :  { %p3473_p4 = pnand %p3471_p3, %p3468_p2 }
  0x2b   :  { %3476 = shalt.err (!%p3473_p4)
}
  0x2c   :  { %s3477_s20 = scalar_lea.vmem %s30_s15, 512  ;;  %p3482_p6 = scmp.lt.s32.totalorder %s30_s15, %s30_s15 }
  0x2d   :  { %p3478_p5 = scmp.ne.s32.totalorder %s30_s15, %s3477_s20  ;;  %p3483_p7 = scmp.lt.s32.totalorder %s3477_s20, %s3477_s20 }
  0x2f   :  { %p3484_p8 = por %p3483_p7, %p3482_p6 }
  0x31   :  { %p3485_p9 = pnand %p3484_p8, %p3478_p5 }
  0x33   :  { %3488 = shalt.err (!%p3485_p9)
}
  0x34   :  { %s3592_s6 = smov 64   ;;  %s3593_s28 = smov 4  }
  0x35   :  { %35 = dma.hbm_to_vmem [thread:$0]  %s4350_s0, 512, %s30_s15, [#allocation7], %s3592_s6, %s3592_s6, %s3593_s28  }
  0x36   :  { %s3594_s2 = smov [#allocation11]   ;;  %s3595_s25 = smov [#allocation14]  }
  0x37   :  { %s55_s30 = sshll.u32 %s3594_s2, 4  ;;  %s83_s26 = sshll.u32 %s3595_s25, 4  ;;  %s56_s30 = int_to_ptr.vmem [resolvable:$true] %s55_s30  ;;  %s84_s26 = int_to_ptr.vmem [resolvable:$true] %s83_s26 }
  0x38   :  { %s3489_s16 = scalar_lea.hbm %s4353_s3, 512 }
  0x39   :  { %p3490_p10 = scmp.ne.s32.totalorder %s4353_s3, %s3489_s16  ;;  %p3493_p11 = scmp.lt.u32.totalorder %s3489_s16, %s4353_s3 }
  0x3b   :  { %p3495_p12 = pnand %p3493_p11, %p3490_p10 }
  0x3d   :  { %3498 = shalt.err (!%p3495_p12)
}
  0x3e   :  { %s3499_s0 = scalar_lea.vmem %s56_s30, 512  ;;  %p3504_p0 = scmp.lt.s32.totalorder %s56_s30, %s56_s30 }
  0x3f   :  { %p3500_p13 = scmp.ne.s32.totalorder %s56_s30, %s3499_s0  ;;  %p3505_p1 = scmp.lt.s32.totalorder %s3499_s0, %s3499_s0 }
  0x41   :  { %p3506_p2 = por %p3505_p1, %p3504_p0 }
  0x43   :  { %p3507_p3 = pnand %p3506_p2, %p3500_p13 }
  0x45   :  { %3510 = shalt.err (!%p3507_p3)
}
  0x46   :  { %61 = dma.hbm_to_vmem [thread:$0]  %s4353_s3, 512, %s56_s30, [#allocation10], %s3588_s23, %s3588_s23, %s3589_s24  }
  0x47   :  { %s3511_s2 = scalar_lea.hbm %s4357_s7, 512 }
  0x48   :  { %p3512_p4 = scmp.ne.s32.totalorder %s4357_s7, %s3511_s2  ;;  %p3515_p5 = scmp.lt.u32.totalorder %s3511_s2, %s4357_s7 }
  0x4a   :  { %p3517_p6 = pnand %p3515_p5, %p3512_p4 }
  0x4c   :  { %3520 = shalt.err (!%p3517_p6)
}
  0x4d   :  { %s3521_s17 = scalar_lea.vmem %s84_s26, 512  ;;  %p3526_p8 = scmp.lt.s32.totalorder %s84_s26, %s84_s26 }
  0x4e   :  { %p3522_p7 = scmp.ne.s32.totalorder %s84_s26, %s3521_s17  ;;  %p3527_p9 = scmp.lt.s32.totalorder %s3521_s17, %s3521_s17 }
  0x50   :  { %p3528_p10 = por %p3527_p9, %p3526_p8 }
  0x52   :  { %p3529_p11 = pnand %p3528_p10, %p3522_p7 }
  0x54   :  { %3532 = shalt.err (!%p3529_p11)
}
  0x55   :  { %89 = dma.hbm_to_vmem [thread:$0]  %s4357_s7, 512, %s84_s26, [#allocation13], %s3588_s23, %s3588_s23, %s3589_s24  }
  0x56   :  { %s3596_s18 = smov [#allocation15]   ;;  %s3533_s15 = scalar_lea.hbm %s4361_s11, 512 }
  0x57   :  { %s101_s19 = sshll.u32 %s3596_s18, 4  ;;  %p3534_p12 = scmp.ne.s32.totalorder %s4361_s11, %s3533_s15  ;;  %s102_s19 = int_to_ptr.vmem [resolvable:$true] %s101_s19 }
  0x58   :  { %p3537_p13 = scmp.lt.u32.totalorder %s3533_s15, %s4361_s11 }
  0x5a   :  { %p3539_p0 = pnand %p3537_p13, %p3534_p12 }
  0x5c   :  { %3542 = shalt.err (!%p3539_p0)
}
  0x5d   :  { %s3543_s25 = scalar_lea.vmem %s102_s19, 512  ;;  %p3548_p2 = scmp.lt.s32.totalorder %s102_s19, %s102_s19 }
  0x5e   :  { %p3544_p1 = scmp.ne.s32.totalorder %s102_s19, %s3543_s25  ;;  %p3549_p3 = scmp.lt.s32.totalorder %s3543_s25, %s3543_s25 }
  0x60   :  { %p3550_p4 = por %p3549_p3, %p3548_p2 }
  0x62   :  { %p3551_p5 = pnand %p3550_p4, %p3544_p1 }
  0x64   :  { %3554 = shalt.err (!%p3551_p5)
}
  0x65   :  { %107 = dma.hbm_to_vmem [thread:$0]  %s4361_s11, 512, %s102_s19, [#allocation16], %s3588_s23, %s3588_s23, %s3589_s24  }
  0x66   :  { %3577 = dma.done.wait [#allocation7], 512  }
  0x67   :  { %3578 = vsyncadd [#allocation7], 4294966784 }
  0x68   :  { %3579 = dma.done.wait [#allocation10], 768  }
  0x69   :  { %3580 = vsyncadd [#allocation10], 4294966528 }
  0x6a   :  { %3581 = dma.done.wait [#allocation13], 768  }
  0x6b   :  { %3582 = vsyncadd [#allocation13], 4294966528 }
  0x6c   :  { %3583 = dma.done.wait [#allocation16], 512  }
  0x6d   :  { %3584 = vsyncadd [#allocation16], 4294966784  ;;  %v139_v0 = vld [vmem:[#allocation9] sm:$0xff]  ;;  %v140_v1 = vld [vmem:[#allocation9 + $0x8] sm:$0xff]  ;;  %vm160_vm0 = vcmask 130048   ;;  %v3597_v12 = vmov 0.0|0.0  }
  0x6e   :  { %v275_v2 = vld [vmem:[#allocation12] sm:$0xff]  ;;  %v3144_v3 = vpack.c.bf16 %v140_v1, %v139_v0  ;;  %v276_v4 = vld [vmem:[#allocation12 + $0x8] sm:$0xff]  ;;  %v3289_v6 = vld [vmem:[#allocation6] sm:$0xff]   ;;  %vm3598_vm1 = vmmov 0   ;;  %v3599_v21 = vmov 0.0   ;;  %vm266_vm2 = vcmask 781312  }
  0x6f   :  { %v3148_v5 = vpack.c.bf16 %v276_v4, %v275_v2  ;;  %v3290_v7 = vld [vmem:[#allocation6 + $0x8] sm:$0xff]   ;;  %v389_v8 = vld [vmem:[#allocation11] sm:$0xff]  ;;  %v390_v9 = vld [vmem:[#allocation11 + $0x8] sm:$0xff]  ;;  %2924 = vmatprep.mubr.msk.f32.mxu0 %vm160_vm0, %v3289_v6  ;;  %2934 = vmatprep.mubr.msk.f32.mxu1 %vm160_vm0, %v3289_v6  ;;  %v3600_v49 = vmov 0   ;;  %vm520_vm7 = vcmask 257024   ;;  %vm401_vm8 = vcmask 261120  }
  0x70   :  { %3145 = vmatprep.subr.bf16.mxu0 %v3144_v3  ;;  %v3771_v10 = vpack.c.bf16 %v390_v9, %v389_v8  ;;  %v3291_v11 = vld [vmem:[#allocation6 + $0x10] sm:$0xff]   ;;  %v391_v13 = vld [vmem:[#allocation11 + $0x10] sm:$0xff]  ;;  %v392_v14 = vld [vmem:[#allocation11 + $0x18] sm:$0xff]  ;;  %3287 = vset.pattern.permute.xlu0 %v3600_v49 }
  0x71   :  { %3149 = vmatprep.subr.bf16.mxu1 %v3148_v5  ;;  %3147 = vmatpush3.bf16.msra.mxu0 %v3144_v3  ;;  %v3292_v15 = vld [vmem:[#allocation6 + $0x18] sm:$0xff]   ;;  %v2765_v16 = vld [vmem:[%s4359_s9] ss:$0 sm:$0xff]  ;;  %v3784_v17 = vpack.c.bf16 %v392_v14, %v391_v13  ;;  %v395_v19 = vld [vmem:[#allocation14 + $0x8] sm:$0xff] }
  0x72   :  { %3151 = vmatpush3.bf16.msra.mxu1 %v3148_v5  ;;  %3164 = vmatprep.subr.bf16.mxu0 %v3597_v12  ;;  %v394_v18 = vld [vmem:[#allocation14] sm:$0xff]  ;;  %v396_v23 = vld [vmem:[#allocation14 + $0x10] sm:$0xff]  ;;  %v397_v24 = vld [vmem:[#allocation14 + $0x18] sm:$0xff] }
  0x73   :  { %3152 = vmatprep.subr.bf16.mxu1 %v3597_v12  ;;  %607 = vrot.lane.b32.xlu0 %v2765_v16, %s3592_s6  ;;  %v2763_v20 = vld [vmem:[%s4355_s5] ss:$0 sm:$0xff]  ;;  %v3798_v22 = vpack.c.bf16 %v395_v19, %v394_v18  ;;  %v3808_v25 = vpack.c.bf16 %v397_v24, %v396_v23 }
  0x74   :  { %2925 = vmatmul.mubr.msk.f32.vlgmr.msra.gmra.mrb[0].mxu0 %vm160_vm0, %v3290_v7  ;;  %v3825_v26 = vld [vmem:[%s4354_s4] ss:$0 sm:$0xff]  ;;  %3288 = vset.pattern.permute.xlu1 %v3600_v49 }
  0x75   :  { %2935 = vmatmul.mubr.msk.f32.vlgmr.msra.gmra.mrb[0].mxu1 %vm160_vm0, %v3290_v7  ;;  %3166 = vmatpush3.bf16.msra.mxu0 %v3771_v10  ;;  %v2757_v27 = vld [vmem:[%s4358_s8] ss:$0 sm:$0xff] }
  0x76   :  { %3154 = vmatpush3.bf16.msra.mxu1 %v3771_v10  ;;  %2937 = vmatprep.mubr.msk.f32.mxu1 %vm160_vm0, %v3291_v11  ;;  %v3857_v1 = vld [vmem:[%s4351_s1] sm:$0xf]  ;;  %s3601_s1 = smov 96  }
  0x77   :  { %3155 = vmatprep.subr.bf16.mxu1 %v3597_v12  ;;  %2927 = vmatprep.mubr.msk.f32.mxu0 %vm160_vm0, %v3291_v11  ;;  %vm4365_vm3 = vcmp.gt.s32.totalorder %v3857_v1, 7  ;;  %vm399_vm4 = vcmp.gt.s32.totalorder %v3857_v1, 0  ;;  %vm4366_vm9 = vcmp.gt.s32.totalorder %v3857_v1, 6  ;;  %vm642_vm10 = vcmp.gt.s32.totalorder %v3857_v1, 1 }
  0x78   :  { %3167 = vmatprep.subr.bf16.mxu0 %v3597_v12  ;;  %2928 = vmatmul.mubr.msk.f32.gmra.mrb[2].mxu0 %vm160_vm0, %v3292_v15  ;;  %v630_v7 = vsel %vm4365_vm3, 1, %v3600_v49  ;;  %v510_v16 = vsel %vm399_vm4, 1, %v3600_v49  ;;  %vm4367_vm13 = vcmp.gt.s32.totalorder %v3857_v1, 5  ;;  %vm870_vm14 = vcmp.gt.s32.totalorder %v3857_v1, 2 }
  0x79   :  { %2938 = vmatmul.mubr.msk.f32.gmra.mrb[2].mxu1 %vm160_vm0, %v3292_v15  ;;  %487 = vrot.lane.b32.xlu0 %v2763_v20, %s3592_s6  ;;  %vm1098_vm3 = vcmp.gt.s32.totalorder %v3857_v1, 3 }
  0x7a   :  { %3157 = vmatpush3.bf16.msra.mxu1 %v3784_v17  ;;  %2948 = vmatprep.mubr.msk.f32.mxu1 %vm3598_vm1, %v3599_v21 }
  0x7b   :  { %3158 = vmatprep.subr.bf16.mxu1 %v3597_v12  ;;  %3169 = vmatpush3.bf16.msra.mxu0 %v3784_v17 }
  0x7c   :  { %2970 = vmatprep.mubr.msk.f32.mxu0 %vm3598_vm1, %v3599_v21  ;;  %3176 = vmatprep.subr.bf16.mxu0 %v3597_v12 }
  0x7d   :  { %2949 = vmatmul.mubr.f32.vlgmr.msra.gmra.mrb[4].mxu1 %v3599_v21 }
  0x7e   :  { %3160 = vmatpush3.bf16.msra.mxu1 %v3798_v22  ;;  %2959 = vmatprep.mubr.msk.f32.mxu1 %vm3598_vm1, %v3599_v21 }
  0x7f   :  { %3161 = vmatprep.subr.bf16.mxu1 %v3597_v12 }
  0x82   :  { %3163 = vmatpush3.bf16.msra.mxu1 %v3808_v25 }
  0x83   :  { %3170 = vmatprep.subr.bf16.mxu1 %v3597_v12 }
  0x85   :  { %2960 = vmatmul.mubr.f32.vlgmr.msra.gmra.mrb[6].mxu1 %v3599_v21 }
  0x86   :  { %3172 = vmatpush3.bf16.msra.mxu1 %v3798_v22  ;;  %2981 = vmatprep.mubr.msk.f32.mxu1 %vm3598_vm1, %v3599_v21 }
  0x87   :  { %3173 = vmatprep.subr.bf16.mxu1 %v3597_v12 }
  0x8a   :  { %3175 = vmatpush3.bf16.msra.mxu1 %v3808_v25 }
  0x8b   :  { %3182 = vmatprep.subr.bf16.mxu1 %v3597_v12 }
  0xe5   :  { %v3844_v48 = vpop.permute.xlu0 %607 }
  0xeb   :  { %v3849_v53 = vpop.permute.xlu0 %487 }
 0x147   :  { %v2926_v28 = vpop.f32.mrb[0].mxu0 }
 0x148   :  { %v241_v29 = vadd.f32 %v2926_v28, %v3825_v26  ;;  %v2936_v30 = vpop.f32.mrb[0].mxu1  ;;  %v235_v31 = vpop.f32.mrb[1].mxu0 }
 0x149   :  { %v356_v32 = vadd.f32 %v2936_v30, %v2757_v27  ;;  %v236_v33 = vadd.f32 %v3825_v26, %v235_v31  ;;  %v350_v34 = vpop.f32.mrb[1].mxu1 }
 0x14a   :  { %v259_v35 = vcombine.high %v241_v29, %v241_v29  ;;  %269 = vst.msk [vmem:[#allocation2 + $0x8] sm:$0xf] %vm266_vm2, %v241_v29  ;;  %v351_v36 = vadd.f32 %v2757_v27, %v350_v34 }
 0x14b   :  { %v374_v37 = vcombine.high %v356_v32, %v356_v32  ;;  %383 = vst.msk [vmem:[#allocation3 + $0x8] sm:$0xf] %vm266_vm2, %v356_v32  ;;  %v258_v38 = vcombine.high %v236_v33, %v236_v33  ;;  %267 = vst.msk [vmem:[#allocation2] sm:$0xf] %vm266_vm2, %v236_v33 }
 0x14c   :  { %270 = vst.msk [vmem:[#allocation2 + $0xc] sm:$0xf] %vm266_vm2, %v259_v35  ;;  %v373_v39 = vcombine.high %v351_v36, %v351_v36  ;;  %381 = vst.msk [vmem:[#allocation3] sm:$0xf] %vm266_vm2, %v351_v36  ;;  %v2939_v40 = vpop.f32.mrb[2].mxu1 }
 0x14d   :  { %384 = vst.msk [vmem:[#allocation3 + $0xc] sm:$0xf] %vm266_vm2, %v374_v37  ;;  %268 = vst.msk [vmem:[#allocation2 + $0x4] sm:$0xf] %vm266_vm2, %v258_v38  ;;  %v366_v41 = vadd.f32 %v2939_v40, %v2757_v27  ;;  %v360_v42 = vpop.f32.mrb[3].mxu1 }
 0x14e   :  { %382 = vst.msk [vmem:[#allocation3 + $0x4] sm:$0xf] %vm266_vm2, %v373_v39  ;;  %v361_v43 = vadd.f32 %v2757_v27, %v360_v42  ;;  %v2929_v39 = vpop.f32.mrb[2].mxu0 }
 0x14f   :  { %v376_v44 = vcombine.high %v366_v41, %v366_v41  ;;  %387 = vst.msk [vmem:[#allocation3 + $0x18] sm:$0xf] %vm266_vm2, %v366_v41  ;;  %v245_v40 = vpop.f32.mrb[3].mxu0  ;;  %v251_v41 = vadd.f32 %v2929_v39, %v3825_v26 }
 0x150   :  { %v375_v45 = vcombine.high %v361_v43, %v361_v43  ;;  %385 = vst.msk [vmem:[#allocation3 + $0x10] sm:$0xf] %vm266_vm2, %v361_v43  ;;  %v471_v46 = vpop.f32.mrb[4].mxu1  ;;  %v246_v42 = vadd.f32 %v3825_v26, %v245_v40 }
 0x151   :  { %388 = vst.msk [vmem:[#allocation3 + $0x1c] sm:$0xf] %vm266_vm2, %v376_v44  ;;  %v2950_v47 = vpop.f32.mrb[5].mxu1  ;;  %v490_v54 = vadd.f32 %v3849_v53, %v471_v46  ;;  %v261_v43 = vcombine.high %v251_v41, %v251_v41  ;;  %273 = vst.msk [vmem:[#allocation2 + $0x18] sm:$0xf] %vm266_vm2, %v251_v41 }
 0x152   :  { %386 = vst.msk [vmem:[#allocation3 + $0x14] sm:$0xf] %vm266_vm2, %v375_v45  ;;  %v400_v57 = vld [vmem:[#allocation2] sm:$0xf]  ;;  %v260_v44 = vcombine.high %v246_v42, %v246_v42  ;;  %271 = vst.msk [vmem:[#allocation2 + $0x10] sm:$0xf] %vm266_vm2, %v246_v42 }
 0x153   :  { %v475_v58 = vadd.f32 %v471_v46, %v400_v57  ;;  %274 = vst.msk [vmem:[#allocation2 + $0x1c] sm:$0xf] %vm266_vm2, %v261_v43 }
 0x154   :  { %272 = vst.msk [vmem:[#allocation2 + $0x14] sm:$0xf] %vm266_vm2, %v260_v44  ;;  %vm1212_vm2 = vcmp.gt.s32.totalorder %v3857_v1, 4 }
 0x155   :  { %v2762_v60 = vmul.f32 -1.442695, %v475_v58 }
 0x158   :  { %v591_v50 = vpop.f32.mrb[6].mxu1  ;;  %v524_v55 = vld [vmem:[#allocation3 + $0x1c] sm:$0xf] }
 0x159   :  { %v2961_v51 = vpop.f32.mrb[7].mxu1  ;;  %v610_v52 = vadd.f32 %v3844_v48, %v591_v50  ;;  %v595_v56 = vadd.f32 %v591_v50, %v524_v55 }
 0x15b   :  { %612 = vrot.lane.b32.xlu1 %v610_v52, %s3592_s6  ;;  %v2764_v59 = vmul.f32 -1.442695, %v595_v56  ;;  %v758_v52 = vld [vmem:[#allocation3 + $0x18] sm:$0xf]  ;;  %v644_v56 = vld [vmem:[#allocation2 + $0x4] sm:$0xf] }
 0x15d   :  { %3301 = vpow2.f32 %v2764_v59 }
 0x15e   :  { %3303 = vpow2.f32 %v2762_v60 }
 0x15f   :  { %492 = vrot.lane.b32.xlu1 %v490_v54, %s3592_s6 }
 0x167   :  { %v3302_v61 = vpop.eup %3301 }
 0x168   :  { %v599_v62 = vadd.f32 1.0, %v3302_v61  ;;  %v3304_v63 = vpop.eup %3303 }
 0x169   :  { %v479_v0 = vadd.f32 1.0, %v3304_v63 }
 0x16a   :  { %3305 = vrcp.f32 %v599_v62 }
 0x16b   :  { %3307 = vrcp.f32 %v479_v0 }
 0x174   :  { %v3306_v2 = vpop.eup %3305 }
 0x175   :  { %v3308_v5 = vpop.eup %3307  ;;  %v622_v19 = vsub.f32 1.0, %v3306_v2  ;;  %v628_v23 = vmul.f32 0.0, %v3306_v2 }
 0x176   :  { %v502_v31 = vsub.f32 1.0, %v3308_v5  ;;  %v508_v33 = vmul.f32 0.0, %v3308_v5 }
 0x1cd   :  { %v613_v3 = vpop.permute.xlu1 %612 }
 0x1ce   :  { %v615_v4 = vmul.f32 %v3306_v2, %v613_v3  ;;  %v858_v3 = vsel %vm4366_vm9, 1, %v3600_v49 }
 0x1d0   :  { %617 = vrot.lane.b32.xlu0 %v615_v4, %s3592_s6  ;;  %v744_v4 = vsel %vm642_vm10, 1, %v3600_v49 }
 0x1d1   :  { %v493_v6 = vpop.permute.xlu1 %492 }
 0x1d2   :  { %v495_v8 = vmul.f32 %v3308_v5, %v493_v6 }
 0x1d4   :  { %497 = vrot.lane.b32.xlu1 %v495_v8, %s3592_s6  ;;  %632 = vperm.xlu0 %3287, %v630_v7  }
 0x242   :  { %v618_v9 = vpop.permute.xlu0 %617 }
 0x243   :  { %v620_v11 = vadd.f32 %v618_v9, %v524_v55 }
 0x245   :  { %3309 = vtanh.f32 %v620_v11 }
 0x246   :  { %v498_v13 = vpop.permute.xlu1 %497 }
 0x247   :  { %v500_v14 = vadd.f32 %v498_v13, %v400_v57 }
 0x249   :  { %3311 = vtanh.f32 %v500_v14 }
 0x24f   :  { %v3310_v15 = vpop.eup %3309 }
 0x250   :  { %624 = vrot.lane.b32.xlu1 %v3310_v15, %s3601_s1 }
 0x253   :  { %v3312_v18 = vpop.eup %3311  ;;  %v3871_v27 = vpop.permute.xlu0 %632 }
 0x254   :  { %504 = vrot.lane.b32.xlu0 %v3312_v18, %s3601_s1  ;;  %512 = vperm.xlu1 %3288, %v510_v16   ;;  %vm634_vm5 = vcmp.eq.s32.totalorder %v3871_v27, 1 }
 0x2c2   :  { %v625_v20 = vpop.permute.xlu1 %624 }
 0x2c3   :  { %v627_v24 = vmul.f32 %v625_v20, %v622_v19 }
 0x2c5   :  { %v629_v28 = vadd.f32 %v628_v23, %v627_v24 }
 0x2c6   :  { %v505_v30 = vpop.permute.xlu0 %504 }
 0x2c7   :  { %v3876_v29 = vsel %vm634_vm5, %v629_v28, 0.0  ;;  %v507_v32 = vmul.f32 %v505_v30, %v502_v31 }
 0x2c8   :  { %637 = vrot.lane.b32.xlu1 %v3876_v29, %s3601_s1 }
 0x2c9   :  { %v509_v34 = vadd.f32 %v508_v33, %v507_v32 }
 0x2d3   :  { %v3880_v35 = vpop.permute.xlu1 %512 }
 0x2d4   :  { %vm514_vm6 = vcmp.eq.s32.totalorder %v3880_v35, 1  ;;  %v2206_v35 = vld [vmem:[%s4360_s10 + $0x10] sm:$0xff] }
 0x2d5   :  { %v3885_v36 = vsel %vm514_vm6, %v509_v34, 0.0 }
 0x2d6   :  { %517 = vrot.lane.b32.xlu0 %v3885_v36, %s3601_s1 }
 0x33a   :  { %v638_v37 = vpop.permute.xlu1 %637 }
 0x33b   :  { %641 = vst.msk [vmem:[#allocation5 + $0x1c] sm:$0xf] %vm520_vm7, %v638_v37  ;;  %2982 = vmatmul.mubr.msk.f32.vlgmr.msra.gmra.mrb[8].mxu1 %vm401_vm8, %v638_v37 }
 0x33c   :  { %3184 = vmatpush3.bf16.msra.mxu1 %v3798_v22  ;;  %3003 = vmatprep.mubr.msk.f32.mxu1 %vm3598_vm1, %v3599_v21 }
 0x33d   :  { %3185 = vmatprep.subr.bf16.mxu1 %v3597_v12 }
 0x340   :  { %3187 = vmatpush3.bf16.msra.mxu1 %v3808_v25 }
 0x341   :  { %3194 = vmatprep.subr.bf16.mxu1 %v3597_v12 }
 0x348   :  { %v518_v38 = vpop.permute.xlu0 %517 }
 0x349   :  { %521 = vst.msk [vmem:[#allocation4] sm:$0xf] %vm520_vm7, %v518_v38  ;;  %2971 = vmatmul.mubr.msk.f32.vlgmr.msra.gmra.mrb[4].mxu0 %vm401_vm8, %v518_v38 }
 0x34a   :  { %3178 = vmatpush3.bf16.msra.mxu0 %v3771_v10  ;;  %2992 = vmatprep.mubr.msk.f32.mxu0 %vm3598_vm1, %v3599_v21 }
 0x34b   :  { %3179 = vmatprep.subr.bf16.mxu0 %v3597_v12 }
 0x34e   :  { %3181 = vmatpush3.bf16.msra.mxu0 %v3784_v17 }
 0x34f   :  { %3188 = vmatprep.subr.bf16.mxu0 %v3597_v12 }
 0x40e   :  { %v827_v45 = vpop.f32.mrb[8].mxu1 }
 0x40f   :  { %v2983_v46 = vpop.f32.mrb[9].mxu1  ;;  %v838_v47 = vadd.f32 %v827_v45, %v3844_v48  ;;  %v831_v54 = vadd.f32 %v827_v45, %v758_v52  ;;  %v986_v45 = vld [vmem:[#allocation3 + $0x14] sm:$0xf] }
 0x411   :  { %840 = vrot.lane.b32.xlu1 %v838_v47, %s3592_s6  ;;  %v2769_v55 = vmul.f32 -1.442695, %v831_v54 }
 0x413   :  { %3313 = vpow2.f32 %v2769_v55 }
 0x41c   :  { %v713_v50 = vpop.f32.mrb[4].mxu0 }
 0x41d   :  { %v2972_v51 = vpop.f32.mrb[5].mxu0  ;;  %v724_v26 = vadd.f32 %v713_v50, %v3849_v53  ;;  %v717_v57 = vadd.f32 %v713_v50, %v644_v56  ;;  %v3314_v58 = vpop.eup %3313  ;;  %v872_v50 = vld [vmem:[#allocation2 + $0x8] sm:$0xf] }
 0x41e   :  { %v835_v60 = vadd.f32 1.0, %v3314_v58 }
 0x41f   :  { %726 = vrot.lane.b32.xlu0 %v724_v26, %s3592_s6  ;;  %v2767_v59 = vmul.f32 -1.442695, %v717_v57 }
 0x421   :  { %3315 = vpow2.f32 %v2767_v59 }
 0x422   :  { %3317 = vrcp.f32 %v835_v60  ;;  %v1086_v60 = vsel %vm4367_vm13, 1, %v3600_v49 }
 0x42b   :  { %v3316_v61 = vpop.eup %3315 }
 0x42c   :  { %v3318_v62 = vpop.eup %3317  ;;  %v721_v63 = vadd.f32 1.0, %v3316_v61  ;;  %v972_v61 = vsel %vm870_vm14, 1, %v3600_v49 }
 0x42d   :  { %v850_v16 = vsub.f32 1.0, %v3318_v62  ;;  %v856_v20 = vmul.f32 %v3318_v62, %v3876_v29 }
 0x42e   :  { %3319 = vrcp.f32 %v721_v63 }
 0x438   :  { %v3320_v5 = vpop.eup %3319 }
 0x439   :  { %v736_v30 = vsub.f32 1.0, %v3320_v5  ;;  %v742_v33 = vmul.f32 %v3320_v5, %v3885_v36 }
 0x483   :  { %v841_v0 = vpop.permute.xlu1 %840 }
 0x484   :  { %v843_v2 = vmul.f32 %v3318_v62, %v841_v0 }
 0x486   :  { %845 = vrot.lane.b32.xlu1 %v843_v2, %s3592_s6 }
 0x48a   :  { %860 = vperm.xlu1 %3288, %v858_v3  }
 0x48e   :  { %746 = vperm.xlu1 %3288, %v744_v4  }
 0x491   :  { %v727_v6 = vpop.permute.xlu0 %726 }
 0x492   :  { %v729_v7 = vmul.f32 %v3320_v5, %v727_v6 }
 0x494   :  { %731 = vrot.lane.b32.xlu0 %v729_v7, %s3592_s6 }
 0x4f8   :  { %v846_v8 = vpop.permute.xlu1 %845 }
 0x4f9   :  { %v848_v9 = vadd.f32 %v846_v8, %v758_v52 }
 0x4fb   :  { %3321 = vtanh.f32 %v848_v9 }
 0x505   :  { %v3322_v11 = vpop.eup %3321 }
 0x506   :  { %v732_v13 = vpop.permute.xlu0 %731  ;;  %852 = vrot.lane.b32.xlu0 %v3322_v11, %s3601_s1 }
 0x507   :  { %v734_v14 = vadd.f32 %v732_v13, %v644_v56 }
 0x509   :  { %3323 = vtanh.f32 %v734_v14  ;;  %v3927_v19 = vpop.permute.xlu1 %860 }
 0x50a   :  { %vm862_vm11 = vcmp.eq.s32.totalorder %v3927_v19, 1 }
 0x50d   :  { %v3937_v32 = vpop.permute.xlu1 %746 }
 0x50e   :  { %vm748_vm12 = vcmp.eq.s32.totalorder %v3937_v32, 1 }
 0x513   :  { %v3324_v15 = vpop.eup %3323 }
 0x514   :  { %738 = vrot.lane.b32.xlu0 %v3324_v15, %s3601_s1 }
 0x578   :  { %v853_v18 = vpop.permute.xlu0 %852 }
 0x579   :  { %v855_v23 = vmul.f32 %v853_v18, %v850_v16 }
 0x57b   :  { %v857_v24 = vadd.f32 %v856_v20, %v855_v23 }
 0x57d   :  { %v3933_v28 = vsel %vm862_vm11, %v857_v24, 0.0 }
 0x57e   :  { %865 = vrot.lane.b32.xlu1 %v3933_v28, %s3601_s1 }
 0x586   :  { %v739_v31 = vpop.permute.xlu0 %738 }
 0x587   :  { %v741_v34 = vmul.f32 %v739_v31, %v736_v30 }
 0x589   :  { %v743_v37 = vadd.f32 %v742_v33, %v741_v34 }
 0x58b   :  { %v3943_v29 = vsel %vm748_vm12, %v743_v37, 0.0 }
 0x58c   :  { %751 = vrot.lane.b32.xlu0 %v3943_v29, %s3601_s1 }
 0x5f0   :  { %v866_v38 = vpop.permute.xlu1 %865 }
 0x5f1   :  { %869 = vst.msk [vmem:[#allocation5 + $0x18] sm:$0xf] %vm520_vm7, %v866_v38  ;;  %3004 = vmatmul.mubr.msk.f32.vlgmr.msra.gmra.mrb[10].mxu1 %vm401_vm8, %v866_v38 }
 0x5f2   :  { %3196 = vmatpush3.bf16.msra.mxu1 %v3798_v22  ;;  %3025 = vmatprep.mubr.msk.f32.mxu1 %vm3598_vm1, %v3599_v21 }
 0x5f3   :  { %3197 = vmatprep.subr.bf16.mxu1 %v3597_v12 }
 0x5f6   :  { %3199 = vmatpush3.bf16.msra.mxu1 %v3808_v25 }
 0x5f7   :  { %3206 = vmatprep.subr.bf16.mxu1 %v3597_v12 }
 0x5fe   :  { %v752_v36 = vpop.permute.xlu0 %751 }
 0x5ff   :  { %755 = vst.msk [vmem:[#allocation4 + $0x4] sm:$0xf] %vm520_vm7, %v752_v36  ;;  %2993 = vmatmul.mubr.msk.f32.vlgmr.msra.gmra.mrb[6].mxu0 %vm401_vm8, %v752_v36 }
 0x600   :  { %3190 = vmatpush3.bf16.msra.mxu0 %v3771_v10  ;;  %3014 = vmatprep.mubr.msk.f32.mxu0 %vm3598_vm1, %v3599_v21 }
 0x601   :  { %3191 = vmatprep.subr.bf16.mxu0 %v3597_v12 }
 0x604   :  { %3193 = vmatpush3.bf16.msra.mxu0 %v3784_v17 }
 0x605   :  { %3200 = vmatprep.subr.bf16.mxu0 %v3597_v12 }
 0x6c4   :  { %v1055_v39 = vpop.f32.mrb[10].mxu1 }
 0x6c5   :  { %v3005_v40 = vpop.f32.mrb[11].mxu1  ;;  %v1066_v41 = vadd.f32 %v1055_v39, %v3844_v48  ;;  %v1059_v46 = vadd.f32 %v1055_v39, %v986_v45 }
 0x6c7   :  { %1068 = vrot.lane.b32.xlu1 %v1066_v41, %s3592_s6  ;;  %v2773_v47 = vmul.f32 -1.442695, %v1059_v46  ;;  %v1214_v41 = vld [vmem:[#allocation3 + $0x10] sm:$0xf] }
 0x6c9   :  { %3325 = vpow2.f32 %v2773_v47 }
 0x6d2   :  { %v941_v42 = vpop.f32.mrb[6].mxu0 }
 0x6d3   :  { %v2994_v43 = vpop.f32.mrb[7].mxu0  ;;  %v952_v44 = vadd.f32 %v941_v42, %v3849_v53  ;;  %v945_v51 = vadd.f32 %v941_v42, %v872_v50  ;;  %v3326_v26 = vpop.eup %3325 }
 0x6d4   :  { %v1063_v54 = vadd.f32 1.0, %v3326_v26 }
 0x6d5   :  { %954 = vrot.lane.b32.xlu0 %v952_v44, %s3592_s6  ;;  %v2771_v52 = vmul.f32 -1.442695, %v945_v51  ;;  %v1100_v44 = vld [vmem:[#allocation2 + $0xc] sm:$0xf] }
 0x6d7   :  { %3327 = vpow2.f32 %v2771_v52 }
 0x6d8   :  { %3329 = vrcp.f32 %v1063_v54 }
 0x6e1   :  { %v3328_v55 = vpop.eup %3327 }
 0x6e2   :  { %v3330_v56 = vpop.eup %3329  ;;  %v949_v57 = vadd.f32 1.0, %v3328_v55 }
 0x6e3   :  { %v1078_v8 = vsub.f32 1.0, %v3330_v56  ;;  %v1084_v13 = vmul.f32 %v3330_v56, %v3933_v28 }
 0x6e4   :  { %3331 = vrcp.f32 %v949_v57  ;;  %v1200_v57 = vsel %vm1098_vm3, 1, %v3600_v49 }
 0x6ee   :  { %v3332_v62 = vpop.eup %3331 }
 0x6ef   :  { %v964_v18 = vsub.f32 1.0, %v3332_v62  ;;  %v970_v24 = vmul.f32 %v3332_v62, %v3943_v29 }
 0x739   :  { %v1069_v58 = vpop.permute.xlu1 %1068 }
 0x73a   :  { %v1071_v59 = vmul.f32 %v3330_v56, %v1069_v58  ;;  %v1314_v56 = vsel %vm1212_vm2, 1, %v3600_v49 }
 0x73c   :  { %1073 = vrot.lane.b32.xlu1 %v1071_v59, %s3592_s6 }
 0x740   :  { %1088 = vperm.xlu1 %3288, %v1086_v60  }
 0x744   :  { %974 = vperm.xlu1 %3288, %v972_v61  }
 0x747   :  { %v955_v63 = vpop.permute.xlu0 %954 }
 0x748   :  { %v957_v0 = vmul.f32 %v3332_v62, %v955_v63 }
 0x74a   :  { %959 = vrot.lane.b32.xlu0 %v957_v0, %s3592_s6 }
 0x7ae   :  { %v1074_v2 = vpop.permute.xlu1 %1073 }
 0x7af   :  { %v1076_v3 = vadd.f32 %v1074_v2, %v986_v45 }
 0x7b1   :  { %3333 = vtanh.f32 %v1076_v3 }
 0x7bb   :  { %v3334_v4 = vpop.eup %3333 }
 0x7bc   :  { %v960_v5 = vpop.permute.xlu0 %959  ;;  %1080 = vrot.lane.b32.xlu0 %v3334_v4, %s3601_s1 }
 0x7bd   :  { %v962_v6 = vadd.f32 %v960_v5, %v872_v50 }
 0x7bf   :  { %3335 = vtanh.f32 %v962_v6  ;;  %v3979_v11 = vpop.permute.xlu1 %1088 }
 0x7c0   :  { %vm1090_vm15 = vcmp.eq.s32.totalorder %v3979_v11, 1 }
 0x7c3   :  { %v3989_v23 = vpop.permute.xlu1 %974 }
 0x7c4   :  { %vm976_vm0 = vcmp.eq.s32.totalorder %v3989_v23, 1 }
 0x7c9   :  { %v3336_v7 = vpop.eup %3335 }
 0x7ca   :  { %966 = vrot.lane.b32.xlu0 %v3336_v7, %s3601_s1 }
 0x82e   :  { %v1081_v9 = vpop.permute.xlu0 %1080 }
 0x82f   :  { %v1083_v14 = vmul.f32 %v1081_v9, %v1078_v8 }
 0x831   :  { %v1085_v15 = vadd.f32 %v1084_v13, %v1083_v14 }
 0x833   :  { %v3985_v16 = vsel %vm1090_vm15, %v1085_v15, 0.0 }
 0x834   :  { %1093 = vrot.lane.b32.xlu1 %v3985_v16, %s3601_s1 }
 0x83c   :  { %v967_v20 = vpop.permute.xlu0 %966 }
 0x83d   :  { %v969_v30 = vmul.f32 %v967_v20, %v964_v18 }
 0x83f   :  { %v971_v31 = vadd.f32 %v970_v24, %v969_v30 }
 0x841   :  { %v3995_v28 = vsel %vm976_vm0, %v971_v31, 0.0 }
 0x842   :  { %979 = vrot.lane.b32.xlu0 %v3995_v28, %s3601_s1 }
 0x8a6   :  { %v1094_v33 = vpop.permute.xlu1 %1093 }
 0x8a7   :  { %1097 = vst.msk [vmem:[#allocation5 + $0x14] sm:$0xf] %vm520_vm7, %v1094_v33  ;;  %3026 = vmatmul.mubr.msk.f32.vlgmr.msra.gmra.mrb[12].mxu1 %vm401_vm8, %v1094_v33 }
 0x8a8   :  { %3208 = vmatpush3.bf16.msra.mxu1 %v3798_v22  ;;  %3047 = vmatprep.mubr.msk.f32.mxu1 %vm3598_vm1, %v3599_v21 }
 0x8a9   :  { %3209 = vmatprep.subr.bf16.mxu1 %v3597_v12 }
 0x8ac   :  { %3211 = vmatpush3.bf16.msra.mxu1 %v3808_v25 }
 0x8ad   :  { %3218 = vmatprep.subr.bf16.mxu1 %v3597_v12 }
 0x8b4   :  { %v980_v34 = vpop.permute.xlu0 %979 }
 0x8b5   :  { %983 = vst.msk [vmem:[#allocation4 + $0x8] sm:$0xf] %vm520_vm7, %v980_v34  ;;  %3015 = vmatmul.mubr.msk.f32.vlgmr.msra.gmra.mrb[8].mxu0 %vm401_vm8, %v980_v34 }
 0x8b6   :  { %3202 = vmatpush3.bf16.msra.mxu0 %v3771_v10  ;;  %3036 = vmatprep.mubr.msk.f32.mxu0 %vm3598_vm1, %v3599_v21 }
 0x8b7   :  { %3203 = vmatprep.subr.bf16.mxu0 %v3597_v12 }
 0x8ba   :  { %3205 = vmatpush3.bf16.msra.mxu0 %v3784_v17 }
 0x8bb   :  { %3212 = vmatprep.subr.bf16.mxu0 %v3597_v12 }
 0x97a   :  { %v1283_v37 = vpop.f32.mrb[12].mxu1 }
 0x97b   :  { %v3027_v29 = vpop.f32.mrb[13].mxu1  ;;  %v1294_v38 = vadd.f32 %v1283_v37, %v3844_v48  ;;  %v1287_v42 = vadd.f32 %v1283_v37, %v1214_v41 }
 0x97d   :  { %1296 = vrot.lane.b32.xlu1 %v1294_v38, %s3592_s6  ;;  %v2777_v43 = vmul.f32 -1.442695, %v1287_v42 }
 0x97f   :  { %3337 = vpow2.f32 %v2777_v43 }
 0x988   :  { %v1169_v36 = vpop.f32.mrb[8].mxu0 }
 0x989   :  { %v3016_v39 = vpop.f32.mrb[9].mxu0  ;;  %v1180_v40 = vadd.f32 %v1169_v36, %v3849_v53  ;;  %v1173_v45 = vadd.f32 %v1169_v36, %v1100_v44  ;;  %v3338_v46 = vpop.eup %3337  ;;  %v1435_v36 = vld [vmem:[#allocation3 + $0xc] sm:$0xf] }
 0x98a   :  { %v1291_v50 = vadd.f32 1.0, %v3338_v46 }
 0x98b   :  { %1182 = vrot.lane.b32.xlu0 %v1180_v40, %s3592_s6  ;;  %v2775_v47 = vmul.f32 -1.442695, %v1173_v45 }
 0x98d   :  { %3339 = vpow2.f32 %v2775_v47 }
 0x98e   :  { %3341 = vrcp.f32 %v1291_v50 }
 0x997   :  { %v3340_v51 = vpop.eup %3339 }
 0x998   :  { %v3342_v26 = vpop.eup %3341  ;;  %v1177_v52 = vadd.f32 1.0, %v3340_v51 }
 0x999   :  { %v1306_v4 = vsub.f32 1.0, %v3342_v26  ;;  %v1312_v6 = vmul.f32 %v3342_v26, %v3985_v16 }
 0x99a   :  { %3343 = vrcp.f32 %v1177_v52 }
 0x9a4   :  { %v3344_v58 = vpop.eup %3343 }
 0x9a5   :  { %v1192_v13 = vsub.f32 1.0, %v3344_v58  ;;  %v1198_v18 = vmul.f32 %v3344_v58, %v3995_v28 }
 0x9ef   :  { %v1297_v54 = vpop.permute.xlu1 %1296 }
 0x9f0   :  { %v1299_v55 = vmul.f32 %v3342_v26, %v1297_v54 }
 0x9f2   :  { %1301 = vrot.lane.b32.xlu1 %v1299_v55, %s3592_s6 }
 0x9f6   :  { %1316 = vperm.xlu1 %3288, %v1314_v56  }
 0x9fa   :  { %1202 = vperm.xlu1 %3288, %v1200_v57  }
 0x9fd   :  { %v1183_v59 = vpop.permute.xlu0 %1182 }
 0x9fe   :  { %v1185_v60 = vmul.f32 %v3344_v58, %v1183_v59 }
 0xa00   :  { %1187 = vrot.lane.b32.xlu0 %v1185_v60, %s3592_s6 }
 0xa64   :  { %v1302_v61 = vpop.permute.xlu1 %1301 }
 0xa65   :  { %v1304_v62 = vadd.f32 %v1302_v61, %v1214_v41  ;;  %v1327_v41 = vld [vmem:[#allocation2 + $0x10] sm:$0xf] }
 0xa67   :  { %3345 = vtanh.f32 %v1304_v62 }
 0xa71   :  { %v3346_v63 = vpop.eup %3345 }
 0xa72   :  { %v1188_v0 = vpop.permute.xlu0 %1187  ;;  %1308 = vrot.lane.b32.xlu0 %v3346_v63, %s3601_s1 }
 0xa73   :  { %v1190_v2 = vadd.f32 %v1188_v0, %v1100_v44 }
 0xa75   :  { %3347 = vtanh.f32 %v1190_v2  ;;  %v4031_v5 = vpop.permute.xlu1 %1316 }
 0xa76   :  { %vm1318_vm9 = vcmp.eq.s32.totalorder %v4031_v5, 1 }
 0xa79   :  { %v4041_v15 = vpop.permute.xlu1 %1202 }
 0xa7a   :  { %vm1204_vm13 = vcmp.eq.s32.totalorder %v4041_v15, 1 }
 0xa7f   :  { %v3348_v3 = vpop.eup %3347 }
 0xa80   :  { %1194 = vrot.lane.b32.xlu0 %v3348_v3, %s3601_s1 }
 0xae4   :  { %v1309_v49 = vpop.permute.xlu0 %1308 }
 0xae5   :  { %v1311_v7 = vmul.f32 %v1309_v49, %v1306_v4 }
 0xae7   :  { %v1313_v8 = vadd.f32 %v1312_v6, %v1311_v7 }
 0xae9   :  { %v4037_v9 = vsel %vm1318_vm9, %v1313_v8, 0.0 }
 0xaea   :  { %1321 = vrot.lane.b32.xlu1 %v4037_v9, %s3601_s1 }
 0xaf2   :  { %v1195_v14 = vpop.permute.xlu0 %1194 }
 0xaf3   :  { %v1197_v20 = vmul.f32 %v1195_v14, %v1192_v13 }
 0xaf5   :  { %v1199_v24 = vadd.f32 %v1198_v18, %v1197_v20 }
 0xaf7   :  { %v4047_v16 = vsel %vm1204_vm13, %v1199_v24, 0.0 }
 0xaf8   :  { %1207 = vrot.lane.b32.xlu0 %v4047_v16, %s3601_s1 }
 0xb5c   :  { %v1322_v30 = vpop.permute.xlu1 %1321 }
 0xb5d   :  { %1325 = vst.msk [vmem:[#allocation5 + $0x10] sm:$0xf] %vm520_vm7, %v1322_v30  ;;  %3048 = vmatmul.mubr.msk.f32.vlgmr.msra.gmra.mrb[14].mxu1 %vm401_vm8, %v1322_v30 }
 0xb5e   :  { %3220 = vmatpush3.bf16.msra.mxu1 %v3798_v22  ;;  %3069 = vmatprep.mubr.msk.f32.mxu1 %vm3598_vm1, %v3599_v21 }
 0xb5f   :  { %3221 = vmatprep.subr.bf16.mxu1 %v3597_v12 }
 0xb62   :  { %3223 = vmatpush3.bf16.msra.mxu1 %v3808_v25 }
 0xb63   :  { %3230 = vmatprep.subr.bf16.mxu1 %v3597_v12 }
 0xb64   :  { %v4202_v27 = vld [vmem:[#allocation5 + $0x10] sm:$0xf] }
 0xb6a   :  { %v1208_v31 = vpop.permute.xlu0 %1207 }
 0xb6b   :  { %1211 = vst.msk [vmem:[#allocation4 + $0xc] sm:$0xf] %vm520_vm7, %v1208_v31  ;;  %3037 = vmatmul.mubr.msk.f32.vlgmr.msra.gmra.mrb[10].mxu0 %vm401_vm8, %v1208_v31  ;;  %v1651_v31 = vld [vmem:[#allocation3 + $0x8] sm:$0xf] }
 0xb6c   :  { %3214 = vmatpush3.bf16.msra.mxu0 %v3771_v10  ;;  %3058 = vmatprep.mubr.msk.f32.mxu0 %vm3598_vm1, %v3599_v21 }
 0xb6d   :  { %3215 = vmatprep.subr.bf16.mxu0 %v3597_v12 }
 0xb70   :  { %3217 = vmatpush3.bf16.msra.mxu0 %v3784_v17 }
 0xb71   :  { %3224 = vmatprep.subr.bf16.mxu0 %v3597_v12 }
 0xc30   :  { %v1504_v28 = vpop.f32.mrb[14].mxu1 }
 0xc31   :  { %v3049_v33 = vpop.f32.mrb[15].mxu1  ;;  %v1515_v34 = vadd.f32 %v1504_v28, %v3844_v48  ;;  %v1508_v39 = vadd.f32 %v1504_v28, %v1435_v36 }
 0xc33   :  { %1517 = vrot.lane.b32.xlu1 %v1515_v34, %s3592_s6  ;;  %v2781_v40 = vmul.f32 -1.442695, %v1508_v39  ;;  %v1543_v34 = vld [vmem:[#allocation2 + $0x14] sm:$0xf] }
 0xc35   :  { %3349 = vpow2.f32 %v2781_v40 }
 0xc3e   :  { %v1396_v37 = vpop.f32.mrb[10].mxu0 }
 0xc3f   :  { %v3038_v29 = vpop.f32.mrb[11].mxu0  ;;  %v1407_v38 = vadd.f32 %v1396_v37, %v3849_v53  ;;  %v1400_v42 = vadd.f32 %v1396_v37, %v1327_v41  ;;  %v3350_v43 = vpop.eup %3349 }
 0xc40   :  { %v1512_v45 = vadd.f32 1.0, %v3350_v43 }
 0xc41   :  { %1409 = vrot.lane.b32.xlu0 %v1407_v38, %s3592_s6  ;;  %v2779_v44 = vmul.f32 -1.442695, %v1400_v42 }
 0xc43   :  { %3351 = vpow2.f32 %v2779_v44 }
 0xc44   :  { %3353 = vrcp.f32 %v1512_v45 }
 0xc4d   :  { %v3352_v46 = vpop.eup %3351 }
 0xc4e   :  { %v3354_v47 = vpop.eup %3353  ;;  %v1404_v50 = vadd.f32 1.0, %v3352_v46 }
 0xc4f   :  { %v1527_v62 = vsub.f32 1.0, %v3354_v47  ;;  %v1533_v0 = vmul.f32 %v3354_v47, %v4037_v9 }
 0xc50   :  { %3355 = vrcp.f32 %v1404_v50 }
 0xc5a   :  { %v3356_v52 = vpop.eup %3355 }
 0xc5b   :  { %v1419_v49 = vsub.f32 1.0, %v3356_v52  ;;  %v1425_v7 = vmul.f32 %v3356_v52, %v4047_v16 }
 0xca5   :  { %v1518_v51 = vpop.permute.xlu1 %1517 }
 0xca6   :  { %v1520_v26 = vmul.f32 %v3354_v47, %v1518_v51 }
 0xca8   :  { %1522 = vrot.lane.b32.xlu1 %v1520_v26, %s3592_s6 }
 0xcb3   :  { %v1410_v54 = vpop.permute.xlu0 %1409 }
 0xcb4   :  { %v1412_v55 = vmul.f32 %v3356_v52, %v1410_v54 }
 0xcb6   :  { %1414 = vrot.lane.b32.xlu0 %v1412_v55, %s3592_s6 }
 0xd1a   :  { %v1523_v56 = vpop.permute.xlu1 %1522 }
 0xd1b   :  { %v1525_v57 = vadd.f32 %v1523_v56, %v1435_v36 }
 0xd1d   :  { %3357 = vtanh.f32 %v1525_v57 }
 0xd27   :  { %v3358_v58 = vpop.eup %3357 }
 0xd28   :  { %v1415_v59 = vpop.permute.xlu0 %1414  ;;  %1529 = vrot.lane.b32.xlu1 %v3358_v58, %s3601_s1 }
 0xd29   :  { %v1417_v60 = vadd.f32 %v1415_v59, %v1327_v41 }
 0xd2b   :  { %3359 = vtanh.f32 %v1417_v60 }
 0xd35   :  { %v3360_v61 = vpop.eup %3359 }
 0xd36   :  { %1421 = vrot.lane.b32.xlu0 %v3360_v61, %s3601_s1 }
 0xd9a   :  { %v1530_v63 = vpop.permute.xlu1 %1529 }
 0xd9b   :  { %v1532_v2 = vmul.f32 %v1530_v63, %v1527_v62 }
 0xd9d   :  { %v1534_v3 = vadd.f32 %v1533_v0, %v1532_v2 }
 0xd9f   :  { %v4078_v4 = vsel %vm1204_vm13, %v1534_v3, 0.0 }
 0xda0   :  { %1537 = vrot.lane.b32.xlu1 %v4078_v4, %s3601_s1 }
 0xda8   :  { %v1422_v6 = vpop.permute.xlu0 %1421 }
 0xda9   :  { %v1424_v8 = vmul.f32 %v1422_v6, %v1419_v49 }
 0xdab   :  { %v1426_v13 = vadd.f32 %v1425_v7, %v1424_v8 }
 0xdad   :  { %v4085_v14 = vsel %vm1318_vm9, %v1426_v13, 0.0  ;;  %vm2732_vm9 = vcmask 519168  }
 0xdae   :  { %1429 = vrot.lane.b32.xlu0 %v4085_v14, %s3601_s1 }
 0xe12   :  { %v1538_v9 = vpop.permute.xlu1 %1537 }
 0xe13   :  { %1541 = vst.msk [vmem:[#allocation5 + $0xc] sm:$0xf] %vm520_vm7, %v1538_v9  ;;  %3070 = vmatmul.mubr.msk.f32.vlgmr.msra.gmra.mrb[16].mxu1 %vm401_vm8, %v1538_v9 }
 0xe14   :  { %3232 = vmatpush3.bf16.msra.mxu1 %v3798_v22  ;;  %3091 = vmatprep.mubr.msk.f32.mxu1 %vm3598_vm1, %v3599_v21 }
 0xe15   :  { %3233 = vmatprep.subr.bf16.mxu1 %v3597_v12 }
 0xe18   :  { %3235 = vmatpush3.bf16.msra.mxu1 %v3808_v25 }
 0xe19   :  { %3242 = vmatprep.subr.bf16.mxu1 %v3597_v12 }
 0xe20   :  { %v1430_v5 = vpop.permute.xlu0 %1429 }
 0xe21   :  { %1433 = vst.msk [vmem:[#allocation4 + $0x10] sm:$0xf] %vm520_vm7, %v1430_v5  ;;  %3059 = vmatmul.mubr.msk.f32.vlgmr.msra.gmra.mrb[12].mxu0 %vm401_vm8, %v1430_v5 }
 0xe22   :  { %3226 = vmatpush3.bf16.msra.mxu0 %v3771_v10  ;;  %3080 = vmatprep.mubr.msk.f32.mxu0 %vm3598_vm1, %v3599_v21 }
 0xe23   :  { %3227 = vmatprep.subr.bf16.mxu0 %v3597_v12 }
 0xe26   :  { %3229 = vmatpush3.bf16.msra.mxu0 %v3784_v17 }
 0xe27   :  { %3236 = vmatprep.subr.bf16.mxu0 %v3597_v12 }
 0xee6   :  { %v1720_v15 = vpop.f32.mrb[16].mxu1 }
 0xee7   :  { %v3071_v18 = vpop.f32.mrb[17].mxu1  ;;  %v1731_v20 = vadd.f32 %v1720_v15, %v3844_v48  ;;  %v1724_v28 = vadd.f32 %v1720_v15, %v1651_v31 }
 0xee9   :  { %1733 = vrot.lane.b32.xlu1 %v1731_v20, %s3592_s6  ;;  %v2785_v33 = vmul.f32 -1.442695, %v1724_v28 }
 0xeeb   :  { %3361 = vpow2.f32 %v2785_v33 }
 0xef4   :  { %v1612_v24 = vpop.f32.mrb[12].mxu0 }
 0xef5   :  { %v3060_v16 = vpop.f32.mrb[13].mxu0  ;;  %v1623_v30 = vadd.f32 %v1612_v24, %v3849_v53  ;;  %v1616_v37 = vadd.f32 %v1612_v24, %v1543_v34  ;;  %v3362_v29 = vpop.eup %3361 }
 0xef6   :  { %v1728_v36 = vadd.f32 1.0, %v3362_v29 }
 0xef7   :  { %1625 = vrot.lane.b32.xlu0 %v1623_v30, %s3592_s6  ;;  %v2783_v38 = vmul.f32 -1.442695, %v1616_v37 }
 0xef9   :  { %3363 = vpow2.f32 %v2783_v38 }
 0xefa   :  { %3365 = vrcp.f32 %v1728_v36 }
 0xf03   :  { %v3364_v39 = vpop.eup %3363 }
 0xf04   :  { %v3366_v40 = vpop.eup %3365  ;;  %v1620_v41 = vadd.f32 1.0, %v3364_v39 }
 0xf05   :  { %v1743_v55 = vsub.f32 1.0, %v3366_v40  ;;  %v1749_v57 = vmul.f32 %v3366_v40, %v4078_v4 }
 0xf06   :  { %3367 = vrcp.f32 %v1620_v41 }
 0xf10   :  { %v3368_v44 = vpop.eup %3367 }
 0xf11   :  { %v1635_v61 = vsub.f32 1.0, %v3368_v44  ;;  %v1641_v63 = vmul.f32 %v3368_v44, %v4085_v14  ;;  %v1759_v14 = vld [vmem:[#allocation2 + $0x18] sm:$0xf] }
 0xf5b   :  { %v1734_v42 = vpop.permute.xlu1 %1733 }
 0xf5c   :  { %v1736_v43 = vmul.f32 %v3366_v40, %v1734_v42 }
 0xf5e   :  { %1738 = vrot.lane.b32.xlu1 %v1736_v43, %s3592_s6 }
 0xf69   :  { %v1626_v45 = vpop.permute.xlu0 %1625 }
 0xf6a   :  { %v1628_v46 = vmul.f32 %v3368_v44, %v1626_v45 }
 0xf6c   :  { %1630 = vrot.lane.b32.xlu0 %v1628_v46, %s3592_s6 }
 0xfd0   :  { %v1739_v47 = vpop.permute.xlu1 %1738 }
 0xfd1   :  { %v1741_v50 = vadd.f32 %v1739_v47, %v1651_v31 }
 0xfd3   :  { %3369 = vtanh.f32 %v1741_v50 }
 0xfdd   :  { %v3370_v51 = vpop.eup %3369 }
 0xfde   :  { %v1631_v26 = vpop.permute.xlu0 %1630  ;;  %1745 = vrot.lane.b32.xlu1 %v3370_v51, %s3601_s1 }
 0xfdf   :  { %v1633_v52 = vadd.f32 %v1631_v26, %v1543_v34 }
 0xfe1   :  { %3371 = vtanh.f32 %v1633_v52 }
 0xfeb   :  { %v3372_v54 = vpop.eup %3371 }
 0xfec   :  { %1637 = vrot.lane.b32.xlu0 %v3372_v54, %s3601_s1 }
0x1050   :  { %v1746_v56 = vpop.permute.xlu1 %1745 }
0x1051   :  { %v1748_v58 = vmul.f32 %v1746_v56, %v1743_v55 }
0x1053   :  { %v1750_v59 = vadd.f32 %v1749_v57, %v1748_v58 }
0x1055   :  { %v4116_v60 = vsel %vm976_vm0, %v1750_v59, 0.0  ;;  %v2082_v59 = vld [vmem:[#allocation3] sm:$0xf] }
0x1056   :  { %1753 = vrot.lane.b32.xlu1 %v4116_v60, %s3601_s1 }
0x105e   :  { %v1638_v62 = vpop.permute.xlu0 %1637 }
0x105f   :  { %v1640_v0 = vmul.f32 %v1638_v62, %v1635_v61  ;;  %v1975_v62 = vld [vmem:[#allocation2 + $0x1c] sm:$0xf] }
0x1061   :  { %v1642_v2 = vadd.f32 %v1641_v63, %v1640_v0 }
0x1063   :  { %v4123_v3 = vsel %vm1090_vm15, %v1642_v2, 0.0 }
0x1064   :  { %1645 = vrot.lane.b32.xlu0 %v4123_v3, %s3601_s1 }
0x10c8   :  { %v1754_v4 = vpop.permute.xlu1 %1753 }
0x10c9   :  { %1757 = vst.msk [vmem:[#allocation5 + $0x8] sm:$0xf] %vm520_vm7, %v1754_v4  ;;  %3092 = vmatmul.mubr.msk.f32.vlgmr.msra.gmra.mrb[18].mxu1 %vm401_vm8, %v1754_v4 }
0x10ca   :  { %3244 = vmatpush3.bf16.msra.mxu1 %v3798_v22  ;;  %3113 = vmatprep.mubr.msk.f32.mxu1 %vm3598_vm1, %v3599_v21 }
0x10cb   :  { %3245 = vmatprep.subr.bf16.mxu1 %v3597_v12 }
0x10ce   :  { %3247 = vmatpush3.bf16.msra.mxu1 %v3808_v25 }
0x10d6   :  { %v1646_v11 = vpop.permute.xlu0 %1645 }
0x10d7   :  { %1649 = vst.msk [vmem:[#allocation4 + $0x14] sm:$0xf] %vm520_vm7, %v1646_v11  ;;  %3081 = vmatmul.mubr.msk.f32.vlgmr.msra.gmra.mrb[14].mxu0 %vm401_vm8, %v1646_v11 }
0x10d8   :  { %3238 = vmatpush3.bf16.msra.mxu0 %v3771_v10  ;;  %3102 = vmatprep.mubr.msk.f32.mxu0 %vm3598_vm1, %v3599_v21  ;;  %v1867_v10 = vld [vmem:[#allocation3 + $0x4] sm:$0xf]  ;;  %vm2448_vm1 = vcmask 523264  }
0x10d9   :  { %3239 = vmatprep.subr.bf16.mxu0 %v3597_v12 }
0x10dc   :  { %3241 = vmatpush3.bf16.msra.mxu0 %v3784_v17 }
0x119c   :  { %v1936_v22 = vpop.f32.mrb[18].mxu1 }
0x119d   :  { %v3093_v23 = vpop.f32.mrb[19].mxu1  ;;  %v1947_v49 = vadd.f32 %v1936_v22, %v3844_v48  ;;  %v1940_v8 = vadd.f32 %v1936_v22, %v1867_v10 }
0x119f   :  { %1949 = vrot.lane.b32.xlu1 %v1947_v49, %s3592_s6  ;;  %v2789_v13 = vmul.f32 -1.442695, %v1940_v8 }
0x11a1   :  { %3373 = vpow2.f32 %v2789_v13 }
0x11aa   :  { %v1828_v25 = vpop.f32.mrb[14].mxu0 }
0x11ab   :  { %v3082_v6 = vpop.f32.mrb[15].mxu0  ;;  %v1839_v7 = vadd.f32 %v1828_v25, %v3849_v53  ;;  %v1832_v12 = vadd.f32 %v1828_v25, %v1759_v14  ;;  %v3374_v9 = vpop.eup %3373 }
0x11ac   :  { %v1944_v5 = vadd.f32 1.0, %v3374_v9  ;;  %v2209_v9 = vld [vmem:[#allocation15 + $0x8] sm:$0xff] }
0x11ad   :  { %1841 = vrot.lane.b32.xlu0 %v1839_v7, %s3592_s6  ;;  %v2787_v17 = vmul.f32 -1.442695, %v1832_v12  ;;  %v2208_v12 = vld [vmem:[#allocation15] sm:$0xff] }
0x11af   :  { %3375 = vpow2.f32 %v2787_v17  ;;  %v2210_v17 = vld [vmem:[#allocation15 + $0x10] sm:$0xff] }
0x11b0   :  { %3377 = vrcp.f32 %v1944_v5  ;;  %v3248_v5 = vpack.c.bf16 %v2209_v9, %v2208_v12 }
0x11b2   :  { %3249 = vmatprep.subr.bf16.mxu0 %v3248_v5 }
0x11b9   :  { %v3376_v15 = vpop.eup %3375 }
0x11ba   :  { %v3378_v18 = vpop.eup %3377  ;;  %v1836_v20 = vadd.f32 1.0, %v3376_v15  ;;  %v2211_v15 = vld [vmem:[#allocation15 + $0x18] sm:$0xff] }
0x11bb   :  { %v1959_v39 = vsub.f32 1.0, %v3378_v18  ;;  %v1965_v41 = vmul.f32 %v3378_v18, %v4116_v60 }
0x11bc   :  { %3379 = vrcp.f32 %v1836_v20 }
0x11c6   :  { %v3380_v30 = vpop.eup %3379 }
0x11c7   :  { %v1851_v45 = vsub.f32 1.0, %v3380_v30  ;;  %v1857_v47 = vmul.f32 %v3380_v30, %v4123_v3 }
0x1211   :  { %v1950_v24 = vpop.permute.xlu1 %1949 }
0x1212   :  { %v1952_v16 = vmul.f32 %v3378_v18, %v1950_v24  ;;  %v3252_v18 = vpack.c.bf16 %v2211_v15, %v2210_v17 }
0x1214   :  { %1954 = vrot.lane.b32.xlu1 %v1952_v16, %s3592_s6 }
0x121f   :  { %v1842_v31 = vpop.permute.xlu0 %1841 }
0x1220   :  { %v1844_v28 = vmul.f32 %v3380_v30, %v1842_v31  ;;  %v2204_v31 = vld [vmem:[%s4360_s10] sm:$0xff] }
0x1222   :  { %1846 = vrot.lane.b32.xlu0 %v1844_v28, %s3592_s6  ;;  %v2205_v28 = vld [vmem:[%s4360_s10 + $0x8] sm:$0xff] }
0x1286   :  { %v1955_v33 = vpop.permute.xlu1 %1954 }
0x1287   :  { %v1957_v34 = vadd.f32 %v1955_v33, %v1867_v10  ;;  %v3256_v33 = vpack.c.bf16 %v2205_v28, %v2204_v31  ;;  %v3602_v31 = vmov 839922192  }
0x1288   :  { %v2466_v28 = vunpack.c.l.s4 %v3602_v31 }
0x1289   :  { %3381 = vtanh.f32 %v1957_v34 }
0x1293   :  { %v3382_v37 = vpop.eup %3381 }
0x1294   :  { %v1847_v29 = vpop.permute.xlu0 %1846  ;;  %1961 = vrot.lane.b32.xlu1 %v3382_v37, %s3601_s1 }
0x1295   :  { %v1849_v38 = vadd.f32 %v1847_v29, %v1759_v14 }
0x1297   :  { %3383 = vtanh.f32 %v1849_v38 }
0x12a1   :  { %v3384_v36 = vpop.eup %3383 }
0x12a2   :  { %1853 = vrot.lane.b32.xlu0 %v3384_v36, %s3601_s1 }
0x1306   :  { %v1962_v40 = vpop.permute.xlu1 %1961 }
0x1307   :  { %v1964_v42 = vmul.f32 %v1962_v40, %v1959_v39 }
0x1309   :  { %v1966_v43 = vadd.f32 %v1965_v41, %v1964_v42 }
0x130b   :  { %v4152_v44 = vsel %vm748_vm12, %v1966_v43, 0.0  ;;  %v4190_v43 = vld [vmem:[#allocation5 + $0x8] sm:$0xf] }
0x130c   :  { %1969 = vrot.lane.b32.xlu1 %v4152_v44, %s3601_s1 }
0x1314   :  { %v1854_v46 = vpop.permute.xlu0 %1853 }
0x1315   :  { %v1856_v50 = vmul.f32 %v1854_v46, %v1851_v45 }
0x1317   :  { %v1858_v51 = vadd.f32 %v1857_v47, %v1856_v50  ;;  %v4206_v50 = vld [vmem:[#allocation5 + $0xc] sm:$0xf] }
0x1319   :  { %v4159_v26 = vsel %vm862_vm11, %v1858_v51, 0.0  ;;  %v2221_v51 = vcombine.low %v4190_v43, %v4206_v50 }
0x131a   :  { %1861 = vrot.lane.b32.xlu0 %v4159_v26, %s3601_s1 }
0x137e   :  { %v1970_v52 = vpop.permute.xlu1 %1969 }
0x137f   :  { %1973 = vst.msk [vmem:[#allocation5 + $0x4] sm:$0xf] %vm520_vm7, %v1970_v52  ;;  %3114 = vmatmul.mubr.msk.f32.vlgmr.msra.gmra.mrb[20].mxu1 %vm401_vm8, %v1970_v52 }
0x1386   :  { %v4200_v46 = vld [vmem:[#allocation5 + $0x4] sm:$0xf] }
0x138c   :  { %v1862_v32 = vpop.permute.xlu0 %1861 }
0x138d   :  { %1865 = vst.msk [vmem:[#allocation4 + $0x18] sm:$0xf] %vm520_vm7, %v1862_v32  ;;  %3103 = vmatmul.mubr.msk.f32.vlgmr.msra.gmra.mrb[16].mxu0 %vm401_vm8, %v1862_v32 }
0x138e   :  { %3251 = vmatpush3.bf16.msra.mxu0 %v3248_v5 }
0x138f   :  { %3253 = vmatprep.subr.bf16.mxu0 %v3252_v18 }
0x1392   :  { %3255 = vmatpush3.bf16.msra.mxu0 %v3252_v18 }
0x1393   :  { %3257 = vmatprep.subr.bf16.mxu0 %v3256_v33 }
0x1452   :  { %v2151_v54 = vpop.f32.mrb[20].mxu1 }
0x1453   :  { %v3115_v55 = vpop.f32.mrb[21].mxu1  ;;  %v2162_v56 = vadd.f32 %v2151_v54, %v3844_v48  ;;  %v2155_v60 = vadd.f32 %v2151_v54, %v2082_v59  ;;  %v4215_v54 = vld [vmem:[#allocation5 + $0x18] sm:$0xf] }
0x1454   :  { %v4218_v55 = vld [vmem:[#allocation4 + $0x4] sm:$0xf] }
0x1455   :  { %2164 = vrot.lane.b32.xlu1 %v2162_v56, %s3592_s6  ;;  %v2793_v61 = vmul.f32 -1.442695, %v2155_v60  ;;  %v4221_v56 = vld [vmem:[#allocation5 + $0x1c] sm:$0xf]  ;;  %v4230_v60 = vld [vmem:[#allocation4 + $0xc] sm:$0xf] }
0x1457   :  { %3385 = vpow2.f32 %v2793_v61  ;;  %v4233_v61 = vld [vmem:[#allocation4 + $0x14] sm:$0xf] }
0x1460   :  { %v2044_v19 = vpop.f32.mrb[16].mxu0 }
0x1461   :  { %v3104_v57 = vpop.f32.mrb[17].mxu0  ;;  %v2055_v58 = vadd.f32 %v2044_v19, %v3849_v53  ;;  %v2048_v63 = vadd.f32 %v2044_v19, %v1975_v62  ;;  %v3386_v0 = vpop.eup %3385 }
0x1462   :  { %v2159_v3 = vadd.f32 1.0, %v3386_v0  ;;  %v2223_v57 = vcombine.low %v4215_v54, %v4221_v56  ;;  %v4240_v0 = vld [vmem:[#allocation4 + $0x10] sm:$0xf] }
0x1463   :  { %2057 = vrot.lane.b32.xlu0 %v2055_v58, %s3592_s6  ;;  %v2791_v2 = vmul.f32 -1.442695, %v2048_v63  ;;  %v4225_v58 = vld [vmem:[#allocation4] sm:$0xf] }
0x1465   :  { %3387 = vpow2.f32 %v2791_v2  ;;  %v2327_v2 = vcombine.low %v4240_v0, %v4233_v61 }
0x1466   :  { %3389 = vrcp.f32 %v2159_v3  ;;  %v4246_v3 = vld [vmem:[#allocation4 + $0x18] sm:$0xf] }
0x146f   :  { %v3388_v48 = vpop.eup %3387 }
0x1470   :  { %v3390_v4 = vpop.eup %3389  ;;  %v2052_v11 = vadd.f32 1.0, %v3388_v48 }
0x1471   :  { %v2174_v20 = vsub.f32 1.0, %v3390_v4  ;;  %v2180_v16 = vmul.f32 %v3390_v4, %v4152_v44  ;;  %v2207_v44 = vld [vmem:[%s4360_s10 + $0x18] sm:$0xff] }
0x1472   :  { %3391 = vrcp.f32 %v2052_v11  ;;  %v3260_v52 = vpack.c.bf16 %v2207_v44, %v2206_v35  ;;  %v2802_v11 = vld [vmem:[%s4362_s12] ss:$0 sm:$0xff]  ;;  %s3604_s12 = smov 32  }
0x147c   :  { %v3392_v53 = vpop.eup %3391 }
0x147d   :  { %v2067_v29 = vsub.f32 1.0, %v3392_v53  ;;  %v2073_v36 = vmul.f32 %v3392_v53, %v4159_v26  ;;  %v4210_v26 = vld [vmem:[#allocation5 + $0x14] sm:$0xf] }
0x147e   :  { %v2222_v32 = vcombine.low %v4202_v27, %v4210_v26 }
0x14c7   :  { %v2165_v22 = vpop.permute.xlu1 %2164 }
0x14c8   :  { %v2167_v23 = vmul.f32 %v3390_v4, %v2165_v22 }
0x14ca   :  { %2169 = vrot.lane.b32.xlu1 %v2167_v23, %s3592_s6 }
0x14d5   :  { %v2058_v49 = vpop.permute.xlu0 %2057 }
0x14d6   :  { %v2060_v25 = vmul.f32 %v3392_v53, %v2058_v49 }
0x14d8   :  { %2062 = vrot.lane.b32.xlu0 %v2060_v25, %s3592_s6 }
0x153c   :  { %v2170_v6 = vpop.permute.xlu1 %2169 }
0x153d   :  { %v2172_v7 = vadd.f32 %v2170_v6, %v2082_v59  ;;  %v2325_v59 = vcombine.low %v4225_v58, %v4218_v55 }
0x153f   :  { %3393 = vtanh.f32 %v2172_v7 }
0x1549   :  { %v3394_v10 = vpop.eup %3393 }
0x154a   :  { %v2063_v8 = vpop.permute.xlu0 %2062  ;;  %2176 = vrot.lane.b32.xlu1 %v3394_v10, %s3601_s1 }
0x154b   :  { %v2065_v13 = vadd.f32 %v2063_v8, %v1975_v62  ;;  %v4236_v62 = vld [vmem:[#allocation4 + $0x8] sm:$0xf]  ;;  %v2803_v8 = vld [vmem:[%s4363_s13] ss:$0 sm:$0xff]  ;;  %s3605_s13 = smov [#allocation17]  }
0x154c   :  { %v2326_v63 = vcombine.low %v4236_v62, %v4230_v60  ;;  %s2740_s22 = sshll.u32 %s3605_s13, 4  ;;  %s2741_s22 = int_to_ptr.vmem [resolvable:$true] %s2740_s22 }
0x154d   :  { %3395 = vtanh.f32 %v2065_v13  ;;  %s3555_s2 = scalar_lea.vmem %s2741_s22, 64  ;;  %p3560_p7 = scmp.lt.s32.totalorder %s2741_s22, %s2741_s22 }
0x154e   :  { %p3556_p6 = scmp.ne.s32.totalorder %s2741_s22, %s3555_s2  ;;  %p3561_p8 = scmp.lt.s32.totalorder %s3555_s2, %s3555_s2 }
0x1550   :  { %p3562_p9 = por %p3561_p8, %p3560_p7 }
0x1552   :  { %p3563_p10 = pnand %p3562_p9, %p3556_p6 }
0x1557   :  { %v3396_v14 = vpop.eup %3395 }
0x1558   :  { %2069 = vrot.lane.b32.xlu0 %v3396_v14, %s3601_s1 }
0x15bc   :  { %v2177_v24 = vpop.permute.xlu1 %2176 }
0x15bd   :  { %v2179_v30 = vmul.f32 %v2177_v24, %v2174_v20 }
0x15bf   :  { %v2181_v34 = vadd.f32 %v2180_v16, %v2179_v30 }
0x15c1   :  { %v2182_v37 = vsel %vm514_vm6, %v2181_v34, 0.0  ;;  %v3603_v34 = vmov 1985246804   ;;  %vm4370_vm6 = vcmp.gt.s32.totalorder %v3857_v1, 7 }
0x15c2   :  { %2184 = vrot.lane.b32.xlu1 %v2182_v37, %s3601_s1  ;;  %v2473_v37 = vunpack.c.l.s4 %v3603_v34 }
0x15ca   :  { %v2070_v38 = vpop.permute.xlu0 %2069 }
0x15cb   :  { %v2072_v39 = vmul.f32 %v2070_v38, %v2067_v29  ;;  %v2467_v29 = vunpack.c.0.s8 %v2466_v28 }
0x15cd   :  { %v2074_v40 = vadd.f32 %v2073_v36, %v2072_v39  ;;  %v2474_v36 = vunpack.c.0.s8 %v2473_v37 }
0x15cf   :  { %v2075_v41 = vsel %vm634_vm5, %v2074_v40, 0.0  ;;  %vm2561_vm5 = vcmask 3072  }
0x15d0   :  { %2077 = vrot.lane.b32.xlu0 %v2075_v41, %s3601_s1 }
0x1634   :  { %v2185_v42 = vpop.permute.xlu1 %2184 }
0x1635   :  { %2187 = vst.msk [vmem:[#allocation5] sm:$0xf] %vm520_vm7, %v2185_v42 }
0x163c   :  { %v4198_v45 = vld [vmem:[#allocation5] sm:$0xf] }
0x163d   :  { %v2220_v47 = vcombine.low %v4198_v45, %v4200_v46 }
0x163f   :  { %3124 = vmatprep.mubr.msk.f32.mxu0 %vm401_vm8, %v2220_v47 }
0x1640   :  { %3125 = vmatmul.mubr.msk.f32.vlgmr.msra.gmra.mrb[18].mxu0 %vm401_vm8, %v2221_v51 }
0x1641   :  { %3259 = vmatpush3.bf16.msra.mxu0 %v3256_v33  ;;  %3127 = vmatprep.mubr.msk.f32.mxu0 %vm401_vm8, %v2222_v32  ;;  %v2468_v33 = vlaneseq }
0x1642   :  { %v2078_v19 = vpop.permute.xlu0 %2077  ;;  %3261 = vmatprep.subr.bf16.mxu0 %v3260_v52 }
0x1643   :  { %2081 = vst.msk [vmem:[#allocation4 + $0x1c] sm:$0xf] %vm520_vm7, %v2078_v19  ;;  %v2469_v38 = vshrl.u32 %v2468_v33, 7 }
0x1644   :  { %3128 = vmatmul.mubr.msk.f32.gmra.mrb[20].mxu0 %vm401_vm8, %v2223_v57 }
0x1645   :  { %3263 = vmatpush3.bf16.msra.mxu0 %v3260_v52  ;;  %3138 = vmatprep.mubr.msk.f32.mxu0 %vm401_vm8, %v2325_v59  ;;  %v4259_v39 = vsub.s32 %v2467_v29, %v2469_v38  ;;  %v2477_v40 = vsub.s32 %v2474_v36, %v2469_v38 }
0x1648   :  { %3139 = vmatmul.mubr.msk.f32.vlgmr.msra.gmra.mrb[18].mxu0 %vm401_vm8, %v2326_v63 }
0x1649   :  { %3141 = vmatprep.mubr.msk.f32.mxu0 %vm401_vm8, %v2327_v2 }
0x164a   :  { %v4248_v48 = vld [vmem:[#allocation4 + $0x1c] sm:$0xf] }
0x164b   :  { %v2328_v4 = vcombine.low %v4246_v3, %v4248_v48 }
0x164d   :  { %3142 = vmatmul.mubr.msk.f32.gmra.mrb[20].mxu0 %vm401_vm8, %v2328_v4 }
0x171b   :  { %v3140_v22 = vpop.f32.mrb[18].mxu0 }
0x171c   :  { %v2430_v23 = vadd.f32 %v3140_v22, %v2802_v11  ;;  %v2403_v53 = vpop.f32.mrb[19].mxu0 }
0x171d   :  { %v2429_v49 = vadd.f32 %v2802_v11, %v2403_v53 }
0x171e   :  { %3397 = vtanh.f32 %v2430_v23 }
0x171f   :  { %3399 = vtanh.f32 %v2429_v49 }
0x1720   :  { %v3143_v25 = vpop.f32.mrb[20].mxu0 }
0x1721   :  { %v2432_v6 = vadd.f32 %v3143_v25, %v2802_v11  ;;  %v2413_v7 = vpop.f32.mrb[21].mxu0 }
0x1722   :  { %v2431_v10 = vadd.f32 %v2802_v11, %v2413_v7  ;;  %v2804_v7 = vsel %vm399_vm4, 1.0, %v3599_v21  ;;  %vm4368_vm4 = vcmp.gt.s32.totalorder %v3857_v1, 5 }
0x1723   :  { %3401 = vtanh.f32 %v2432_v6  ;;  %v2809_v31 = vsel %vm4368_vm4, 1.0, %v3599_v21 }
0x1724   :  { %3403 = vtanh.f32 %v2431_v10 }
0x1728   :  { %v3398_v13 = vpop.eup %3397 }
0x1729   :  { %v3400_v14 = vpop.eup %3399  ;;  %v2445_v12 = vmul.f32 %v3398_v13, %v2803_v8  ;;  %v2806_v13 = vsel %vm870_vm14, 1.0, %v3599_v21 }
0x172a   :  { %v2444_v9 = vmul.f32 %v3400_v14, %v2803_v8 }
0x172b   :  { %v2452_v17 = vsel %vm2448_vm1, %v2445_v12, 0.0 }
0x172c   :  { %2453 = vadd.xlane.f32.xlu0 %v2452_v17  ;;  %v2449_v5 = vsel %vm2448_vm1, %v2444_v9, 0.0  ;;  %v2807_v9 = vsel %vm1098_vm3, 1.0, %v3599_v21  ;;  %vm4369_vm3 = vcmp.gt.s32.totalorder %v3857_v1, 6 }
0x172d   :  { %v3402_v15 = vpop.eup %3401  ;;  %2450 = vadd.xlane.f32.xlu1 %v2449_v5  ;;  %v2810_v38 = vsel %vm4369_vm3, 1.0, %v3599_v21 }
0x172e   :  { %v3404_v18 = vpop.eup %3403  ;;  %v2447_v20 = vmul.f32 %v3402_v15, %v2803_v8 }
0x172f   :  { %v2446_v24 = vmul.f32 %v3404_v18, %v2803_v8  ;;  %v2805_v8 = vsel %vm642_vm10, 1.0, %v3599_v21  ;;  %v2808_v18 = vsel %vm1212_vm2, 1.0, %v3599_v21 }
0x1730   :  { %v2458_v16 = vsel %vm2448_vm1, %v2447_v20, 0.0 }
0x1731   :  { %2459 = vadd.xlane.f32.xlu1 %v2458_v16  ;;  %v2455_v30 = vsel %vm2448_vm1, %v2446_v24, 0.0 }
0x1732   :  { %2456 = vadd.xlane.f32.xlu0 %v2455_v30 }
0x17b9   :  { %v2454_v41 = vpop.xlane.xlu0 %2453 }
0x17ba   :  { %v2485_v42 = vrot.slane %v2454_v41, %v4259_v39  ;;  %v2492_v35 = vrot.slane %v2454_v41, %v2477_v40  ;;  %v2451_v44 = vpop.xlane.xlu1 %2450 }
0x17bb   :  { %v2471_v47 = vrot.slane %v2451_v44, %v4259_v39  ;;  %v2478_v51 = vrot.slane %v2451_v44, %v2477_v40  ;;  %v2811_v44 = vsel %vm4370_vm6, 1.0, %v3599_v21 }
0x17bc   :  { %v2533_v52 = vmul.f32 1.442695, %v2485_v42  ;;  %v2535_v32 = vmul.f32 1.442695, %v2492_v35 }
0x17bd   :  { %v2529_v19 = vmul.f32 1.442695, %v2471_v47  ;;  %v2531_v57 = vmul.f32 1.442695, %v2478_v51 }
0x17be   :  { %3405 = vpow2.f32 %v2533_v52  ;;  %v2460_v59 = vpop.xlane.xlu1 %2459 }
0x17bf   :  { %3407 = vpow2.f32 %v2535_v32  ;;  %v2513_v63 = vrot.slane %v2460_v59, %v4259_v39  ;;  %v2457_v2 = vpop.xlane.xlu0 %2456  ;;  %v2520_v22 = vrot.slane %v2460_v59, %v2477_v40 }
0x17c0   :  { %3409 = vpow2.f32 %v2529_v19  ;;  %v2499_v4 = vrot.slane %v2457_v2, %v4259_v39  ;;  %v2506_v11 = vrot.slane %v2457_v2, %v2477_v40 }
0x17c1   :  { %3411 = vpow2.f32 %v2531_v57  ;;  %v2541_v49 = vmul.f32 1.442695, %v2513_v63  ;;  %v2543_v25 = vmul.f32 1.442695, %v2520_v22 }
0x17c2   :  { %v2537_v23 = vmul.f32 1.442695, %v2499_v4  ;;  %v2539_v53 = vmul.f32 1.442695, %v2506_v11 }
0x17c4   :  { %3413 = vpow2.f32 %v2537_v23 }
0x17c5   :  { %3415 = vpow2.f32 %v2539_v53 }
0x17c6   :  { %3417 = vpow2.f32 %v2541_v49 }
0x17c7   :  { %3419 = vpow2.f32 %v2543_v25 }
0x17c8   :  { %v3406_v6 = vpop.eup %3405 }
0x17c9   :  { %v3408_v10 = vpop.eup %3407  ;;  %v2555_v15 = vmul.f32 %v3406_v6, %v2806_v13 }
0x17ca   :  { %v3410_v14 = vpop.eup %3409  ;;  %v2556_v16 = vmul.f32 %v3408_v10, %v2807_v9 }
0x17cb   :  { %v3412_v12 = vpop.eup %3411  ;;  %v2553_v17 = vmul.f32 %v3410_v14, %v2804_v7  ;;  %v2565_v34 = vsel %vm2561_vm5, %v2555_v15, 0.0 }
0x17cc   :  { %v2554_v5 = vmul.f32 %v3412_v12, %v2805_v8  ;;  %v2567_v40 = vsel %vm2561_vm5, %v2556_v16, 0.0 }
0x17cd   :  { %v2562_v20 = vsel %vm2561_vm5, %v2553_v17, 0.0  ;;  %2580 = vperm.xlu0 %3287, %v2553_v17  }
0x17ce   :  { %v2563_v24 = vsel %vm2561_vm5, %v2554_v5, 0.0  ;;  %2592 = vperm.xlu1 %3288, %v2554_v5   ;;  %v3414_v30 = vpop.eup %3413 }
0x17cf   :  { %v2564_v28 = vadd.f32 %v2563_v24, %v2562_v20  ;;  %v3416_v33 = vpop.eup %3415  ;;  %v2557_v37 = vmul.f32 %v3414_v30, %v2808_v18 }
0x17d0   :  { %v3418_v29 = vpop.eup %3417  ;;  %v2558_v41 = vmul.f32 %v3416_v33, %v2809_v31 }
0x17d1   :  { %v2566_v36 = vadd.f32 %v2565_v34, %v2564_v28  ;;  %2616 = vperm.xlu0 %3287, %v2556_v16   ;;  %v2569_v42 = vsel %vm2561_vm5, %v2557_v37, 0.0  ;;  %v3420_v35 = vpop.eup %3419  ;;  %v2559_v51 = vmul.f32 %v3418_v29, %v2810_v38 }
0x17d2   :  { %2604 = vperm.xlu1 %3288, %v2555_v15   ;;  %v2571_v32 = vsel %vm2561_vm5, %v2558_v41, 0.0  ;;  %v2560_v19 = vmul.f32 %v3420_v35, %v2811_v44 }
0x17d3   :  { %v2568_v47 = vadd.f32 %v2567_v40, %v2566_v36  ;;  %v2573_v59 = vsel %vm2561_vm5, %v2559_v51, 0.0 }
0x17d4   :  { %v2575_v2 = vsel %vm2561_vm5, %v2560_v19, 0.0 }
0x17d5   :  { %2640 = vperm.xlu0 %3287, %v2558_v41   ;;  %v2570_v52 = vadd.f32 %v2569_v42, %v2568_v47 }
0x17d6   :  { %2628 = vperm.xlu1 %3288, %v2557_v37  }
0x17d7   :  { %v2572_v57 = vadd.f32 %v2571_v32, %v2570_v52 }
0x17d9   :  { %2664 = vperm.xlu0 %3287, %v2560_v19   ;;  %v2574_v63 = vadd.f32 %v2573_v59, %v2572_v57 }
0x17da   :  { %2652 = vperm.xlu1 %3288, %v2559_v51  }
0x17db   :  { %v2576_v4 = vadd.f32 %v2575_v2, %v2574_v63 }
0x17dd   :  { %v2577_v11 = vadd.f32 0.0001, %v2576_v4 }
0x17df   :  { %2727 = vperm.xlu1 %3288, %v2577_v11  }
0x184c   :  { %v2581_v21 = vpop.permute.xlu0 %2580 }
0x184d   :  { %v2593_v1 = vpop.permute.xlu1 %2592  ;;  %v2589_v22 = vrot.slane %v2581_v21, %v4259_v39 }
0x184e   :  { %v2601_v23 = vrot.slane %v2593_v1, %v4259_v39 }
0x184f   :  { %v2674_v53 = vmul.f32 %v2589_v22, %v4225_v58  ;;  %v2697_v49 = vmul.f32 %v2589_v22, %v4198_v45 }
0x1850   :  { %v2675_v25 = vmul.f32 %v2601_v23, %v4218_v55  ;;  %v2698_v6 = vmul.f32 %v2601_v23, %v4200_v46  ;;  %v2617_v7 = vpop.permute.xlu0 %2616 }
0x1851   :  { %v2682_v10 = vsel %vm520_vm7, %v2674_v53, 0.0  ;;  %v2605_v8 = vpop.permute.xlu1 %2604  ;;  %v2625_v13 = vrot.slane %v2617_v7, %v4259_v39  ;;  %v2705_v9 = vsel %vm520_vm7, %v2697_v49, 0.0 }
0x1852   :  { %v2683_v14 = vsel %vm520_vm7, %v2675_v25, 0.0  ;;  %v2706_v12 = vsel %vm520_vm7, %v2698_v6, 0.0  ;;  %v2613_v58 = vrot.slane %v2605_v8, %v4259_v39 }
0x1853   :  { %v2684_v17 = vadd.f32 %v2683_v14, %v2682_v10  ;;  %v2677_v46 = vmul.f32 %v2625_v13, %v4230_v60  ;;  %v2700_v5 = vmul.f32 %v2625_v13, %v4206_v50  ;;  %v2707_v18 = vadd.f32 %v2706_v12, %v2705_v9 }
0x1854   :  { %v2676_v45 = vmul.f32 %v2613_v58, %v4236_v62  ;;  %v2699_v55 = vmul.f32 %v2613_v58, %v4190_v43  ;;  %v2641_v15 = vpop.permute.xlu0 %2640 }
0x1855   :  { %v2629_v20 = vpop.permute.xlu1 %2628  ;;  %v2649_v24 = vrot.slane %v2641_v15, %v4259_v39  ;;  %v2687_v60 = vsel %vm520_vm7, %v2677_v46, 0.0  ;;  %v2710_v50 = vsel %vm520_vm7, %v2700_v5, 0.0 }
0x1856   :  { %v2685_v16 = vsel %vm520_vm7, %v2676_v45, 0.0  ;;  %v2708_v30 = vsel %vm520_vm7, %v2699_v55, 0.0  ;;  %v2637_v31 = vrot.slane %v2629_v20, %v4259_v39 }
0x1857   :  { %v2686_v28 = vadd.f32 %v2685_v16, %v2684_v17  ;;  %v2709_v33 = vadd.f32 %v2708_v30, %v2707_v18  ;;  %v2679_v62 = vmul.f32 %v2649_v24, %v4233_v61  ;;  %v2702_v43 = vmul.f32 %v2649_v24, %v4210_v26 }
0x1858   :  { %v2678_v34 = vmul.f32 %v2637_v31, %v4240_v0  ;;  %v2701_v37 = vmul.f32 %v2637_v31, %v4202_v27  ;;  %v2665_v29 = vpop.permute.xlu0 %2664 }
0x1859   :  { %v2688_v38 = vadd.f32 %v2687_v60, %v2686_v28  ;;  %v2711_v36 = vadd.f32 %v2710_v50, %v2709_v33  ;;  %v2653_v40 = vpop.permute.xlu1 %2652  ;;  %v2673_v26 = vrot.slane %v2665_v29, %v4259_v39  ;;  %v2691_v47 = vsel %vm520_vm7, %v2679_v62, 0.0 }
0x185a   :  { %v2689_v41 = vsel %vm520_vm7, %v2678_v34, 0.0  ;;  %v2712_v42 = vsel %vm520_vm7, %v2701_v37, 0.0  ;;  %v2661_v61 = vrot.slane %v2653_v40, %v4259_v39  ;;  %v2714_v0 = vsel %vm520_vm7, %v2702_v43, 0.0 }
0x185b   :  { %v2690_v35 = vadd.f32 %v2689_v41, %v2688_v38  ;;  %v2713_v44 = vadd.f32 %v2712_v42, %v2711_v36  ;;  %v2681_v52 = vmul.f32 %v2673_v26, %v4248_v48  ;;  %v2704_v32 = vmul.f32 %v2673_v26, %v4221_v56 }
0x185c   :  { %v2680_v27 = vmul.f32 %v2661_v61, %v4246_v3  ;;  %v2703_v51 = vmul.f32 %v2661_v61, %v4215_v54 }
0x185d   :  { %v2692_v19 = vadd.f32 %v2691_v47, %v2690_v35  ;;  %v2715_v57 = vadd.f32 %v2714_v0, %v2713_v44  ;;  %v2695_v4 = vsel %vm520_vm7, %v2681_v52, 0.0  ;;  %v2718_v11 = vsel %vm520_vm7, %v2704_v32, 0.0 }
0x185e   :  { %v2693_v59 = vsel %vm520_vm7, %v2680_v27, 0.0  ;;  %v2716_v39 = vsel %vm520_vm7, %v2703_v51, 0.0  ;;  %v2728_v54 = vpop.permute.xlu1 %2727 }
0x185f   :  { %v2694_v63 = vadd.f32 %v2693_v59, %v2692_v19  ;;  %v2717_v2 = vadd.f32 %v2716_v39, %v2715_v57  ;;  %3421 = vrcp.f32 %v2728_v54 }
0x1861   :  { %v2696_v21 = vadd.f32 %v2695_v4, %v2694_v63  ;;  %v2719_v3 = vadd.f32 %v2718_v11, %v2717_v2 }
0x1863   :  { %2721 = vrot.lane.b32.xlu0 %v2719_v3, %s3604_s12 }
0x1869   :  { %v3422_v48 = vpop.eup %3421 }
0x18d5   :  { %v2722_v56 = vpop.permute.xlu0 %2721 }
0x18d6   :  { %v2724_v1 = vsel %vm401_vm8, %v2696_v21, %v2722_v56 }
0x18d7   :  { %v2731_v22 = vmul.f32 %v3422_v48, %v2724_v1 }
0x18d9   :  { %2733 = vst.msk [vmem:[#allocation17] sm:$0xf] %vm2732_vm9, %v2731_v22 }
0x18da   :  { %3566 = shalt.err (!%p3563_p10)
}
0x18db   :  { %s3567_s26 = scalar_lea.hbm %s4364_s14, 64 }
0x18dc   :  { %p3568_p11 = scmp.ne.s32.totalorder %s4364_s14, %s3567_s26  ;;  %p3571_p12 = scmp.lt.u32.totalorder %s3567_s26, %s4364_s14 }
0x18de   :  { %p3573_p13 = pnand %p3571_p12, %p3568_p11 }
0x18e0   :  { %3576 = shalt.err (!%p3573_p13)
}
0x18e1   :  { %2743 = dma.vmem_to_hbm [thread:$0]  %s2741_s22, 64, %s4364_s14, [#allocation8]  }
0x18e2   :  { %3585 = dma.done.wait [#allocation8], 64  }
0x18e3   :  { %3586 = vsyncadd [#allocation8], 4294967232 }
0x18e4   :  { %2747 = vsyncpa [#allocation7], 1 }
0x18e5   :  { %2748 = vsyncpa [#allocation10], 1 }
0x18e6   :  { %2749 = vsyncpa [#allocation13], 1 }
0x18e7   :  { %2750 = vsyncpa [#allocation16], 1 }
0x18e8   :  { %2751 = vsyncpa [#allocation8], 1 }

</bundles_post_ra>
